<compile_context>
chip_gen: v6e
topology: v6e:2x2x1
jax: 0.10.0
libtpu: 0.0.40
codegen_flags: <defaults>
</compile_context>

<pallas_src>
import functools

import jax
import jax.numpy as jnp
from jax.experimental import pallas as pl
from jax.experimental.pallas import tpu as pltpu


def _mish_kernel(x_ref, o_ref):
    x = x_ref[...].astype(jnp.float32)
    # Numerically stable softplus: max(x, 0) + log1p(exp(-|x|))  (== logaddexp(x, 0))
    sp = jnp.logaddexp(x, 0.0)
    y = x * jnp.tanh(sp)
    o_ref[...] = y.astype(o_ref.dtype)


@functools.partial(jax.jit, static_argnames=("tm", "tn"))
def mish_pallas(x, tm=256, tn=512):
    """Mish over an arbitrarily-shaped array.

    The array is flattened, zero-padded to a whole number of (tm, tn) tiles,
    processed as a lane-dense 2D slab, and reshaped back.  tn is a multiple
    of 128 (lane width), tm a multiple of 8 (sublane width).
    """
    orig_shape = x.shape
    orig_dtype = x.dtype
    total = x.size

    block_elems = tm * tn
    padded = pl.cdiv(total, block_elems) * block_elems

    xf = x.reshape(-1)
    if padded != total:
        xf = jnp.pad(xf, (0, padded - total))

    M = padded // tn
    x2 = xf.reshape(M, tn)

    grid = (M // tm,)
    spec = pl.BlockSpec((tm, tn), lambda i: (i, 0))

    out = pl.pallas_call(
        _mish_kernel,
        out_shape=jax.ShapeDtypeStruct((M, tn), orig_dtype),
        grid_spec=pl.GridSpec(
            grid=grid,
            in_specs=[spec],
            out_specs=spec,
        ),
        compiler_params=pltpu.CompilerParams(
            dimension_semantics=("parallel",)),
        cost_estimate=pl.CostEstimate(
            flops=5 * padded,                 # mul/add/compare work per element
            transcendentals=3 * padded,       # exp, log1p, tanh per element
            bytes_accessed=2 * padded * jnp.dtype(jnp.float32).itemsize),
    )(x2)

    return out.reshape(-1)[:total].reshape(orig_shape)


def mish_ref(x):
    """Pure-JAX reference mirroring the PyTorch forward exactly."""
    return x * jnp.tanh(jax.nn.softplus(x))


if __name__ == "__main__":
    key = jax.random.PRNGKey(0)
    k0, k1 = jax.random.split(key)

    # Shape consistent with a typical conv-activation use: (B, C, H, W)
    x = jax.random.normal(k0, (2, 4, 16, 16), dtype=jnp.float32) * 3.0

    out = mish_pallas(x)
    out = jax.block_until_ready(out)

    ref = mish_ref(x)
    assert out.shape == x.shape
    assert jnp.allclose(out, ref, atol=1e-5, rtol=1e-5), \
        f"max err {jnp.max(jnp.abs(out - ref))}"

    # Ragged / non-tile-aligned shape exercises the pad-and-trim path.
    x2 = jax.random.normal(k1, (3, 7, 50), dtype=jnp.float32) * 3.0
    out2 = jax.block_until_ready(mish_pallas(x2))
    ref2 = mish_ref(x2)
    assert out2.shape == x2.shape
    assert jnp.allclose(out2, ref2, atol=1e-5, rtol=1e-5), \
        f"max err {jnp.max(jnp.abs(out2 - ref2))}"

    print("KERNEL_OK")
</pallas_src>

<mosaic_0001>
module attributes {stable_mosaic.version = 11 : i64} {
  func.func @_mish_kernel(%arg0: i32, %arg1: memref<256x512xf32, #tpu.memory_space<vmem>>, %arg2: memref<256x512xf32, #tpu.memory_space<vmem>>) attributes {dimension_semantics = [#tpu.dimension_semantics<parallel>], iteration_bounds = array<i64: 1>, scalar_prefetch = 0 : i64, scratch_operands = 0 : i64, tpu.core_type = #tpu.core_type<tc>, window_params = [{transform_indices = @transform_0, window_bounds = array<i64: 256, 512>}, {transform_indices = @transform_1, window_bounds = array<i64: 256, 512>}]} {
    %c0 = arith.constant 0 : index
    %c0_0 = arith.constant 0 : index
    %0 = vector.load %arg1[%c0, %c0_0] : memref<256x512xf32, #tpu.memory_space<vmem>>, vector<256x512xf32>
    %cst = arith.constant 0.000000e+00 : f32
    %1 = vector.broadcast %cst : f32 to vector<256x512xf32>
    %2 = arith.maximumf %0, %1 : vector<256x512xf32>
    %3 = vector.broadcast %cst : f32 to vector<256x512xf32>
    %4 = arith.subf %0, %3 : vector<256x512xf32>
    %5 = arith.cmpf one, %4, %4 : vector<256x512xf32>
    %6 = vector.broadcast %cst : f32 to vector<256x512xf32>
    %7 = arith.addf %0, %6 : vector<256x512xf32>
    %8 = math.absf %4 : vector<256x512xf32>
    %cst_1 = arith.constant 0.000000e+00 : f32
    %9 = vector.broadcast %cst_1 : f32 to vector<256x512xf32>
    %10 = arith.subf %9, %8 : vector<256x512xf32>
    %11 = math.exp %10 : vector<256x512xf32>
    %12 = math.log1p %11 : vector<256x512xf32>
    %13 = arith.addf %2, %12 : vector<256x512xf32>
    %14 = arith.select %5, %7, %13 : vector<256x512xi1>, vector<256x512xf32>
    %15 = math.tanh %14 : vector<256x512xf32>
    %16 = arith.mulf %0, %15 : vector<256x512xf32>
    %c0_2 = arith.constant 0 : index
    %c0_3 = arith.constant 0 : index
    %17 = vector.load %arg2[%c0_2, %c0_3] : memref<256x512xf32, #tpu.memory_space<vmem>>, vector<256x512xf32>
    tpu.vector_store %arg2[%c0_2, %c0_3], %16 {strides = array<i32>} : memref<256x512xf32, #tpu.memory_space<vmem>>, vector<256x512xf32>,
    return
  }
  func.func @transform_0(%arg0: i32) -> (i32, i32) {
    %c0_i32 = arith.constant 0 : i32
    %c0_i32_0 = arith.constant 0 : i32
    return %arg0, %c0_i32 : i32, i32
  }
  func.func @transform_1(%arg0: i32) -> (i32, i32) {
    %c0_i32 = arith.constant 0 : i32
    %c0_i32_0 = arith.constant 0 : i32
    return %arg0, %c0_i32 : i32, i32
  }
}

</mosaic_0001>

<bundles_post_ra>
// kernel: mish_pallas.1
= control target key start
LH: loop header
LB: loop body
LE: loop exit
PB: predicated region body
PF: predicated region fallthrough
CT: control target
= control target key end

     0   :  { %s7324_s0 = inlined_call_operand.vmem [shape: f32[256,512], index: 0, kind: input, shape index: {}]   ;;  %s7325_s1 = inlined_call_operand.vmem [shape: f32[256,512], index: 1, kind: output, shape index: {}]  }
   0x1   :  { %v3609_v0 = vld [vmem:[%s7324_s0] sm:$0xff]  ;;  %v3614_v1 = vld [vmem:[%s7324_s0 + $0x8] sm:$0xff]  ;;  %v3619_v2 = vld [vmem:[%s7324_s0 + $0x10] sm:$0xff] }
   0x2   :  { %v520_v3 = vand.u32 2147483647, %v3609_v0  ;;  %v3625_v4 = vld [vmem:[%s7324_s0 + $0x18] sm:$0xff]  ;;  %v521_v5 = vand.u32 2147483647, %v3614_v1  ;;  %v3631_v6 = vld [vmem:[%s7324_s0 + $0x20] sm:$0xff]  ;;  %vm264_vm3 = vcmp.ne.f32.partialorder %v3609_v0, %v3609_v0  ;;  %vm265_vm4 = vcmp.ne.f32.partialorder %v3614_v1, %v3614_v1 }
   0x3   :  { %v522_v8 = vand.u32 2147483647, %v3619_v2  ;;  %v3637_v9 = vld [vmem:[%s7324_s0 + $0x28] sm:$0xff]  ;;  %v523_v11 = vand.u32 2147483647, %v3625_v4  ;;  %v3645_v18 = vld [vmem:[%s7324_s0 + $0x30] sm:$0xff]  ;;  %vm266_vm5 = vcmp.ne.f32.partialorder %v3619_v2, %v3619_v2  ;;  %vm267_vm7 = vcmp.ne.f32.partialorder %v3625_v4, %v3625_v4 }
   0x4   :  { %v648_v7 = vsub.f32 0.0, %v520_v3  ;;  %v649_v10 = vsub.f32 0.0, %v521_v5  ;;  %v524_v14 = vand.u32 2147483647, %v3631_v6  ;;  %v525_v17 = vand.u32 2147483647, %v3637_v9 }
   0x5   :  { %v650_v13 = vsub.f32 0.0, %v522_v8  ;;  %v651_v16 = vsub.f32 0.0, %v523_v11  ;;  %v3650_v21 = vld [vmem:[%s7324_s0 + $0x38] sm:$0xff]  ;;  %v526_v25 = vand.u32 2147483647, %v3645_v18  ;;  %v3656_v26 = vld [vmem:[%s7324_s0 + $0x40] sm:$0xff]  ;;  %vm268_vm10 = vcmp.ne.f32.partialorder %v3631_v6, %v3631_v6 }
   0x6   :  { %v776_v12 = vmul.f32 1.442695, %v648_v7  ;;  %v778_v15 = vmul.f32 1.442695, %v649_v10  ;;  %v652_v20 = vsub.f32 0.0, %v524_v14  ;;  %v653_v23 = vsub.f32 0.0, %v525_v17 }
   0x7   :  { %v780_v19 = vmul.f32 1.442695, %v650_v13  ;;  %v782_v22 = vmul.f32 1.442695, %v651_v16  ;;  %v527_v28 = vand.u32 2147483647, %v3650_v21  ;;  %vm269_vm12 = vcmp.ne.f32.partialorder %v3637_v9, %v3637_v9 }
   0x8   :  { %2828 = vpow2.f32 %v776_v12  ;;  %v784_v24 = vmul.f32 1.442695, %v652_v20  ;;  %v786_v27 = vmul.f32 1.442695, %v653_v23  ;;  %v3662_v29 = vld [vmem:[%s7324_s0 + $0x48] sm:$0xff]  ;;  %v654_v30 = vsub.f32 0.0, %v526_v25 }
   0x9   :  { %2830 = vpow2.f32 %v778_v15  ;;  %v3667_v31 = vld [vmem:[%s7324_s0 + $0x50] sm:$0xff]  ;;  %v655_v32 = vsub.f32 0.0, %v527_v28  ;;  %v528_v33 = vand.u32 2147483647, %v3656_v26  ;;  %v529_v35 = vand.u32 2147483647, %v3662_v29 }
   0xa   :  { %2832 = vpow2.f32 %v780_v19  ;;  %v788_v34 = vmul.f32 1.442695, %v654_v30  ;;  %v3674_v36 = vld [vmem:[%s7324_s0 + $0x58] sm:$0xff]  ;;  %v530_v39 = vand.u32 2147483647, %v3667_v31  ;;  %v3681_v44 = vld [vmem:[%s7324_s0 + $0x60] sm:$0xff]  ;;  %vm270_vm14 = vcmp.ne.f32.partialorder %v3645_v18, %v3645_v18 }
   0xb   :  { %2834 = vpow2.f32 %v782_v22  ;;  %v790_v37 = vmul.f32 1.442695, %v655_v32  ;;  %v656_v38 = vsub.f32 0.0, %v528_v33  ;;  %v657_v40 = vsub.f32 0.0, %v529_v35  ;;  %v3697_v12 = vld [vmem:[%s7324_s0 + $0x68] sm:$0xff] }
   0xc   :  { %2836 = vpow2.f32 %v784_v24  ;;  %v658_v42 = vsub.f32 0.0, %v530_v39  ;;  %v531_v43 = vand.u32 2147483647, %v3674_v36  ;;  %v136_v46 = vmax.f32 %v3609_v0, 0.0 }
   0xd   :  { %2838 = vpow2.f32 %v786_v27  ;;  %v792_v41 = vmul.f32 1.442695, %v656_v38  ;;  %v794_v45 = vmul.f32 1.442695, %v657_v40  ;;  %v137_v47 = vmax.f32 %v3614_v1, 0.0 }
   0xe   :  { %2840 = vpow2.f32 %v788_v34  ;;  %v796_v48 = vmul.f32 1.442695, %v658_v42  ;;  %v138_v49 = vmax.f32 %v3619_v2, 0.0  ;;  %v139_v50 = vmax.f32 %v3625_v4, 0.0 }
   0xf   :  { %2842 = vpow2.f32 %v790_v37  ;;  %v659_v51 = vsub.f32 0.0, %v531_v43  ;;  %v532_v52 = vand.u32 2147483647, %v3681_v44  ;;  %v140_v54 = vmax.f32 %v3631_v6, 0.0 }
  0x10   :  { %2844 = vpow2.f32 %v792_v41  ;;  %v141_v55 = vmax.f32 %v3637_v9, 0.0  ;;  %v142_v56 = vmax.f32 %v3645_v18, 0.0  ;;  %v143_v60 = vmax.f32 %v3650_v21, 0.0 }
  0x11   :  { %2846 = vpow2.f32 %v794_v45  ;;  %v144_v61 = vmax.f32 %v3656_v26, 0.0  ;;  %v145_v5 = vmax.f32 %v3662_v29, 0.0  ;;  %v798_v10 = vmul.f32 1.442695, %v659_v51 }
  0x12   :  { %2848 = vpow2.f32 %v796_v48  ;;  %v660_v11 = vsub.f32 0.0, %v532_v52  ;;  %v146_v20 = vmax.f32 %v3667_v31, 0.0  ;;  %v533_v27 = vand.u32 2147483647, %v3697_v12 }
  0x14   :  { %v3701_v32 = vmul.f32 1.442695, %v660_v11 }
  0x15   :  { %v2829_v53 = vpop.eup %2828 }
  0x16   :  { %v2831_v57 = vpop.eup %2830  ;;  %v1032_v58 = vadd.f32 1.0, %v2829_v53  ;;  %v1035_v59 = vmul.f32 -0.5, %v2829_v53  ;;  %v1038_v15 = vand.u32 2147483647, %v2829_v53 }
  0x17   :  { %v2833_v62 = vpop.eup %2832  ;;  %v1041_v63 = vadd.f32 1.0, %v2831_v57  ;;  %v1044_v3 = vmul.f32 -0.5, %v2831_v57  ;;  %v1047_v17 = vand.u32 2147483647, %v2831_v57 }
  0x18   :  { %v2835_v7 = vpop.eup %2834  ;;  %2850 = vlog2.f32 %v1032_v58  ;;  %v1050_v8 = vadd.f32 1.0, %v2833_v62  ;;  %v1036_v14 = vadd.f32 1.0, %v1035_v59  ;;  %v1053_v16 = vmul.f32 -0.5, %v2833_v62 }
  0x19   :  { %v2837_v13 = vpop.eup %2836  ;;  %2852 = vlog2.f32 %v1041_v63  ;;  %v1059_v19 = vadd.f32 1.0, %v2835_v7  ;;  %v1045_v23 = vadd.f32 1.0, %v1044_v3  ;;  %v1056_v24 = vand.u32 2147483647, %v2833_v62 }
  0x1a   :  { %2854 = vlog2.f32 %v1050_v8  ;;  %v2839_v22 = vpop.eup %2838  ;;  %v1062_v25 = vmul.f32 -0.5, %v2835_v7  ;;  %v1068_v28 = vadd.f32 1.0, %v2837_v13  ;;  %v1071_v30 = vmul.f32 -0.5, %v2837_v13 }
  0x1b   :  { %2856 = vlog2.f32 %v1059_v19  ;;  %v2841_v33 = vpop.eup %2840  ;;  %v3703_v34 = vmul.f32 %v2829_v53, %v1036_v14  ;;  %vm3705_vm0 = vcmp.lt.f32.partialorder %v1038_v15, 0.0004427343  ;;  %v1054_v37 = vadd.f32 1.0, %v1053_v16 }
  0x1c   :  { %2858 = vpow2.f32 %v798_v10  ;;  %v3709_v38 = vpop.eup %2842  ;;  %vm3711_vm1 = vcmp.lt.f32.partialorder %v1047_v17, 0.0004427343  ;;  %v1065_v40 = vand.u32 2147483647, %v2835_v7  ;;  %v1077_v41 = vadd.f32 1.0, %v2839_v22 }
  0x1d   :  { %2860 = vlog2.f32 %v1068_v28  ;;  %v1080_v42 = vmul.f32 -0.5, %v2839_v22  ;;  %v1046_v43 = vmul.f32 %v2831_v57, %v1045_v23  ;;  %vm3715_vm2 = vcmp.lt.f32.partialorder %v1056_v24, 0.0004427343  ;;  %v3719_v52 = vpop.eup %2844 }
  0x1e   :  { %v1063_v48 = vadd.f32 1.0, %v1062_v25  ;;  %v1086_v51 = vadd.f32 1.0, %v2841_v33  ;;  %v1072_v53 = vadd.f32 1.0, %v1071_v30  ;;  %v1074_v58 = vand.u32 2147483647, %v2837_v13  ;;  %v3726_v8 = vpop.eup %2846 }
  0x1f   :  { %2862 = vlog2.f32 %v1077_v41  ;;  %v1089_v59 = vmul.f32 -0.5, %v2841_v33  ;;  %v1055_v63 = vmul.f32 %v2833_v62, %v1054_v37  ;;  %v1083_v57 = vand.u32 2147483647, %v2839_v22  ;;  %v3736_v19 = vpop.eup %2848 }
  0x20   :  { %2864 = vlog2.f32 %v1086_v51  ;;  %v1095_v3 = vadd.f32 1.0, %v3709_v38  ;;  %vm3730_vm6 = vcmp.lt.f32.partialorder %v1065_v40, 0.0004427343  ;;  %v1081_v11 = vadd.f32 1.0, %v1080_v42 }
  0x21   :  { %v1092_v14 = vand.u32 2147483647, %v2841_v33  ;;  %v1098_v15 = vmul.f32 -0.5, %v3709_v38  ;;  %v1064_v16 = vmul.f32 %v2835_v7, %v1063_v48  ;;  %v1090_v17 = vadd.f32 1.0, %v1089_v59 }
  0x22   :  { %2866 = vlog2.f32 %v1095_v3  ;;  %v1104_v62 = vadd.f32 1.0, %v3719_v52  ;;  %v1073_v23 = vmul.f32 %v2837_v13, %v1072_v53  ;;  %vm3740_vm8 = vcmp.lt.f32.partialorder %v1074_v58, 0.0004427343 }
  0x23   :  { %v1101_v25 = vand.u32 2147483647, %v3709_v38  ;;  %v1107_v28 = vmul.f32 -0.5, %v3719_v52  ;;  %vm3746_vm9 = vcmp.lt.f32.partialorder %v1083_v57, 0.0004427343  ;;  %v1099_v37 = vadd.f32 1.0, %v1098_v15 }
  0x24   :  { %2868 = vlog2.f32 %v1104_v62  ;;  %v1113_v40 = vadd.f32 1.0, %v3726_v8  ;;  %v1082_v13 = vmul.f32 %v2839_v22, %v1081_v11  ;;  %vm3753_vm11 = vcmp.lt.f32.partialorder %v1092_v14, 0.0004427343 }
  0x25   :  { %v2851_v30 = vpop.eup %2850  ;;  %v1110_v51 = vand.u32 2147483647, %v3719_v52  ;;  %v1091_v59 = vmul.f32 %v2841_v33, %v1090_v17  ;;  %v1116_v57 = vmul.f32 -0.5, %v3726_v8  ;;  %vm3764_vm13 = vcmp.lt.f32.partialorder %v1101_v25, 0.0004427343 }
  0x26   :  { %v2853_v41 = vpop.eup %2852  ;;  %v1034_v42 = vmul.f32 0.6931472, %v2851_v30  ;;  %2870 = vlog2.f32 %v1113_v40  ;;  %v1108_v11 = vadd.f32 1.0, %v1107_v28  ;;  %v1122_v14 = vadd.f32 1.0, %v3736_v19 }
  0x27   :  { %v2855_v53 = vpop.eup %2854  ;;  %v1043_v58 = vmul.f32 0.6931472, %v2853_v41  ;;  %v1125_v35 = vmul.f32 -0.5, %v3736_v19  ;;  %vm3783_vm15 = vcmp.lt.f32.partialorder %v1110_v51, 0.0004427343 }
  0x28   :  { %v1040_v3 = vsel %vm3705_vm0, %v3703_v34, %v1034_v42  ;;  %v1052_v15 = vmul.f32 0.6931472, %v2855_v53  ;;  %v2857_v62 = vpop.eup %2856  ;;  %v1100_v34 = vmul.f32 %v3709_v38, %v1099_v37  ;;  %2872 = vlog2.f32 %v1122_v14 }
  0x29   :  { %v2184_v33 = vadd.f32 %v1040_v3, %v136_v46  ;;  %v1049_v17 = vsel %vm3711_vm1, %v1046_v43, %v1043_v58  ;;  %v3777_v25 = vpop.eup %2858  ;;  %v1061_v40 = vmul.f32 0.6931472, %v2857_v62  ;;  %vm271_vm0 = vcmp.ne.f32.partialorder %v3650_v21, %v3650_v21  ;;  %v3874_v46 = vld [vmem:[%s7324_s0 + $0x78] sm:$0xff] }
  0x2a   :  { %v2185_v28 = vadd.f32 %v1049_v17, %v137_v47  ;;  %v1058_v30 = vsel %vm3715_vm2, %v1055_v63, %v1052_v15  ;;  %v2861_v39 = vpop.eup %2860  ;;  %v1117_v47 = vadd.f32 1.0, %v1116_v57  ;;  %v1119_v45 = vand.u32 2147483647, %v3726_v8 }
  0x2b   :  { %v2312_v38 = vsel %vm264_vm3, %v3609_v0, %v2184_v33  ;;  %v2186_v43 = vadd.f32 %v1058_v30, %v138_v49  ;;  %v1067_v37 = vsel %vm3730_vm6, %v1064_v16, %v1061_v40  ;;  %v1070_v41 = vmul.f32 0.6931472, %v2861_v39 }
  0x2c   :  { %2874 = vtanh.f32 %v2312_v38  ;;  %v2313_v63 = vsel %vm265_vm4, %v3614_v1, %v2185_v28  ;;  %v2863_v42 = vpop.eup %2862  ;;  %v2187_v51 = vadd.f32 %v1067_v37, %v139_v50  ;;  %vm272_vm1 = vcmp.ne.f32.partialorder %v3656_v26, %v3656_v26 }
  0x2d   :  { %2876 = vtanh.f32 %v2313_v63  ;;  %v2314_v49 = vsel %vm266_vm5, %v3619_v2, %v2186_v43  ;;  %v1109_v53 = vmul.f32 %v3719_v52, %v1108_v11  ;;  %v2865_v58 = vpop.eup %2864  ;;  %v1076_v10 = vsel %vm3740_vm8, %v1073_v23, %v1070_v41 }
  0x2e   :  { %2878 = vtanh.f32 %v2314_v49  ;;  %v1079_v16 = vmul.f32 0.6931472, %v2863_v42  ;;  %v1126_v57 = vadd.f32 1.0, %v1125_v35  ;;  %v2315_v3 = vsel %vm267_vm7, %v3625_v4, %v2187_v51 }
  0x2f   :  { %v2188_v50 = vadd.f32 %v1076_v10, %v140_v54  ;;  %v1088_v15 = vmul.f32 0.6931472, %v2865_v58  ;;  %vm273_vm2 = vcmp.ne.f32.partialorder %v3662_v29, %v3662_v29  ;;  %v1131_v52 = vadd.f32 1.0, %v3777_v25  ;;  %v2867_v11 = vpop.eup %2866 }
  0x30   :  { %2880 = vtanh.f32 %v2315_v3  ;;  %v1085_v23 = vsel %vm3746_vm9, %v1082_v13, %v1079_v16  ;;  %v1118_v24 = vmul.f32 %v3726_v8, %v1117_v47  ;;  %vm3825_vm3 = vcmp.lt.f32.partialorder %v1119_v45, 0.0004427343 }
  0x31   :  { %v2316_v54 = vsel %vm268_vm10, %v3631_v6, %v2188_v50  ;;  %v2189_v62 = vadd.f32 %v1085_v23, %v141_v55  ;;  %v1094_v33 = vsel %vm3753_vm11, %v1091_v59, %v1088_v15  ;;  %v1097_v17 = vmul.f32 0.6931472, %v2867_v11  ;;  %v2869_v7 = vpop.eup %2868  ;;  %v3850_v59 = vld [vmem:[%s7324_s0 + $0x70] sm:$0xff] }
  0x32   :  { %2882 = vtanh.f32 %v2316_v54  ;;  %v2190_v8 = vadd.f32 %v1094_v33, %v142_v56  ;;  %v1127_v13 = vmul.f32 %v3736_v19, %v1126_v57  ;;  %v1128_v35 = vand.u32 2147483647, %v3736_v19 }
  0x33   :  { %v2317_v28 = vsel %vm269_vm12, %v3637_v9, %v2189_v62  ;;  %v1103_v55 = vsel %vm3764_vm13, %v1100_v34, %v1097_v17  ;;  %v1106_v48 = vmul.f32 0.6931472, %v2869_v7  ;;  %2884 = vlog2.f32 %v1131_v52  ;;  %v2871_v56 = vpop.eup %2870 }
  0x34   :  { %2886 = vtanh.f32 %v2317_v28  ;;  %v2318_v19 = vsel %vm270_vm14, %v3645_v18, %v2190_v8  ;;  %v2191_v30 = vadd.f32 %v1103_v55, %v143_v60  ;;  %v1134_v22 = vmul.f32 -0.5, %v3777_v25 }
  0x35   :  { %2888 = vtanh.f32 %v2318_v19  ;;  %v1112_v34 = vsel %vm3783_vm15, %v1109_v53, %v1106_v48  ;;  %v1115_v40 = vmul.f32 0.6931472, %v2871_v56  ;;  %v661_v39 = vsub.f32 0.0, %v533_v27  ;;  %v2873_v47 = vpop.eup %2872  ;;  %v3894_v53 = vld [vmem:[%s7324_s0 + $0x80] sm:$0xff] }
  0x36   :  { %v2319_v38 = vsel %vm271_vm0, %v3650_v21, %v2191_v30  ;;  %v2192_v43 = vadd.f32 %v1112_v34, %v144_v61  ;;  %2890 = vpow2.f32 %v3701_v32  ;;  %v534_v60 = vand.u32 2147483647, %v3850_v59 }
  0x37   :  { %2892 = vtanh.f32 %v2319_v38  ;;  %v1121_v27 = vsel %vm3825_vm3, %v1118_v24, %v1115_v40  ;;  %vm3878_vm4 = vcmp.lt.f32.partialorder %v1128_v35, 0.0004427343  ;;  %v802_v63 = vmul.f32 1.442695, %v661_v39  ;;  %v3940_v35 = vld [vmem:[%s7324_s0 + $0x98] sm:$0xff] }
  0x38   :  { %v2320_v61 = vsel %vm272_vm1, %v3656_v26, %v2192_v43  ;;  %v2193_v32 = vadd.f32 %v1121_v27, %v145_v5  ;;  %v1124_v37 = vmul.f32 0.6931472, %v2873_v47  ;;  %v662_v41 = vsub.f32 0.0, %v534_v60  ;;  %v3969_v27 = vld [vmem:[%s7324_s0 + $0xa0] sm:$0xff] }
  0x39   :  { %v2875_v42 = vpop.eup %2874  ;;  %2894 = vtanh.f32 %v2320_v61  ;;  %vm274_vm5 = vcmp.ne.f32.partialorder %v3667_v31, %v3667_v31  ;;  %v1135_v49 = vadd.f32 1.0, %v1134_v22  ;;  %v535_v51 = vand.u32 2147483647, %v3874_v46 }
  0x3a   :  { %v2877_v58 = vpop.eup %2876  ;;  %v2568_v10 = vmul.f32 %v2875_v42, %v3609_v0  ;;  %v2321_v5 = vsel %vm273_vm2, %v3662_v29, %v2193_v32  ;;  %v1130_v16 = vsel %vm3878_vm4, %v1127_v13, %v1124_v37  ;;  %2896 = vpow2.f32 %v802_v63  ;;  %v3909_v0 = vld [vmem:[%s7324_s0 + $0x88] sm:$0xff] }
  0x3b   :  { %v2879_v57 = vpop.eup %2878  ;;  %v2569_v3 = vmul.f32 %v2877_v58, %v3614_v1  ;;  %2898 = vtanh.f32 %v2321_v5  ;;  %v2194_v50 = vadd.f32 %v1130_v16, %v146_v20  ;;  %v804_v15 = vmul.f32 1.442695, %v662_v41  ;;  %v3920_v20 = vld [vmem:[%s7324_s0 + $0x90] sm:$0xff]  ;;  %v3991_v5 = vld [vmem:[%s7324_s0 + $0xa8] sm:$0xff] }
  0x3c   :  { %2696 = vst [vmem:[%s7325_s1] sm:$0xff] %v2568_v10  ;;  %v2570_v52 = vmul.f32 %v2879_v57, %v3619_v2  ;;  %v1137_v11 = vand.u32 2147483647, %v3777_v25  ;;  %v663_v23 = vsub.f32 0.0, %v535_v51  ;;  %v536_v1 = vand.u32 2147483647, %v3894_v53 }
  0x3d   :  { %v2881_v24 = vpop.eup %2880  ;;  %2697 = vst [vmem:[%s7325_s1 + $0x8] sm:$0xff] %v2569_v3  ;;  %v2322_v2 = vsel %vm274_vm5, %v3667_v31, %v2194_v50  ;;  %2900 = vpow2.f32 %v804_v15  ;;  %v147_v17 = vmax.f32 %v3674_v36, 0.0  ;;  %v1136_v7 = vmul.f32 %v3777_v25, %v1135_v49 }
  0x3e   :  { %2698 = vst [vmem:[%s7325_s1 + $0x10] sm:$0xff] %v2570_v52  ;;  %v2571_v14 = vmul.f32 %v2881_v24, %v3625_v4  ;;  %2902 = vtanh.f32 %v2322_v2  ;;  %v806_v54 = vmul.f32 1.442695, %v663_v23  ;;  %v664_v62 = vsub.f32 0.0, %v536_v1  ;;  %v4009_v24 = vld [vmem:[%s7324_s0 + $0xb0] sm:$0xff] }
  0x3f   :  { %v2883_v33 = vpop.eup %2882  ;;  %v537_v8 = vand.u32 2147483647, %v3909_v0  ;;  %v538_v13 = vand.u32 2147483647, %v3920_v20  ;;  %vm3946_vm6 = vcmp.lt.f32.partialorder %v1137_v11, 0.0004427343  ;;  %vm275_vm7 = vcmp.ne.f32.partialorder %v3674_v36, %v3674_v36 }
  0x40   :  { %v2885_v28 = vpop.eup %2884  ;;  %2699 = vst [vmem:[%s7325_s1 + $0x18] sm:$0xff] %v2571_v14  ;;  %v2572_v4 = vmul.f32 %v2883_v33, %v3631_v6  ;;  %2904 = vpow2.f32 %v806_v54  ;;  %v808_v25 = vmul.f32 1.442695, %v664_v62  ;;  %v539_v6 = vand.u32 2147483647, %v3940_v35 }
  0x41   :  { %v2887_v48 = vpop.eup %2886  ;;  %v1133_v56 = vmul.f32 0.6931472, %v2885_v28  ;;  %v665_v19 = vsub.f32 0.0, %v537_v8  ;;  %v666_v30 = vsub.f32 0.0, %v538_v13  ;;  %v540_v49 = vand.u32 2147483647, %v3969_v27 }
  0x42   :  { %v2889_v22 = vpop.eup %2888  ;;  %2700 = vst [vmem:[%s7325_s1 + $0x20] sm:$0xff] %v2572_v4  ;;  %v2573_v34 = vmul.f32 %v2887_v48, %v3637_v9  ;;  %2906 = vpow2.f32 %v808_v25  ;;  %v667_v63 = vsub.f32 0.0, %v539_v6  ;;  %v148_v16 = vmax.f32 %v3681_v44, 0.0 }
  0x43   :  { %v3955_v40 = vpop.eup %2890  ;;  %v2574_v39 = vmul.f32 %v2889_v22, %v3645_v18  ;;  %v1139_v38 = vsel %vm3946_vm6, %v1136_v7, %v1133_v56  ;;  %v810_v43 = vmul.f32 1.442695, %v665_v19  ;;  %v812_v45 = vmul.f32 1.442695, %v666_v30 }
  0x44   :  { %v2893_v60 = vpop.eup %2892  ;;  %2701 = vst [vmem:[%s7325_s1 + $0x28] sm:$0xff] %v2573_v34  ;;  %v2195_v9 = vadd.f32 %v1139_v38, %v147_v17  ;;  %v1140_v47 = vadd.f32 1.0, %v3955_v40  ;;  %v814_v42 = vmul.f32 1.442695, %v667_v63  ;;  %v668_v10 = vsub.f32 0.0, %v540_v49  ;;  %v4132_v49 = vld [vmem:[%s7324_s0 + $0xc0] sm:$0xff] }
  0x45   :  { %2702 = vst [vmem:[%s7325_s1 + $0x30] sm:$0xff] %v2574_v39  ;;  %v2575_v18 = vmul.f32 %v2893_v60, %v3650_v21  ;;  %2908 = vpow2.f32 %v810_v43  ;;  %v1143_v57 = vmul.f32 -0.5, %v3955_v40  ;;  %v150_v50 = vmax.f32 %v3850_v59, 0.0 }
  0x46   :  { %v2895_v61 = vpop.eup %2894  ;;  %v2323_v32 = vsel %vm275_vm7, %v3674_v36, %v2195_v9  ;;  %2910 = vlog2.f32 %v1140_v47  ;;  %v151_v11 = vmax.f32 %v3874_v46, 0.0  ;;  %v816_v23 = vmul.f32 1.442695, %v668_v10 }
  0x47   :  { %v3976_v37 = vpop.eup %2896  ;;  %2703 = vst [vmem:[%s7325_s1 + $0x38] sm:$0xff] %v2575_v18  ;;  %v2576_v41 = vmul.f32 %v2895_v61, %v3656_v26  ;;  %2912 = vtanh.f32 %v2323_v32  ;;  %v541_v1 = vand.u32 2147483647, %v3991_v5  ;;  %v152_v54 = vmax.f32 %v3894_v53, 0.0  ;;  %v4051_v18 = vld [vmem:[%s7324_s0 + $0xb8] sm:$0xff] }
  0x48   :  { %v2899_v21 = vpop.eup %2898  ;;  %v1149_v51 = vadd.f32 1.0, %v3976_v37  ;;  %2914 = vpow2.f32 %v812_v45  ;;  %v1152_v14 = vmul.f32 -0.5, %v3976_v37  ;;  %v153_v62 = vmax.f32 %v3909_v0, 0.0 }
  0x49   :  { %2704 = vst [vmem:[%s7325_s1 + $0x40] sm:$0xff] %v2576_v41  ;;  %v2577_v58 = vmul.f32 %v2899_v21, %v3662_v29  ;;  %v149_v29 = vmax.f32 %v3697_v12, 0.0  ;;  %vm276_vm8 = vcmp.ne.f32.partialorder %v3681_v44, %v3681_v44  ;;  %v1146_v33 = vand.u32 2147483647, %v3955_v40 }
  0x4a   :  { %v3993_v26 = vpop.eup %2900  ;;  %2916 = vlog2.f32 %v1149_v51  ;;  %v1155_v8 = vand.u32 2147483647, %v3976_v37  ;;  %v669_v28 = vsub.f32 0.0, %v541_v1  ;;  %v542_v4 = vand.u32 2147483647, %v4009_v24 }
  0x4b   :  { %v2903_v3 = vpop.eup %2902  ;;  %2705 = vst [vmem:[%s7325_s1 + $0x48] sm:$0xff] %v2577_v58  ;;  %v1158_v15 = vadd.f32 1.0, %v3993_v26  ;;  %2918 = vpow2.f32 %v814_v42  ;;  %v1161_v13 = vmul.f32 -0.5, %v3993_v26  ;;  %v154_v25 = vmax.f32 %v3920_v20, 0.0 }
  0x4c   :  { %v2578_v52 = vmul.f32 %v2903_v3, %v3667_v31  ;;  %v1144_v31 = vadd.f32 1.0, %v1143_v57  ;;  %v155_v48 = vmax.f32 %v3940_v35, 0.0  ;;  %v1153_v56 = vadd.f32 1.0, %v1152_v14 }
  0x4d   :  { %v4011_v2 = vpop.eup %2904  ;;  %2920 = vlog2.f32 %v1158_v15  ;;  %v1164_v19 = vand.u32 2147483647, %v3993_v26  ;;  %v818_v30 = vmul.f32 1.442695, %v669_v28  ;;  %v670_v22 = vsub.f32 0.0, %v542_v4 }
  0x4e   :  { %2706 = vst [vmem:[%s7325_s1 + $0x50] sm:$0xff] %v2578_v52  ;;  %v1167_v17 = vadd.f32 1.0, %v4011_v2  ;;  %2922 = vpow2.f32 %v816_v23  ;;  %v1145_v6 = vmul.f32 %v3955_v40, %v1144_v31  ;;  %vm4035_vm9 = vcmp.lt.f32.partialorder %v1146_v33, 0.0004427343 }
  0x4f   :  { %v4023_v7 = vpop.eup %2906  ;;  %vm277_vm10 = vcmp.ne.f32.partialorder %v3697_v12, %v3697_v12  ;;  %v156_v38 = vmax.f32 %v3969_v27, 0.0  ;;  %vm4042_vm11 = vcmp.lt.f32.partialorder %v1155_v8, 0.0004427343  ;;  %v1162_v9 = vadd.f32 1.0, %v1161_v13 }
  0x50   :  { %2924 = vlog2.f32 %v1167_v17  ;;  %v1176_v55 = vadd.f32 1.0, %v4023_v7  ;;  %v1170_v47 = vmul.f32 -0.5, %v4011_v2  ;;  %v1179_v61 = vmul.f32 -0.5, %v4023_v7 }
  0x51   :  { %v820_v32 = vmul.f32 1.442695, %v670_v22  ;;  %v1154_v42 = vmul.f32 %v3976_v37, %v1153_v56  ;;  %vm278_vm12 = vcmp.ne.f32.partialorder %v3850_v59, %v3850_v59  ;;  %vm4058_vm13 = vcmp.lt.f32.partialorder %v1164_v19, 0.0004427343 }
  0x52   :  { %v4032_v34 = vpop.eup %2908  ;;  %2926 = vlog2.f32 %v1176_v55  ;;  %v1173_v58 = vand.u32 2147483647, %v4011_v2  ;;  %v1163_v57 = vmul.f32 %v3993_v26, %v1162_v9  ;;  %vm279_vm14 = vcmp.ne.f32.partialorder %v3874_v46, %v3874_v46 }
  0x53   :  { %v2911_v43 = vpop.eup %2910  ;;  %v1185_v40 = vadd.f32 1.0, %v4032_v34  ;;  %2928 = vpow2.f32 %v818_v30  ;;  %v1188_v3 = vmul.f32 -0.5, %v4032_v34  ;;  %v1171_v1 = vadd.f32 1.0, %v1170_v47 }
  0x54   :  { %v2913_v45 = vpop.eup %2912  ;;  %v1142_v63 = vmul.f32 0.6931472, %v2911_v43  ;;  %v1180_v14 = vadd.f32 1.0, %v1179_v61  ;;  %vm280_vm15 = vcmp.ne.f32.partialorder %v3894_v53, %v3894_v53  ;;  %v1182_v13 = vand.u32 2147483647, %v4023_v7 }
  0x55   :  { %v2579_v41 = vmul.f32 %v2913_v45, %v3674_v36  ;;  %2930 = vlog2.f32 %v1185_v40  ;;  %v4062_v21 = vpop.eup %2914  ;;  %v543_v36 = vand.u32 2147483647, %v4051_v18  ;;  %v1191_v28 = vand.u32 2147483647, %v4032_v34 }
  0x56   :  { %v1148_v51 = vsel %vm4035_vm9, %v1145_v6, %v1142_v63  ;;  %2932 = vpow2.f32 %v820_v32  ;;  %v1194_v15 = vadd.f32 1.0, %v4062_v21  ;;  %v1197_v31 = vmul.f32 -0.5, %v4062_v21 }
  0x57   :  { %v2917_v10 = vpop.eup %2916  ;;  %2707 = vst [vmem:[%s7325_s1 + $0x58] sm:$0xff] %v2579_v41  ;;  %v2196_v37 = vadd.f32 %v1148_v51, %v148_v16  ;;  %v671_v33 = vsub.f32 0.0, %v543_v36  ;;  %v1189_v19 = vadd.f32 1.0, %v1188_v3  ;;  %v1172_v30 = vmul.f32 %v4011_v2, %v1171_v1 }
  0x58   :  { %v4076_v52 = vpop.eup %2918  ;;  %v1151_v23 = vmul.f32 0.6931472, %v2917_v10  ;;  %2934 = vlog2.f32 %v1194_v15  ;;  %vm4097_vm0 = vcmp.lt.f32.partialorder %v1173_v58, 0.0004427343  ;;  %v1181_v6 = vmul.f32 %v4023_v7, %v1180_v14 }
  0x59   :  { %v2324_v16 = vsel %vm276_vm8, %v3681_v44, %v2196_v37  ;;  %v1203_v26 = vadd.f32 1.0, %v4076_v52  ;;  %vm281_vm1 = vcmp.ne.f32.partialorder %v3909_v0, %v3909_v0  ;;  %v1198_v2 = vadd.f32 1.0, %v1197_v31 }
  0x5a   :  { %v2921_v17 = vpop.eup %2920  ;;  %2936 = vtanh.f32 %v2324_v16  ;;  %v1157_v8 = vsel %vm4042_vm11, %v1154_v42, %v1151_v23  ;;  %v822_v9 = vmul.f32 1.442695, %v671_v33  ;;  %v1206_v40 = vmul.f32 -0.5, %v4076_v52 }
  0x5b   :  { %v4092_v4 = vpop.eup %2922  ;;  %v2197_v55 = vadd.f32 %v1157_v8, %v149_v29  ;;  %v1160_v56 = vmul.f32 0.6931472, %v2921_v17  ;;  %2938 = vlog2.f32 %v1203_v26  ;;  %vm4114_vm2 = vcmp.lt.f32.partialorder %v1182_v13, 0.0004427343 }
  0x5c   :  { %v1212_v39 = vadd.f32 1.0, %v4092_v4  ;;  %v1190_v61 = vmul.f32 %v4032_v34, %v1189_v19  ;;  %vm4119_vm3 = vcmp.lt.f32.partialorder %v1191_v28, 0.0004427343  ;;  %vm282_vm4 = vcmp.ne.f32.partialorder %v3920_v20, %v3920_v20 }
  0x5d   :  { %v2925_v43 = vpop.eup %2924  ;;  %v2325_v60 = vsel %vm277_vm10, %v3697_v12, %v2197_v55  ;;  %v1166_v29 = vsel %vm4058_vm13, %v1163_v57, %v1160_v56  ;;  %v1200_v58 = vand.u32 2147483647, %v4062_v21  ;;  %v1215_v36 = vmul.f32 -0.5, %v4092_v4 }
  0x5e   :  { %2940 = vtanh.f32 %v2325_v60  ;;  %v2198_v7 = vadd.f32 %v1166_v29, %v150_v50  ;;  %v1169_v47 = vmul.f32 0.6931472, %v2925_v43  ;;  %v1199_v57 = vmul.f32 %v4062_v21, %v1198_v2  ;;  %v4197_v29 = vld [vmem:[%s7324_s0 + $0xd0] sm:$0xff] }
  0x5f   :  { %v2927_v45 = vpop.eup %2926  ;;  %2942 = vlog2.f32 %v1212_v39  ;;  %v1207_v3 = vadd.f32 1.0, %v1206_v40  ;;  %vm283_vm5 = vcmp.ne.f32.partialorder %v3940_v35, %v3940_v35  ;;  %v544_v31 = vand.u32 2147483647, %v4132_v49 }
  0x60   :  { %v2326_v50 = vsel %vm278_vm12, %v3850_v59, %v2198_v7  ;;  %v1175_v41 = vsel %vm4097_vm0, %v1172_v30, %v1169_v47  ;;  %v1178_v42 = vmul.f32 0.6931472, %v2927_v45  ;;  %2944 = vpow2.f32 %v822_v9  ;;  %v4134_v34 = vpop.eup %2928 }
  0x61   :  { %2946 = vtanh.f32 %v2326_v50  ;;  %v2199_v51 = vadd.f32 %v1175_v41, %v151_v11  ;;  %v1221_v15 = vadd.f32 1.0, %v4134_v34  ;;  %v1209_v21 = vand.u32 2147483647, %v4076_v52 }
  0x62   :  { %v2931_v10 = vpop.eup %2930  ;;  %v1184_v37 = vsel %vm4114_vm2, %v1181_v6, %v1178_v42  ;;  %v1218_v16 = vand.u32 2147483647, %v4092_v4  ;;  %v1216_v17 = vadd.f32 1.0, %v1215_v36  ;;  %vm4168_vm6 = vcmp.lt.f32.partialorder %v1200_v58, 0.0004427343  ;;  %v4179_v6 = vld [vmem:[%s7324_s0 + $0xc8] sm:$0xff] }
  0x63   :  { %v4146_v23 = vpop.eup %2932  ;;  %v2327_v11 = vsel %vm279_vm14, %v3874_v46, %v2199_v51  ;;  %v2200_v1 = vadd.f32 %v1184_v37, %v152_v54  ;;  %v1187_v14 = vmul.f32 0.6931472, %v2931_v10  ;;  %v1208_v55 = vmul.f32 %v4076_v52, %v1207_v3 }
  0x64   :  { %2948 = vtanh.f32 %v2327_v11  ;;  %v1230_v26 = vadd.f32 1.0, %v4146_v23  ;;  %vm284_vm7 = vcmp.ne.f32.partialorder %v3969_v27, %v3969_v27  ;;  %v1224_v30 = vmul.f32 -0.5, %v4134_v34 }
  0x65   :  { %v2328_v33 = vsel %vm280_vm15, %v3894_v53, %v2200_v1  ;;  %v1193_v54 = vsel %vm4119_vm3, %v1190_v61, %v1187_v14  ;;  %2950 = vlog2.f32 %v1221_v15  ;;  %v2935_v8 = vpop.eup %2934  ;;  %v672_v22 = vsub.f32 0.0, %v544_v31  ;;  %v4237_v31 = vld [vmem:[%s7324_s0 + $0xd8] sm:$0xff] }
  0x66   :  { %2952 = vtanh.f32 %v2328_v33  ;;  %v2201_v13 = vadd.f32 %v1193_v54, %v153_v62  ;;  %v1196_v19 = vmul.f32 0.6931472, %v2935_v8  ;;  %vm4186_vm8 = vcmp.lt.f32.partialorder %v1209_v21, 0.0004427343 }
  0x67   :  { %v2937_v56 = vpop.eup %2936  ;;  %2954 = vlog2.f32 %v1230_v26  ;;  %vm4190_vm9 = vcmp.lt.f32.partialorder %v1218_v16, 0.0004427343  ;;  %v1217_v9 = vmul.f32 %v4092_v4, %v1216_v17  ;;  %v1233_v47 = vmul.f32 -0.5, %v4146_v23 }
  0x68   :  { %v2939_v62 = vpop.eup %2938  ;;  %v2580_v39 = vmul.f32 %v2937_v56, %v3681_v44  ;;  %v2329_v52 = vsel %vm281_vm1, %v3909_v0, %v2201_v13  ;;  %v1202_v44 = vsel %vm4168_vm6, %v1199_v57, %v1196_v19  ;;  %v824_v40 = vmul.f32 1.442695, %v672_v22 }
  0x69   :  { %2956 = vtanh.f32 %v2329_v52  ;;  %v1205_v2 = vmul.f32 0.6931472, %v2939_v62  ;;  %v2202_v7 = vadd.f32 %v1202_v44, %v154_v25  ;;  %v545_v45 = vand.u32 2147483647, %v4179_v6 }
  0x6a   :  { %2708 = vst [vmem:[%s7325_s1 + $0x60] sm:$0xff] %v2580_v39  ;;  %v1225_v32 = vadd.f32 1.0, %v1224_v30  ;;  %v1227_v50 = vand.u32 2147483647, %v4134_v34  ;;  %v546_v4 = vand.u32 2147483647, %v4197_v29  ;;  %2958 = vpow2.f32 %v824_v40 }
  0x6b   :  { %v2941_v63 = vpop.eup %2940  ;;  %v1211_v61 = vsel %vm4186_vm8, %v1208_v55, %v1205_v2  ;;  %v2330_v25 = vsel %vm282_vm4, %v3920_v20, %v2202_v7  ;;  %v673_v10 = vsub.f32 0.0, %v545_v45  ;;  %v1234_v3 = vadd.f32 1.0, %v1233_v47  ;;  %v4289_v47 = vld [vmem:[%s7324_s0 + $0xf0] sm:$0xff] }
  0x6c   :  { %v2943_v41 = vpop.eup %2942  ;;  %v2581_v42 = vmul.f32 %v2941_v63, %v3697_v12  ;;  %v2203_v51 = vadd.f32 %v1211_v61, %v155_v48  ;;  %2960 = vtanh.f32 %v2330_v25  ;;  %v674_v37 = vsub.f32 0.0, %v546_v4 }
  0x6d   :  { %v4220_v58 = vpop.eup %2944  ;;  %v1214_v36 = vmul.f32 0.6931472, %v2943_v41  ;;  %v1236_v48 = vand.u32 2147483647, %v4146_v23  ;;  %v826_v14 = vmul.f32 1.442695, %v673_v10  ;;  %v1235_v30 = vmul.f32 %v4146_v23, %v1234_v3 }
  0x6e   :  { %v2947_v57 = vpop.eup %2946  ;;  %2709 = vst [vmem:[%s7325_s1 + $0x68] sm:$0xff] %v2581_v42  ;;  %v2331_v12 = vsel %vm283_vm5, %v3940_v35, %v2203_v51  ;;  %v1239_v15 = vadd.f32 1.0, %v4220_v58  ;;  %v157_v16 = vmax.f32 %v3991_v5, 0.0  ;;  %v158_v26 = vmax.f32 %v4009_v24, 0.0  ;;  %v4309_v10 = vld [vmem:[%s7324_s0 + $0xf8] sm:$0xff] }
  0x6f   :  { %v2582_v11 = vmul.f32 %v2947_v57, %v3850_v59  ;;  %2962 = vtanh.f32 %v2331_v12  ;;  %v1220_v1 = vsel %vm4190_vm9, %v1217_v9, %v1214_v36  ;;  %v1226_v59 = vmul.f32 %v4134_v34, %v1225_v32 }
  0x70   :  { %v2204_v21 = vadd.f32 %v1220_v1, %v156_v38  ;;  %2964 = vlog2.f32 %v1239_v15  ;;  %vm4247_vm10 = vcmp.lt.f32.partialorder %v1227_v50, 0.0004427343  ;;  %v828_v17 = vmul.f32 1.442695, %v674_v37  ;;  %v4254_v38 = vld [vmem:[%s7324_s0 + $0xe0] sm:$0xff] }
  0x71   :  { %v2949_v33 = vpop.eup %2948  ;;  %2710 = vst [vmem:[%s7325_s1 + $0x70] sm:$0xff] %v2582_v11  ;;  %2966 = vpow2.f32 %v826_v14  ;;  %vm4261_vm11 = vcmp.lt.f32.partialorder %v1236_v48, 0.0004427343  ;;  %v547_v55 = vand.u32 2147483647, %v4237_v31  ;;  %v1242_v22 = vmul.f32 -0.5, %v4220_v58 }
  0x72   :  { %v2951_v8 = vpop.eup %2950  ;;  %v2583_v13 = vmul.f32 %v2949_v33, %v3874_v46  ;;  %v2332_v28 = vsel %vm284_vm7, %v3969_v27, %v2204_v21  ;;  %v4271_v46 = vld [vmem:[%s7324_s0 + $0xe8] sm:$0xff]  ;;  %v548_v43 = vand.u32 2147483647, %v4254_v38  ;;  %vm285_vm12 = vcmp.ne.f32.partialorder %v3991_v5, %v3991_v5 }
  0x73   :  { %v2953_v56 = vpop.eup %2952  ;;  %2968 = vtanh.f32 %v2332_v28  ;;  %v1223_v19 = vmul.f32 0.6931472, %v2951_v8  ;;  %v675_v52 = vsub.f32 0.0, %v547_v55  ;;  %vm286_vm13 = vcmp.ne.f32.partialorder %v4009_v24, %v4009_v24 }
  0x74   :  { %v2955_v62 = vpop.eup %2954  ;;  %2711 = vst [vmem:[%s7325_s1 + $0x78] sm:$0xff] %v2583_v13  ;;  %v2584_v39 = vmul.f32 %v2953_v56, %v3894_v53  ;;  %2970 = vpow2.f32 %v828_v17  ;;  %v676_v7 = vsub.f32 0.0, %v548_v43  ;;  %v549_v53 = vand.u32 2147483647, %v4271_v46  ;;  %v4347_v56 = vld [vmem:[%s7324_s0 + $0x108] sm:$0xff] }
  0x75   :  { %v1229_v23 = vsel %vm4247_vm10, %v1226_v59, %v1223_v19  ;;  %v1232_v60 = vmul.f32 0.6931472, %v2955_v62  ;;  %v830_v9 = vmul.f32 1.442695, %v675_v52  ;;  %v1245_v63 = vand.u32 2147483647, %v4220_v58 }
  0x76   :  { %v2957_v44 = vpop.eup %2956  ;;  %2712 = vst [vmem:[%s7325_s1 + $0x80] sm:$0xff] %v2584_v39  ;;  %v2205_v2 = vadd.f32 %v1229_v23, %v157_v16  ;;  %v1243_v50 = vadd.f32 1.0, %v1242_v22  ;;  %v677_v41 = vsub.f32 0.0, %v549_v53  ;;  %v550_v42 = vand.u32 2147483647, %v4289_v47 }
  0x77   :  { %v2585_v40 = vmul.f32 %v2957_v44, %v3909_v0  ;;  %v1238_v45 = vsel %vm4261_vm11, %v1235_v30, %v1232_v60  ;;  %2972 = vpow2.f32 %v830_v9  ;;  %v4298_v4 = vpop.eup %2958  ;;  %v832_v0 = vmul.f32 1.442695, %v676_v7 }
  0x78   :  { %v2333_v61 = vsel %vm285_vm12, %v3991_v5, %v2205_v2  ;;  %v2206_v32 = vadd.f32 %v1238_v45, %v158_v26  ;;  %v1248_v36 = vadd.f32 1.0, %v4298_v4  ;;  %v834_v57 = vmul.f32 1.442695, %v677_v41 }
  0x79   :  { %2713 = vst [vmem:[%s7325_s1 + $0x88] sm:$0xff] %v2585_v40  ;;  %2974 = vtanh.f32 %v2333_v61  ;;  %v2961_v25 = vpop.eup %2960  ;;  %v678_v12 = vsub.f32 0.0, %v550_v42  ;;  %v159_v48 = vmax.f32 %v4051_v18, 0.0  ;;  %v1244_v15 = vmul.f32 %v4220_v58, %v1243_v50  ;;  %v4326_v58 = vld [vmem:[%s7324_s0 + $0x100] sm:$0xff] }
  0x7a   :  { %v2334_v51 = vsel %vm286_vm13, %v4009_v24, %v2206_v32  ;;  %v2586_v37 = vmul.f32 %v2961_v25, %v3920_v20  ;;  %vm4314_vm14 = vcmp.lt.f32.partialorder %v1245_v63, 0.0004427343  ;;  %v551_v21 = vand.u32 2147483647, %v4309_v10  ;;  %v4382_v25 = vld [vmem:[%s7324_s0 + $0x110] sm:$0xff] }
  0x7b   :  { %2976 = vtanh.f32 %v2334_v51  ;;  %v836_v14 = vmul.f32 1.442695, %v678_v12  ;;  %vm287_vm15 = vcmp.ne.f32.partialorder %v4051_v18, %v4051_v18  ;;  %v1251_v54 = vmul.f32 -0.5, %v4298_v4 }
  0x7c   :  { %v2963_v3 = vpop.eup %2962  ;;  %2978 = vlog2.f32 %v1248_v36  ;;  %2714 = vst [vmem:[%s7325_s1 + $0x90] sm:$0xff] %v2586_v37  ;;  %v679_v17 = vsub.f32 0.0, %v551_v21  ;;  %v552_v8 = vand.u32 2147483647, %v4326_v58  ;;  %v160_v30 = vmax.f32 %v4132_v49, 0.0 }
  0x7d   :  { %v2965_v1 = vpop.eup %2964  ;;  %v2587_v20 = vmul.f32 %v2963_v3, %v3940_v35  ;;  %2980 = vpow2.f32 %v832_v0  ;;  %v1254_v39 = vand.u32 2147483647, %v4298_v4  ;;  %vm288_vm0 = vcmp.ne.f32.partialorder %v4132_v49, %v4132_v49 }
  0x7e   :  { %v4328_v16 = vpop.eup %2966  ;;  %v1241_v26 = vmul.f32 0.6931472, %v2965_v1  ;;  %2982 = vpow2.f32 %v834_v57  ;;  %v838_v22 = vmul.f32 1.442695, %v679_v17  ;;  %v680_v62 = vsub.f32 0.0, %v552_v8 }
  0x7f   :  { %2715 = vst [vmem:[%s7325_s1 + $0x98] sm:$0xff] %v2587_v20  ;;  %v1257_v35 = vadd.f32 1.0, %v4328_v16  ;;  %2984 = vpow2.f32 %v836_v14  ;;  %v1260_v52 = vmul.f32 -0.5, %v4328_v16  ;;  %v553_v60 = vand.u32 2147483647, %v4347_v56 }
  0x80   :  { %v2969_v33 = vpop.eup %2968  ;;  %v1247_v59 = vsel %vm4314_vm14, %v1244_v15, %v1241_v26  ;;  %v840_v23 = vmul.f32 1.442695, %v680_v62  ;;  %v161_v2 = vmax.f32 %v4179_v6, 0.0  ;;  %v162_v9 = vmax.f32 %v4197_v29, 0.0  ;;  %v4428_v62 = vld [vmem:[%s7324_s0 + $0x118] sm:$0xff] }
  0x81   :  { %v4340_v13 = vpop.eup %2970  ;;  %v2588_v28 = vmul.f32 %v2969_v33, %v3969_v27  ;;  %v2207_v34 = vadd.f32 %v1247_v59, %v159_v48  ;;  %2986 = vlog2.f32 %v1257_v35  ;;  %v1252_v27 = vadd.f32 1.0, %v1251_v54 }
  0x82   :  { %v1266_v55 = vadd.f32 1.0, %v4340_v13  ;;  %v163_v7 = vmax.f32 %v4237_v31, 0.0  ;;  %v164_v45 = vmax.f32 %v4254_v38, 0.0  ;;  %v681_v63 = vsub.f32 0.0, %v553_v60 }
  0x83   :  { %2716 = vst [vmem:[%s7325_s1 + $0xa0] sm:$0xff] %v2588_v28  ;;  %v2335_v19 = vsel %vm287_vm15, %v4051_v18, %v2207_v34  ;;  %v1253_v32 = vmul.f32 %v4298_v4, %v1252_v27  ;;  %vm4368_vm1 = vcmp.lt.f32.partialorder %v1254_v39, 0.0004427343  ;;  %v1261_v0 = vadd.f32 1.0, %v1260_v52 }
  0x84   :  { %2988 = vtanh.f32 %v2335_v19  ;;  %v4356_v43 = vpop.eup %2972  ;;  %vm289_vm2 = vcmp.ne.f32.partialorder %v4179_v6, %v4179_v6  ;;  %v1269_v42 = vmul.f32 -0.5, %v4340_v13  ;;  %v842_v4 = vmul.f32 1.442695, %v681_v63 }
  0x85   :  { %2990 = vlog2.f32 %v1266_v55  ;;  %v1275_v53 = vadd.f32 1.0, %v4356_v43  ;;  %v1263_v37 = vand.u32 2147483647, %v4328_v16  ;;  %v165_v57 = vmax.f32 %v4271_v46, 0.0 }
  0x86   :  { %v2975_v44 = vpop.eup %2974  ;;  %2992 = vpow2.f32 %v838_v22  ;;  %v1278_v3 = vmul.f32 -0.5, %v4356_v43  ;;  %v167_v15 = vmax.f32 %v4309_v10, 0.0  ;;  %v1272_v20 = vand.u32 2147483647, %v4340_v13 }
  0x87   :  { %v2589_v40 = vmul.f32 %v2975_v44, %v3991_v5  ;;  %2994 = vlog2.f32 %v1275_v53  ;;  %v554_v21 = vand.u32 2147483647, %v4382_v25  ;;  %v1262_v35 = vmul.f32 %v4328_v16, %v1261_v0 }
  0x88   :  { %v2977_v61 = vpop.eup %2976  ;;  %2996 = vpow2.f32 %v840_v23  ;;  %vm290_vm3 = vcmp.ne.f32.partialorder %v4197_v29, %v4197_v29  ;;  %v1270_v33 = vadd.f32 1.0, %v1269_v42  ;;  %vm4407_vm4 = vcmp.lt.f32.partialorder %v1263_v37, 0.0004427343 }
  0x89   :  { %v2979_v41 = vpop.eup %2978  ;;  %2717 = vst [vmem:[%s7325_s1 + $0xa8] sm:$0xff] %v2589_v40  ;;  %v2590_v5 = vmul.f32 %v2977_v61, %v4009_v24  ;;  %v166_v24 = vmax.f32 %v4289_v47, 0.0  ;;  %2998 = vpow2.f32 %v842_v4  ;;  %v168_v8 = vmax.f32 %v4326_v58, 0.0 }
  0x8a   :  { %v4384_v51 = vpop.eup %2980  ;;  %v1250_v36 = vmul.f32 0.6931472, %v2979_v41  ;;  %v1279_v34 = vadd.f32 1.0, %v1278_v3  ;;  %v1281_v55 = vand.u32 2147483647, %v4356_v43  ;;  %vm291_vm6 = vcmp.ne.f32.partialorder %v4237_v31, %v4237_v31 }
  0x8b   :  { %v4389_v12 = vpop.eup %2982  ;;  %2718 = vst [vmem:[%s7325_s1 + $0xb0] sm:$0xff] %v2590_v5  ;;  %v1284_v48 = vadd.f32 1.0, %v4384_v51  ;;  %vm4418_vm5 = vcmp.lt.f32.partialorder %v1272_v20, 0.0004427343  ;;  %v682_v22 = vsub.f32 0.0, %v554_v21  ;;  %v1271_v52 = vmul.f32 %v4340_v13, %v1270_v33 }
  0x8c   :  { %v4397_v11 = vpop.eup %2984  ;;  %v1256_v1 = vsel %vm4368_vm1, %v1253_v32, %v1250_v36  ;;  %v1293_v14 = vadd.f32 1.0, %v4389_v12  ;;  %v1290_v23 = vand.u32 2147483647, %v4384_v51  ;;  %v1296_v40 = vmul.f32 -0.5, %v4389_v12  ;;  %v4463_v36 = vld [vmem:[%s7324_s0 + $0x120] sm:$0xff] }
  0x8d   :  { %v2208_v26 = vadd.f32 %v1256_v1, %v160_v30  ;;  %3000 = vlog2.f32 %v1284_v48  ;;  %v1302_v17 = vadd.f32 1.0, %v4397_v11  ;;  %v1287_v30 = vmul.f32 -0.5, %v4384_v51 }
  0x8e   :  { %v2987_v59 = vpop.eup %2986  ;;  %3002 = vlog2.f32 %v1293_v14  ;;  %v844_v63 = vmul.f32 1.442695, %v682_v22  ;;  %v1280_v32 = vmul.f32 %v4356_v43, %v1279_v34  ;;  %vm4439_vm7 = vcmp.lt.f32.partialorder %v1281_v55, 0.0004427343 }
  0x8f   :  { %v2336_v16 = vsel %vm288_vm0, %v4132_v49, %v2208_v26  ;;  %v1259_v28 = vmul.f32 0.6931472, %v2987_v59  ;;  %v555_v13 = vand.u32 2147483647, %v4428_v62  ;;  %v1299_v43 = vand.u32 2147483647, %v4389_v12 }
  0x90   :  { %3004 = vtanh.f32 %v2336_v16  ;;  %vm292_vm8 = vcmp.ne.f32.partialorder %v4254_v38, %v4254_v38  ;;  %v1305_v42 = vmul.f32 -0.5, %v4397_v11  ;;  %vm4469_vm9 = vcmp.lt.f32.partialorder %v1290_v23, 0.0004427343 }
  0x91   :  { %v2989_v27 = vpop.eup %2988  ;;  %v1265_v39 = vsel %vm4407_vm4, %v1262_v35, %v1259_v28  ;;  %3006 = vlog2.f32 %v1302_v17  ;;  %vm293_vm10 = vcmp.ne.f32.partialorder %v4271_v46, %v4271_v46  ;;  %v1297_v20 = vadd.f32 1.0, %v1296_v40 }
  0x92   :  { %v2991_v60 = vpop.eup %2990  ;;  %v2591_v44 = vmul.f32 %v2989_v27, %v4051_v18  ;;  %v2209_v53 = vadd.f32 %v1265_v39, %v161_v2  ;;  %v1288_v2 = vadd.f32 1.0, %v1287_v30  ;;  %3008 = vpow2.f32 %v844_v63  ;;  %v4513_v63 = vld [vmem:[%s7324_s0 + $0x128] sm:$0xff] }
  0x93   :  { %v1268_v61 = vmul.f32 0.6931472, %v2991_v60  ;;  %v4444_v0 = vpop.eup %2992  ;;  %v1308_v14 = vand.u32 2147483647, %v4397_v11  ;;  %v683_v26 = vsub.f32 0.0, %v555_v13  ;;  %vm294_vm11 = vcmp.ne.f32.partialorder %v4289_v47, %v4289_v47 }
  0x94   :  { %2719 = vst [vmem:[%s7325_s1 + $0xb8] sm:$0xff] %v2591_v44  ;;  %v2337_v18 = vsel %vm289_vm2, %v4179_v6, %v2209_v53  ;;  %v2995_v41 = vpop.eup %2994  ;;  %v1311_v4 = vadd.f32 1.0, %v4444_v0  ;;  %v1289_v59 = vmul.f32 %v4384_v51, %v1288_v2  ;;  %v556_v54 = vand.u32 2147483647, %v4463_v36 }
  0x95   :  { %3010 = vtanh.f32 %v2337_v18  ;;  %v1274_v5 = vsel %vm4418_vm5, %v1271_v52, %v1268_v61  ;;  %v4465_v37 = vpop.eup %2996  ;;  %v1277_v48 = vmul.f32 0.6931472, %v2995_v41  ;;  %v1306_v16 = vadd.f32 1.0, %v1305_v42 }
  0x96   :  { %v2210_v3 = vadd.f32 %v1274_v5, %v162_v9  ;;  %3012 = vlog2.f32 %v1311_v4  ;;  %v1320_v21 = vadd.f32 1.0, %v4465_v37  ;;  %v4477_v35 = vpop.eup %2998  ;;  %v1314_v28 = vmul.f32 -0.5, %v4444_v0 }
  0x97   :  { %v1283_v33 = vsel %vm4439_vm7, %v1280_v32, %v1277_v48  ;;  %v1298_v55 = vmul.f32 %v4389_v12, %v1297_v20  ;;  %vm4493_vm12 = vcmp.lt.f32.partialorder %v1299_v43, 0.0004427343  ;;  %v1329_v51 = vadd.f32 1.0, %v4477_v35  ;;  %v4550_v48 = vld [vmem:[%s7324_s0 + $0x130] sm:$0xff] }
  0x98   :  { %v2338_v9 = vsel %vm290_vm3, %v4197_v29, %v2210_v3  ;;  %v2211_v17 = vadd.f32 %v1283_v33, %v163_v7  ;;  %vm4502_vm13 = vcmp.lt.f32.partialorder %v1308_v14, 0.0004427343  ;;  %v846_v39 = vmul.f32 1.442695, %v683_v26 }
  0x99   :  { %3014 = vtanh.f32 %v2338_v9  ;;  %v1317_v52 = vand.u32 2147483647, %v4444_v0  ;;  %v684_v23 = vsub.f32 0.0, %v556_v54  ;;  %v1307_v53 = vmul.f32 %v4397_v11, %v1306_v16  ;;  %v4568_v16 = vld [vmem:[%s7324_s0 + $0x138] sm:$0xff] }
  0x9a   :  { %v3001_v34 = vpop.eup %3000  ;;  %3016 = vlog2.f32 %v1320_v21  ;;  %v2339_v7 = vsel %vm291_vm6, %v4237_v31, %v2211_v17  ;;  %v1315_v40 = vadd.f32 1.0, %v1314_v28  ;;  %v1323_v18 = vmul.f32 -0.5, %v4465_v37 }
  0x9b   :  { %v3003_v30 = vpop.eup %3002  ;;  %v1286_v22 = vmul.f32 0.6931472, %v3001_v34  ;;  %3018 = vtanh.f32 %v2339_v7  ;;  %vm295_vm14 = vcmp.ne.f32.partialorder %v4309_v10, %v4309_v10  ;;  %v848_v43 = vmul.f32 1.442695, %v684_v23  ;;  %v4582_v7 = vld [vmem:[%s7324_s0 + $0x140] sm:$0xff] }
  0x9c   :  { %v1295_v12 = vmul.f32 0.6931472, %v3003_v30  ;;  %3020 = vlog2.f32 %v1329_v51  ;;  %vm4532_vm15 = vcmp.lt.f32.partialorder %v1317_v52, 0.0004427343  ;;  %v557_v41 = vand.u32 2147483647, %v4513_v63 }
  0x9d   :  { %v3005_v60 = vpop.eup %3004  ;;  %v1292_v44 = vsel %vm4469_vm9, %v1289_v59, %v1286_v22  ;;  %3022 = vpow2.f32 %v846_v39  ;;  %v1332_v3 = vmul.f32 -0.5, %v4477_v35  ;;  %vm296_vm0 = vcmp.ne.f32.partialorder %v4326_v58, %v4326_v58 }
  0x9e   :  { %v3007_v61 = vpop.eup %3006  ;;  %v2592_v32 = vmul.f32 %v3005_v60, %v4132_v49  ;;  %v2212_v50 = vadd.f32 %v1292_v44, %v164_v45  ;;  %v1301_v13 = vsel %vm4493_vm12, %v1298_v55, %v1295_v12  ;;  %v1324_v14 = vadd.f32 1.0, %v1323_v18 }
  0x9f   :  { %v2213_v11 = vadd.f32 %v1301_v13, %v165_v57  ;;  %v1304_v2 = vmul.f32 0.6931472, %v3007_v61  ;;  %v1326_v57 = vand.u32 2147483647, %v4465_v37  ;;  %v4538_v5 = vpop.eup %3008  ;;  %v1316_v9 = vmul.f32 %v4444_v0, %v1315_v40 }
  0xa0   :  { %2720 = vst [vmem:[%s7325_s1 + $0xc0] sm:$0xff] %v2592_v32  ;;  %v2340_v49 = vsel %vm292_vm8, %v4254_v38, %v2212_v50  ;;  %v1338_v21 = vadd.f32 1.0, %v4538_v5  ;;  %v685_v33 = vsub.f32 0.0, %v557_v41  ;;  %v558_v17 = vand.u32 2147483647, %v4550_v48 }
  0xa1   :  { %3024 = vtanh.f32 %v2340_v49  ;;  %v2341_v42 = vsel %vm293_vm10, %v4271_v46, %v2213_v11  ;;  %v1310_v4 = vsel %vm4502_vm13, %v1307_v53, %v1304_v2  ;;  %v1333_v0 = vadd.f32 1.0, %v1332_v3 }
  0xa2   :  { %v3011_v1 = vpop.eup %3010  ;;  %3026 = vtanh.f32 %v2341_v42  ;;  %v2214_v20 = vadd.f32 %v1310_v4, %v166_v24  ;;  %v1335_v24 = vand.u32 2147483647, %v4477_v35  ;;  %v850_v28 = vmul.f32 1.442695, %v685_v33 }
  0xa3   :  { %v2593_v26 = vmul.f32 %v3011_v1, %v4179_v6  ;;  %3028 = vpow2.f32 %v848_v43  ;;  %v3013_v59 = vpop.eup %3012  ;;  %v1325_v55 = vmul.f32 %v4465_v37, %v1324_v14  ;;  %vm4574_vm1 = vcmp.lt.f32.partialorder %v1326_v57, 0.0004427343 }
  0xa4   :  { %v2342_v54 = vsel %vm294_vm11, %v4289_v47, %v2214_v20  ;;  %3030 = vlog2.f32 %v1338_v21  ;;  %v1313_v6 = vmul.f32 0.6931472, %v3013_v59  ;;  %v169_v51 = vmax.f32 %v4347_v56, 0.0 }
  0xa5   :  { %2721 = vst [vmem:[%s7325_s1 + $0xc8] sm:$0xff] %v2593_v26  ;;  %3032 = vtanh.f32 %v2342_v54  ;;  %v686_v30 = vsub.f32 0.0, %v558_v17  ;;  %v559_v37 = vand.u32 2147483647, %v4568_v16  ;;  %v1341_v23 = vmul.f32 -0.5, %v4538_v5  ;;  %v4651_v17 = vld [vmem:[%s7324_s0 + $0x150] sm:$0xff] }
  0xa6   :  { %v3015_v34 = vpop.eup %3014  ;;  %v1319_v39 = vsel %vm4532_vm15, %v1316_v9, %v1313_v6  ;;  %3034 = vpow2.f32 %v850_v28  ;;  %vm4595_vm2 = vcmp.lt.f32.partialorder %v1335_v24, 0.0004427343  ;;  %v560_v61 = vand.u32 2147483647, %v4582_v7 }
  0xa7   :  { %v3017_v22 = vpop.eup %3016  ;;  %v2594_v27 = vmul.f32 %v3015_v34, %v4197_v29  ;;  %v2215_v12 = vadd.f32 %v1319_v39, %v167_v15  ;;  %v852_v60 = vmul.f32 1.442695, %v686_v30  ;;  %v1334_v29 = vmul.f32 %v4477_v35, %v1333_v0  ;;  %v4603_v15 = vld [vmem:[%s7324_s0 + $0x148] sm:$0xff]  ;;  %v4668_v30 = vld [vmem:[%s7324_s0 + $0x158] sm:$0xff] }
  0xa8   :  { %v1322_v52 = vmul.f32 0.6931472, %v3017_v22  ;;  %v3019_v44 = vpop.eup %3018  ;;  %v687_v40 = vsub.f32 0.0, %v559_v37  ;;  %vm297_vm3 = vcmp.ne.f32.partialorder %v4347_v56, %v4347_v56  ;;  %v688_v49 = vsub.f32 0.0, %v560_v61 }
  0xa9   :  { %2722 = vst [vmem:[%s7325_s1 + $0xd0] sm:$0xff] %v2594_v27  ;;  %v3021_v32 = vpop.eup %3020  ;;  %v2595_v50 = vmul.f32 %v3019_v44, %v4237_v31  ;;  %v2343_v35 = vsel %vm295_vm14, %v4309_v10, %v2215_v12  ;;  %3036 = vpow2.f32 %v852_v60  ;;  %v1342_v31 = vadd.f32 1.0, %v1341_v23 }
  0xaa   :  { %v1328_v13 = vsel %vm4574_vm1, %v1325_v55, %v1322_v52  ;;  %3038 = vtanh.f32 %v2343_v35  ;;  %v1331_v11 = vmul.f32 0.6931472, %v3021_v32  ;;  %v4616_v2 = vpop.eup %3022  ;;  %v854_v43 = vmul.f32 1.442695, %v687_v40  ;;  %v4688_v32 = vld [vmem:[%s7324_s0 + $0x160] sm:$0xff] }
  0xab   :  { %v2216_v18 = vadd.f32 %v1328_v13, %v168_v8  ;;  %2723 = vst [vmem:[%s7325_s1 + $0xd8] sm:$0xff] %v2595_v50  ;;  %v561_v45 = vand.u32 2147483647, %v4603_v15  ;;  %v1344_v41 = vand.u32 2147483647, %v4538_v5  ;;  %v1347_v42 = vadd.f32 1.0, %v4616_v2 }
  0xac   :  { %v1337_v57 = vsel %vm4595_vm2, %v1334_v29, %v1331_v11  ;;  %v856_v1 = vmul.f32 1.442695, %v688_v49  ;;  %v1343_v59 = vmul.f32 %v4538_v5, %v1342_v31  ;;  %v1350_v0 = vmul.f32 -0.5, %v4616_v2 }
  0xad   :  { %v2344_v8 = vsel %vm296_vm0, %v4326_v58, %v2216_v18  ;;  %v2217_v3 = vadd.f32 %v1337_v57, %v169_v51  ;;  %v689_v21 = vsub.f32 0.0, %v561_v45  ;;  %vm4643_vm4 = vcmp.lt.f32.partialorder %v1344_v41, 0.0004427343 }
  0xae   :  { %v3025_v4 = vpop.eup %3024  ;;  %3040 = vtanh.f32 %v2344_v8  ;;  %vm298_vm5 = vcmp.ne.f32.partialorder %v4382_v25, %v4382_v25  ;;  %v562_v51 = vand.u32 2147483647, %v4651_v17  ;;  %v1351_v27 = vadd.f32 1.0, %v1350_v0 }
  0xaf   :  { %v3027_v20 = vpop.eup %3026  ;;  %v2596_v14 = vmul.f32 %v3025_v4, %v4254_v38  ;;  %3042 = vlog2.f32 %v1347_v42  ;;  %v2345_v33 = vsel %vm297_vm3, %v4347_v56, %v2217_v3  ;;  %v170_v38 = vmax.f32 %v4382_v25, 0.0 }
  0xb0   :  { %v4631_v26 = vpop.eup %3028  ;;  %v2597_v9 = vmul.f32 %v3027_v20, %v4271_v46  ;;  %3044 = vpow2.f32 %v854_v43  ;;  %v858_v28 = vmul.f32 1.442695, %v689_v21  ;;  %v690_v39 = vsub.f32 0.0, %v562_v51 }
  0xb1   :  { %v3031_v54 = vpop.eup %3030  ;;  %2724 = vst [vmem:[%s7325_s1 + $0xe0] sm:$0xff] %v2596_v14  ;;  %3046 = vtanh.f32 %v2345_v33  ;;  %v1356_v46 = vadd.f32 1.0, %v4631_v26  ;;  %v1359_v52 = vmul.f32 -0.5, %v4631_v26  ;;  %v563_v23 = vand.u32 2147483647, %v4668_v30 }
  0xb2   :  { %v3033_v5 = vpop.eup %3032  ;;  %2725 = vst [vmem:[%s7325_s1 + $0xe8] sm:$0xff] %v2597_v9  ;;  %v1340_v6 = vmul.f32 0.6931472, %v3031_v54  ;;  %3048 = vpow2.f32 %v856_v1  ;;  %v1353_v44 = vand.u32 2147483647, %v4616_v2  ;;  %v171_v40 = vmax.f32 %v4428_v62, 0.0 }
  0xb3   :  { %v2598_v34 = vmul.f32 %v3033_v5, %v4289_v47  ;;  %3050 = vlog2.f32 %v1356_v46  ;;  %v4658_v55 = vpop.eup %3034  ;;  %vm299_vm6 = vcmp.ne.f32.partialorder %v4428_v62, %v4428_v62  ;;  %v860_v61 = vmul.f32 1.442695, %v690_v39 }
  0xb4   :  { %v1346_v19 = vsel %vm4643_vm4, %v1343_v59, %v1340_v6  ;;  %3052 = vpow2.f32 %v858_v28  ;;  %v1365_v22 = vadd.f32 1.0, %v4658_v55  ;;  %v172_v50 = vmax.f32 %v4463_v36, 0.0 }
  0xb5   :  { %2726 = vst [vmem:[%s7325_s1 + $0xf0] sm:$0xff] %v2598_v34  ;;  %v2218_v47 = vadd.f32 %v1346_v19, %v170_v38  ;;  %v1362_v35 = vand.u32 2147483647, %v4631_v26  ;;  %v691_v13 = vsub.f32 0.0, %v563_v23  ;;  %v1352_v11 = vmul.f32 %v4616_v2, %v1351_v27 }
  0xb6   :  { %v4674_v37 = vpop.eup %3036  ;;  %3054 = vlog2.f32 %v1365_v22  ;;  %vm300_vm7 = vcmp.ne.f32.partialorder %v4463_v36, %v4463_v36  ;;  %v1360_v31 = vadd.f32 1.0, %v1359_v52  ;;  %v1368_v43 = vmul.f32 -0.5, %v4658_v55 }
  0xb7   :  { %v2346_v12 = vsel %vm298_vm5, %v4382_v25, %v2218_v47  ;;  %v3039_v60 = vpop.eup %3038  ;;  %v1374_v29 = vadd.f32 1.0, %v4674_v37  ;;  %vm4705_vm8 = vcmp.lt.f32.partialorder %v1353_v44, 0.0004427343  ;;  %v862_v57 = vmul.f32 1.442695, %v691_v13 }
  0xb8   :  { %3056 = vtanh.f32 %v2346_v12  ;;  %v2599_v53 = vmul.f32 %v3039_v60, %v4309_v10  ;;  %v4695_v10 = vld [vmem:[%s7324_s0 + $0x168] sm:$0xff]  ;;  %v564_v41 = vand.u32 2147483647, %v4688_v32  ;;  %v173_v4 = vmax.f32 %v4513_v63, 0.0 }
  0xb9   :  { %3058 = vlog2.f32 %v1374_v29  ;;  %v174_v3 = vmax.f32 %v4550_v48, 0.0  ;;  %v565_v1 = vand.u32 2147483647, %v4695_v10  ;;  %vm4718_vm9 = vcmp.lt.f32.partialorder %v1362_v35, 0.0004427343  ;;  %v4759_v29 = vld [vmem:[%s7324_s0 + $0x170] sm:$0xff] }
  0xba   :  { %2727 = vst [vmem:[%s7325_s1 + $0xf8] sm:$0xff] %v2599_v53  ;;  %3060 = vpow2.f32 %v860_v61  ;;  %v1377_v14 = vmul.f32 -0.5, %v4674_v37  ;;  %v1361_v54 = vmul.f32 %v4631_v26, %v1360_v31  ;;  %vm301_vm10 = vcmp.ne.f32.partialorder %v4513_v63, %v4513_v63 }
  0xbb   :  { %v3041_v18 = vpop.eup %3040  ;;  %3062 = vpow2.f32 %v862_v57  ;;  %v1369_v38 = vadd.f32 1.0, %v1368_v43  ;;  %v1371_v5 = vand.u32 2147483647, %v4658_v55  ;;  %v692_v6 = vsub.f32 0.0, %v564_v41 }
  0xbc   :  { %v3043_v49 = vpop.eup %3042  ;;  %v2600_v45 = vmul.f32 %v3041_v18, %v4326_v58  ;;  %v1380_v28 = vand.u32 2147483647, %v4674_v37  ;;  %v693_v34 = vsub.f32 0.0, %v565_v1  ;;  %vm302_vm11 = vcmp.ne.f32.partialorder %v4550_v48, %v4550_v48 }
  0xbd   :  { %v4710_v42 = vpop.eup %3044  ;;  %v1349_v2 = vmul.f32 0.6931472, %v3043_v49  ;;  %v1378_v51 = vadd.f32 1.0, %v1377_v14  ;;  %v1370_v39 = vmul.f32 %v4658_v55, %v1369_v38  ;;  %v175_v12 = vmax.f32 %v4568_v16, 0.0 }
  0xbe   :  { %v3047_v20 = vpop.eup %3046  ;;  %2728 = vst [vmem:[%s7325_s1 + $0x100] sm:$0xff] %v2600_v45  ;;  %v1383_v21 = vadd.f32 1.0, %v4710_v42  ;;  %v1386_v47 = vmul.f32 -0.5, %v4710_v42  ;;  %vm4752_vm12 = vcmp.lt.f32.partialorder %v1371_v5, 0.0004427343  ;;  %vm303_vm14 = vcmp.ne.f32.partialorder %v4568_v16, %v4568_v16 }
  0xbf   :  { %v4724_v9 = vpop.eup %3048  ;;  %v2601_v33 = vmul.f32 %v3047_v20, %v4347_v56  ;;  %v1355_v59 = vsel %vm4705_vm8, %v1352_v11, %v1349_v2  ;;  %v864_v44 = vmul.f32 1.442695, %v692_v6  ;;  %vm4761_vm13 = vcmp.lt.f32.partialorder %v1380_v28, 0.0004427343 }
  0xc0   :  { %v3051_v24 = vpop.eup %3050  ;;  %v2219_v46 = vadd.f32 %v1355_v59, %v171_v40  ;;  %3064 = vlog2.f32 %v1383_v21  ;;  %v1392_v26 = vadd.f32 1.0, %v4724_v9  ;;  %v866_v55 = vmul.f32 1.442695, %v693_v34 }
  0xc1   :  { %v4733_v0 = vpop.eup %3052  ;;  %2729 = vst [vmem:[%s7325_s1 + $0x108] sm:$0xff] %v2601_v33  ;;  %v1358_v56 = vmul.f32 0.6931472, %v3051_v24  ;;  %v1379_v13 = vmul.f32 %v4674_v37, %v1378_v51  ;;  %v1387_v18 = vadd.f32 1.0, %v1386_v47  ;;  %v1395_v43 = vmul.f32 -0.5, %v4724_v9  ;;  %v4804_v24 = vld [vmem:[%s7324_s0 + $0x178] sm:$0xff] }
  0xc2   :  { %v2347_v19 = vsel %vm299_vm6, %v4428_v62, %v2219_v46  ;;  %v1401_v22 = vadd.f32 1.0, %v4733_v0  ;;  %v1404_v49 = vmul.f32 -0.5, %v4733_v0  ;;  %v566_v37 = vand.u32 2147483647, %v4759_v29  ;;  %v4809_v46 = vld [vmem:[%s7324_s0 + $0x180] sm:$0xff] }
  0xc3   :  { %3066 = vtanh.f32 %v2347_v19  ;;  %v1364_v27 = vsel %vm4718_vm9, %v1361_v54, %v1358_v56  ;;  %v3055_v52 = vpop.eup %3054  ;;  %v1389_v57 = vand.u32 2147483647, %v4710_v42  ;;  %v176_v41 = vmax.f32 %v4582_v7, 0.0 }
  0xc4   :  { %v2220_v23 = vadd.f32 %v1364_v27, %v172_v50  ;;  %3068 = vlog2.f32 %v1392_v26  ;;  %v1367_v40 = vmul.f32 0.6931472, %v3055_v52  ;;  %v1398_v20 = vand.u32 2147483647, %v4724_v9 }
  0xc5   :  { %v3057_v53 = vpop.eup %3056  ;;  %3070 = vlog2.f32 %v1401_v22  ;;  %v694_v58 = vsub.f32 0.0, %v566_v37  ;;  %v1396_v33 = vadd.f32 1.0, %v1395_v43  ;;  %v1405_v59 = vadd.f32 1.0, %v1404_v49  ;;  %v4831_v22 = vld [vmem:[%s7324_s0 + $0x188] sm:$0xff] }
  0xc6   :  { %v2602_v50 = vmul.f32 %v3057_v53, %v4382_v25  ;;  %v2348_v35 = vsel %vm300_vm7, %v4463_v36, %v2220_v23  ;;  %v3059_v11 = vpop.eup %3058  ;;  %v1373_v31 = vsel %vm4752_vm12, %v1370_v39, %v1367_v40  ;;  %v1388_v54 = vmul.f32 %v4710_v42, %v1387_v18 }
  0xc7   :  { %3072 = vtanh.f32 %v2348_v35  ;;  %v4775_v45 = vpop.eup %3060  ;;  %v2221_v25 = vadd.f32 %v1373_v31, %v173_v4  ;;  %v1376_v8 = vmul.f32 0.6931472, %v3059_v11  ;;  %vm304_vm15 = vcmp.ne.f32.partialorder %v4582_v7, %v4582_v7 }
  0xc8   :  { %2730 = vst [vmem:[%s7325_s1 + $0x110] sm:$0xff] %v2602_v50  ;;  %3074 = vpow2.f32 %v864_v44  ;;  %v1410_v2 = vadd.f32 1.0, %v4775_v45  ;;  %v4793_v14 = vpop.eup %3062  ;;  %vm4815_vm0 = vcmp.lt.f32.partialorder %v1389_v57, 0.0004427343  ;;  %v1407_v6 = vand.u32 2147483647, %v4733_v0 }
  0xc9   :  { %3076 = vpow2.f32 %v866_v55  ;;  %v2349_v1 = vsel %vm301_vm10, %v4513_v63, %v2221_v25  ;;  %v1382_v4 = vsel %vm4761_vm13, %v1379_v13, %v1376_v8  ;;  %v1419_v38 = vadd.f32 1.0, %v4793_v14 }
  0xca   :  { %3078 = vtanh.f32 %v2349_v1  ;;  %v2222_v21 = vadd.f32 %v1382_v4, %v174_v3  ;;  %v868_v56 = vmul.f32 1.442695, %v694_v58  ;;  %vm4820_vm1 = vcmp.lt.f32.partialorder %v1398_v20, 0.0004427343 }
  0xcb   :  { %3080 = vlog2.f32 %v1410_v2  ;;  %v177_v34 = vmax.f32 %v4603_v15, 0.0  ;;  %v1397_v19 = vmul.f32 %v4724_v9, %v1396_v33  ;;  %v1406_v51 = vmul.f32 %v4733_v0, %v1405_v59 }
  0xcc   :  { %v2350_v42 = vsel %vm302_vm11, %v4550_v48, %v2222_v21  ;;  %v567_v47 = vand.u32 2147483647, %v4804_v24  ;;  %v1413_v52 = vmul.f32 -0.5, %v4775_v45  ;;  %v568_v23 = vand.u32 2147483647, %v4809_v46 }
  0xcd   :  { %v3065_v3 = vpop.eup %3064  ;;  %3082 = vtanh.f32 %v2350_v42  ;;  %vm4840_vm2 = vcmp.lt.f32.partialorder %v1407_v6, 0.0004427343  ;;  %vm305_vm3 = vcmp.ne.f32.partialorder %v4603_v15, %v4603_v15  ;;  %v1416_v55 = vand.u32 2147483647, %v4775_v45 }
  0xce   :  { %v1385_v28 = vmul.f32 0.6931472, %v3065_v3  ;;  %3084 = vlog2.f32 %v1419_v38  ;;  %v695_v53 = vsub.f32 0.0, %v567_v47  ;;  %v569_v50 = vand.u32 2147483647, %v4831_v22  ;;  %v4884_v3 = vld [vmem:[%s7324_s0 + $0x190] sm:$0xff] }
  0xcf   :  { %3086 = vpow2.f32 %v868_v56  ;;  %v1422_v35 = vmul.f32 -0.5, %v4793_v14  ;;  %v1414_v31 = vadd.f32 1.0, %v1413_v52  ;;  %v696_v43 = vsub.f32 0.0, %v568_v23 }
  0xd0   :  { %v3067_v27 = vpop.eup %3066  ;;  %v1391_v39 = vsel %vm4815_vm0, %v1388_v54, %v1385_v28  ;;  %v870_v13 = vmul.f32 1.442695, %v695_v53  ;;  %v178_v1 = vmax.f32 %v4651_v17, 0.0  ;;  %v697_v20 = vsub.f32 0.0, %v569_v50 }
  0xd1   :  { %v3069_v9 = vpop.eup %3068  ;;  %v2603_v0 = vmul.f32 %v3067_v27, %v4428_v62  ;;  %v2223_v60 = vadd.f32 %v1391_v39, %v175_v12  ;;  %v1425_v58 = vand.u32 2147483647, %v4793_v14  ;;  %v1415_v54 = vmul.f32 %v4775_v45, %v1414_v31 }
  0xd2   :  { %v3071_v40 = vpop.eup %3070  ;;  %v1394_v61 = vmul.f32 0.6931472, %v3069_v9  ;;  %v872_v38 = vmul.f32 1.442695, %v696_v43  ;;  %vm306_vm4 = vcmp.ne.f32.partialorder %v4651_v17, %v4651_v17  ;;  %vm4889_vm5 = vcmp.lt.f32.partialorder %v1416_v55, 0.0004427343 }
  0xd3   :  { %2731 = vst [vmem:[%s7325_s1 + $0x118] sm:$0xff] %v2603_v0  ;;  %v2351_v62 = vsel %vm303_vm14, %v4568_v16, %v2223_v60  ;;  %v1403_v12 = vmul.f32 0.6931472, %v3071_v40  ;;  %v179_v45 = vmax.f32 %v4668_v30, 0.0  ;;  %v874_v28 = vmul.f32 1.442695, %v697_v20 }
  0xd4   :  { %v3073_v18 = vpop.eup %3072  ;;  %3088 = vtanh.f32 %v2351_v62  ;;  %v1400_v11 = vsel %vm4820_vm1, %v1397_v19, %v1394_v61  ;;  %vm4898_vm6 = vcmp.lt.f32.partialorder %v1425_v58, 0.0004427343  ;;  %v570_v19 = vand.u32 2147483647, %v4884_v3 }
  0xd5   :  { %v4858_v49 = vpop.eup %3074  ;;  %v2604_v25 = vmul.f32 %v3073_v18, %v4463_v36  ;;  %v2224_v8 = vadd.f32 %v1400_v11, %v176_v41  ;;  %v1409_v37 = vsel %vm4840_vm2, %v1406_v51, %v1403_v12  ;;  %3090 = vpow2.f32 %v870_v13  ;;  %v4933_v18 = vld [vmem:[%s7324_s0 + $0x1a0] sm:$0xff] }
  0xd6   :  { %v4863_v57 = vpop.eup %3076  ;;  %v2225_v2 = vadd.f32 %v1409_v37, %v177_v34  ;;  %v1428_v4 = vadd.f32 1.0, %v4858_v49  ;;  %v1423_v41 = vadd.f32 1.0, %v1422_v35  ;;  %v1431_v39 = vmul.f32 -0.5, %v4858_v49 }
  0xd7   :  { %2732 = vst [vmem:[%s7325_s1 + $0x120] sm:$0xff] %v2604_v25  ;;  %v2352_v36 = vsel %vm304_vm15, %v4582_v7, %v2224_v8  ;;  %v1437_v21 = vadd.f32 1.0, %v4863_v57  ;;  %v3079_v33 = vpop.eup %3078  ;;  %v698_v0 = vsub.f32 0.0, %v570_v19  ;;  %vm307_vm7 = vcmp.ne.f32.partialorder %v4668_v30, %v4668_v30  ;;  %v4946_v8 = vld [vmem:[%s7324_s0 + $0x1a8] sm:$0xff] }
  0xd8   :  { %3092 = vtanh.f32 %v2352_v36  ;;  %v2353_v59 = vsel %vm305_vm3, %v4603_v15, %v2225_v2  ;;  %v3081_v42 = vpop.eup %3080  ;;  %v2605_v5 = vmul.f32 %v3079_v33, %v4513_v63  ;;  %v1424_v63 = vmul.f32 %v4793_v14, %v1423_v41  ;;  %v4910_v14 = vld [vmem:[%s7324_s0 + $0x198] sm:$0xff] }
  0xd9   :  { %3094 = vtanh.f32 %v2353_v59  ;;  %v1412_v56 = vmul.f32 0.6931472, %v3081_v42  ;;  %v876_v40 = vmul.f32 1.442695, %v698_v0  ;;  %v571_v61 = vand.u32 2147483647, %v4910_v14 }
  0xda   :  { %3096 = vlog2.f32 %v1428_v4  ;;  %v3083_v26 = vpop.eup %3082  ;;  %2733 = vst [vmem:[%s7325_s1 + $0x128] sm:$0xff] %v2605_v5  ;;  %v180_v50 = vmax.f32 %v4688_v32, 0.0  ;;  %v1432_v12 = vadd.f32 1.0, %v1431_v39  ;;  %v181_v35 = vmax.f32 %v4695_v10, 0.0 }
  0xdb   :  { %3098 = vlog2.f32 %v1437_v21  ;;  %v3085_v51 = vpop.eup %3084  ;;  %v2606_v47 = vmul.f32 %v3083_v26, %v4550_v48  ;;  %v1418_v27 = vsel %vm4889_vm5, %v1415_v54, %v1412_v56  ;;  %v1440_v48 = vmul.f32 -0.5, %v4863_v57 }
  0xdc   :  { %3100 = vpow2.f32 %v872_v38  ;;  %v4912_v52 = vpop.eup %3086  ;;  %v2226_v23 = vadd.f32 %v1418_v27, %v178_v1  ;;  %v1421_v9 = vmul.f32 0.6931472, %v3085_v51  ;;  %v699_v13 = vsub.f32 0.0, %v571_v61 }
  0xdd   :  { %3102 = vpow2.f32 %v874_v28  ;;  %2734 = vst [vmem:[%s7325_s1 + $0x130] sm:$0xff] %v2606_v47  ;;  %v1446_v60 = vadd.f32 1.0, %v4912_v52  ;;  %v1449_v25 = vmul.f32 -0.5, %v4912_v52  ;;  %v1434_v37 = vand.u32 2147483647, %v4858_v49 }
  0xde   :  { %v2354_v44 = vsel %vm306_vm4, %v4651_v17, %v2226_v23  ;;  %v1427_v53 = vsel %vm4898_vm6, %v1424_v63, %v1421_v9  ;;  %v1441_v2 = vadd.f32 1.0, %v1440_v48  ;;  %vm308_vm8 = vcmp.ne.f32.partialorder %v4688_v32, %v4688_v32  ;;  %v4999_v23 = vld [vmem:[%s7324_s0 + $0x1b0] sm:$0xff] }
  0xdf   :  { %3104 = vtanh.f32 %v2354_v44  ;;  %v2227_v55 = vadd.f32 %v1427_v53, %v179_v45  ;;  %v878_v4 = vmul.f32 1.442695, %v699_v13  ;;  %v572_v20 = vand.u32 2147483647, %v4933_v18 }
  0xe0   :  { %3106 = vlog2.f32 %v1446_v60  ;;  %v1433_v41 = vmul.f32 %v4858_v49, %v1432_v12  ;;  %vm309_vm9 = vcmp.ne.f32.partialorder %v4695_v10, %v4695_v10  ;;  %v573_v58 = vand.u32 2147483647, %v4946_v8 }
  0xe1   :  { %v3089_v62 = vpop.eup %3088  ;;  %v2355_v43 = vsel %vm307_vm7, %v4668_v30, %v2227_v55  ;;  %3108 = vpow2.f32 %v876_v40  ;;  %v1450_v59 = vadd.f32 1.0, %v1449_v25  ;;  %v1452_v54 = vand.u32 2147483647, %v4912_v52 }
  0xe2   :  { %v4935_v11 = vpop.eup %3090  ;;  %v2607_v31 = vmul.f32 %v3089_v62, %v4568_v16  ;;  %3110 = vtanh.f32 %v2355_v43  ;;  %v1443_v16 = vand.u32 2147483647, %v4863_v57  ;;  %vm4964_vm10 = vcmp.lt.f32.partialorder %v1434_v37, 0.0004427343 }
  0xe3   :  { %v1455_v1 = vadd.f32 1.0, %v4935_v11  ;;  %v1442_v49 = vmul.f32 %v4863_v57, %v1441_v2  ;;  %v182_v6 = vmax.f32 %v4759_v29, 0.0  ;;  %v700_v28 = vsub.f32 0.0, %v572_v20 }
  0xe4   :  { %2735 = vst [vmem:[%s7325_s1 + $0x138] sm:$0xff] %v2607_v31  ;;  %vm4973_vm11 = vcmp.lt.f32.partialorder %v1443_v16, 0.0004427343  ;;  %vm310_vm12 = vcmp.ne.f32.partialorder %v4759_v29, %v4759_v29  ;;  %v183_v63 = vmax.f32 %v4804_v24, 0.0  ;;  %v701_v34 = vsub.f32 0.0, %v573_v58 }
  0xe5   :  { %v3093_v36 = vpop.eup %3092  ;;  %3112 = vlog2.f32 %v1455_v1  ;;  %v1451_v47 = vmul.f32 %v4912_v52, %v1450_v59  ;;  %vm4991_vm13 = vcmp.lt.f32.partialorder %v1452_v54, 0.0004427343  ;;  %v1461_v48 = vand.u32 2147483647, %v4935_v11  ;;  %v5041_v59 = vld [vmem:[%s7324_s0 + $0x1c0] sm:$0xff] }
  0xe6   :  { %v3095_v21 = vpop.eup %3094  ;;  %v2608_v33 = vmul.f32 %v3093_v36, %v4582_v7  ;;  %3114 = vpow2.f32 %v878_v4  ;;  %v880_v53 = vmul.f32 1.442695, %v700_v28  ;;  %v882_v55 = vmul.f32 1.442695, %v701_v34  ;;  %v5032_v4 = vld [vmem:[%s7324_s0 + $0x1b8] sm:$0xff]  ;;  %v5066_v34 = vld [vmem:[%s7324_s0 + $0x1c8] sm:$0xff] }
  0xe7   :  { %v3097_v38 = vpop.eup %3096  ;;  %v2609_v42 = vmul.f32 %v3095_v21, %v4603_v15  ;;  %v1458_v15 = vmul.f32 -0.5, %v4935_v11  ;;  %vm5018_vm14 = vcmp.lt.f32.partialorder %v1461_v48, 0.0004427343  ;;  %v184_v37 = vmax.f32 %v4809_v46, 0.0 }
  0xe8   :  { %v3099_v56 = vpop.eup %3098  ;;  %2736 = vst [vmem:[%s7325_s1 + $0x140] sm:$0xff] %v2608_v33  ;;  %v1430_v7 = vmul.f32 0.6931472, %v3097_v38  ;;  %vm311_vm15 = vcmp.ne.f32.partialorder %v4804_v24, %v4804_v24  ;;  %vm312_vm0 = vcmp.ne.f32.partialorder %v4809_v46, %v4809_v46  ;;  %vm313_vm3 = vcmp.ne.f32.partialorder %v4831_v22, %v4831_v22 }
  0xe9   :  { %v4978_v26 = vpop.eup %3100  ;;  %2737 = vst [vmem:[%s7325_s1 + $0x148] sm:$0xff] %v2609_v42  ;;  %v1439_v57 = vmul.f32 0.6931472, %v3099_v56  ;;  %v1459_v44 = vadd.f32 1.0, %v1458_v15  ;;  %v575_v42 = vand.u32 2147483647, %v5032_v4  ;;  %vm314_vm5 = vcmp.ne.f32.partialorder %v4884_v3, %v4884_v3 }
  0xea   :  { %v4986_v19 = vpop.eup %3102  ;;  %v1436_v51 = vsel %vm4964_vm10, %v1433_v41, %v1430_v7  ;;  %v1464_v39 = vadd.f32 1.0, %v4978_v26  ;;  %v1467_v13 = vmul.f32 -0.5, %v4978_v26  ;;  %v1470_v33 = vand.u32 2147483647, %v4978_v26 }
  0xeb   :  { %v2228_v9 = vadd.f32 %v1436_v51, %v180_v50  ;;  %v1445_v0 = vsel %vm4973_vm11, %v1442_v49, %v1439_v57  ;;  %v1473_v60 = vadd.f32 1.0, %v4986_v19  ;;  %v574_v50 = vand.u32 2147483647, %v4999_v23 }
  0xec   :  { %v2229_v52 = vadd.f32 %v1445_v0, %v181_v35  ;;  %3116 = vlog2.f32 %v1464_v39  ;;  %v3105_v40 = vpop.eup %3104  ;;  %v1476_v1 = vmul.f32 -0.5, %v4986_v19  ;;  %v703_v15 = vsub.f32 0.0, %v575_v42 }
  0xed   :  { %v2356_v61 = vsel %vm308_vm8, %v4688_v32, %v2228_v9  ;;  %3118 = vlog2.f32 %v1473_v60  ;;  %v3107_v62 = vpop.eup %3106  ;;  %v2610_v12 = vmul.f32 %v3105_v40, %v4651_v17  ;;  %v1460_v17 = vmul.f32 %v4935_v11, %v1459_v44 }
  0xee   :  { %3120 = vtanh.f32 %v2356_v61  ;;  %v2357_v35 = vsel %vm309_vm9, %v4695_v10, %v2229_v52  ;;  %v5016_v31 = vpop.eup %3108  ;;  %v1448_v43 = vmul.f32 0.6931472, %v3107_v62  ;;  %v702_v41 = vsub.f32 0.0, %v574_v50 }
  0xef   :  { %3122 = vtanh.f32 %v2357_v35  ;;  %v3111_v2 = vpop.eup %3110  ;;  %2738 = vst [vmem:[%s7325_s1 + $0x150] sm:$0xff] %v2610_v12  ;;  %v1482_v16 = vadd.f32 1.0, %v5016_v31  ;;  %v1468_v11 = vadd.f32 1.0, %v1467_v13  ;;  %v1477_v49 = vadd.f32 1.0, %v1476_v1 }
  0xf0   :  { %3124 = vpow2.f32 %v880_v53  ;;  %v2611_v20 = vmul.f32 %v3111_v2, %v4668_v30  ;;  %v1454_v36 = vsel %vm4991_vm13, %v1451_v47, %v1448_v43  ;;  %v884_v38 = vmul.f32 1.442695, %v702_v41 }
  0xf1   :  { %3126 = vpow2.f32 %v882_v55  ;;  %v2230_v21 = vadd.f32 %v1454_v36, %v182_v6  ;;  %v1479_v6 = vand.u32 2147483647, %v4986_v19  ;;  %v1485_v45 = vmul.f32 -0.5, %v5016_v31 }
  0xf2   :  { %v3113_v58 = vpop.eup %3112  ;;  %3128 = vlog2.f32 %v1482_v16  ;;  %2739 = vst [vmem:[%s7325_s1 + $0x158] sm:$0xff] %v2611_v20  ;;  %v576_v57 = vand.u32 2147483647, %v5041_v59  ;;  %vm5068_vm1 = vcmp.lt.f32.partialorder %v1470_v33, 0.0004427343  ;;  %v185_v47 = vmax.f32 %v4831_v22, 0.0 }
  0xf3   :  { %v5043_v54 = vpop.eup %3114  ;;  %v1457_v30 = vmul.f32 0.6931472, %v3113_v58  ;;  %v2358_v5 = vsel %vm310_vm12, %v4759_v29, %v2230_v21  ;;  %v886_v27 = vmul.f32 1.442695, %v703_v15  ;;  %v1469_v39 = vmul.f32 %v4978_v26, %v1468_v11  ;;  %v5088_v26 = vld [vmem:[%s7324_s0 + $0x1d0] sm:$0xff] }
  0xf4   :  { %v1491_v56 = vadd.f32 1.0, %v5043_v54  ;;  %3130 = vtanh.f32 %v2358_v5  ;;  %v1478_v9 = vmul.f32 %v4986_v19, %v1477_v49  ;;  %v704_v0 = vsub.f32 0.0, %v576_v57  ;;  %v5210_v11 = vld [vmem:[%s7324_s0 + $0x1f0] sm:$0xff] }
  0xf5   :  { %v1463_v7 = vsel %vm5018_vm14, %v1460_v17, %v1457_v30  ;;  %vm5079_vm2 = vcmp.lt.f32.partialorder %v1479_v6, 0.0004427343  ;;  %v1486_v52 = vadd.f32 1.0, %v1485_v45  ;;  %v577_v44 = vand.u32 2147483647, %v5066_v34  ;;  %v5135_v6 = vld [vmem:[%s7324_s0 + $0x1d8] sm:$0xff] }
  0xf6   :  { %v2231_v28 = vadd.f32 %v1463_v7, %v183_v63  ;;  %3132 = vlog2.f32 %v1491_v56  ;;  %v1494_v61 = vmul.f32 -0.5, %v5043_v54  ;;  %v888_v55 = vmul.f32 1.442695, %v704_v0 }
  0xf7   :  { %3134 = vpow2.f32 %v884_v38  ;;  %v186_v62 = vmax.f32 %v4884_v3, 0.0  ;;  %v1488_v12 = vand.u32 2147483647, %v5016_v31  ;;  %v705_v25 = vsub.f32 0.0, %v577_v44 }
  0xf8   :  { %v2359_v63 = vsel %vm311_vm15, %v4804_v24, %v2231_v28  ;;  %v578_v20 = vand.u32 2147483647, %v5088_v26  ;;  %v1487_v41 = vmul.f32 %v5016_v31, %v1486_v52  ;;  %v1495_v58 = vadd.f32 1.0, %v1494_v61 }
  0xf9   :  { %v3117_v48 = vpop.eup %3116  ;;  %3136 = vtanh.f32 %v2359_v63  ;;  %vm5119_vm4 = vcmp.lt.f32.partialorder %v1488_v12, 0.0004427343  ;;  %v1497_v33 = vand.u32 2147483647, %v5043_v54  ;;  %v890_v42 = vmul.f32 1.442695, %v705_v25 }
  0xfa   :  { %v3119_v53 = vpop.eup %3118  ;;  %v1466_v40 = vmul.f32 0.6931472, %v3117_v48  ;;  %3138 = vpow2.f32 %v886_v27  ;;  %v187_v5 = vmax.f32 %v4910_v14, 0.0  ;;  %v706_v49 = vsub.f32 0.0, %v578_v20 }
  0xfb   :  { %v3121_v19 = vpop.eup %3120  ;;  %v1475_v50 = vmul.f32 0.6931472, %v3119_v53  ;;  %3140 = vpow2.f32 %v888_v55  ;;  %vm315_vm6 = vcmp.ne.f32.partialorder %v4910_v14, %v4910_v14  ;;  %v1496_v45 = vmul.f32 %v5043_v54, %v1495_v58  ;;  %v5200_v58 = vld [vmem:[%s7324_s0 + $0x1e8] sm:$0xff] }
  0xfc   :  { %v3123_v35 = vpop.eup %3122  ;;  %v2612_v13 = vmul.f32 %v3121_v19, %v4688_v32  ;;  %v1472_v43 = vsel %vm5068_vm1, %v1469_v39, %v1466_v40  ;;  %vm5143_vm7 = vcmp.lt.f32.partialorder %v1497_v33, 0.0004427343  ;;  %v188_v63 = vmax.f32 %v4933_v18, 0.0 }
  0xfd   :  { %v5097_v2 = vpop.eup %3124  ;;  %v2613_v17 = vmul.f32 %v3123_v35, %v4695_v10  ;;  %v2232_v1 = vadd.f32 %v1472_v43, %v184_v37  ;;  %v1481_v16 = vsel %vm5079_vm2, %v1478_v9, %v1475_v50  ;;  %v579_v39 = vand.u32 2147483647, %v5135_v6  ;;  %v5174_v35 = vld [vmem:[%s7324_s0 + $0x1e0] sm:$0xff] }
  0xfe   :  { %v5105_v36 = vpop.eup %3126  ;;  %2740 = vst [vmem:[%s7325_s1 + $0x160] sm:$0xff] %v2612_v13  ;;  %v2233_v32 = vadd.f32 %v1481_v16, %v185_v47  ;;  %v1500_v10 = vadd.f32 1.0, %v5097_v2  ;;  %v1503_v54 = vmul.f32 -0.5, %v5097_v2  ;;  %v892_v0 = vmul.f32 1.442695, %v706_v49 }
  0xff   :  { %v3129_v21 = vpop.eup %3128  ;;  %2741 = vst [vmem:[%s7325_s1 + $0x168] sm:$0xff] %v2613_v17  ;;  %v2360_v37 = vsel %vm312_vm0, %v4809_v46, %v2232_v1  ;;  %v1509_v31 = vadd.f32 1.0, %v5105_v36  ;;  %v1512_v52 = vmul.f32 -0.5, %v5105_v36  ;;  %v707_v44 = vsub.f32 0.0, %v579_v39 }
 0x100   :  { %3142 = vtanh.f32 %v2360_v37  ;;  %v2361_v30 = vsel %vm313_vm3, %v4831_v22, %v2233_v32  ;;  %v1484_v38 = vmul.f32 0.6931472, %v3129_v21  ;;  %v1506_v55 = vand.u32 2147483647, %v5097_v2 }
 0x101   :  { %3144 = vtanh.f32 %v2361_v30  ;;  %v3131_v56 = vpop.eup %3130  ;;  %v189_v19 = vmax.f32 %v4946_v8, 0.0  ;;  %v1515_v50 = vand.u32 2147483647, %v5105_v36  ;;  %v1504_v43 = vadd.f32 1.0, %v1503_v54 }
 0x102   :  { %v1490_v7 = vsel %vm5119_vm4, %v1487_v41, %v1484_v38  ;;  %3146 = vlog2.f32 %v1500_v10  ;;  %v2614_v28 = vmul.f32 %v3131_v56, %v4759_v29  ;;  %v894_v25 = vmul.f32 1.442695, %v707_v44 }
 0x103   :  { %v3133_v15 = vpop.eup %3132  ;;  %v2234_v57 = vadd.f32 %v1490_v7, %v186_v62  ;;  %3148 = vlog2.f32 %v1509_v31  ;;  %vm316_vm8 = vcmp.ne.f32.partialorder %v4933_v18, %v4933_v18  ;;  %v1513_v17 = vadd.f32 1.0, %v1512_v52 }
 0x104   :  { %v5147_v47 = vpop.eup %3134  ;;  %v1493_v27 = vmul.f32 0.6931472, %v3133_v15  ;;  %3150 = vpow2.f32 %v890_v42  ;;  %2742 = vst [vmem:[%s7325_s1 + $0x170] sm:$0xff] %v2614_v28  ;;  %v190_v1 = vmax.f32 %v4999_v23, 0.0  ;;  %vm5189_vm9 = vcmp.lt.f32.partialorder %v1506_v55, 0.0004427343 }
 0x105   :  { %v2362_v29 = vsel %vm314_vm5, %v4884_v3, %v2234_v57  ;;  %v1518_v9 = vadd.f32 1.0, %v5147_v47  ;;  %v1521_v62 = vmul.f32 -0.5, %v5147_v47  ;;  %vm317_vm10 = vcmp.ne.f32.partialorder %v4946_v8, %v4946_v8 }
 0x106   :  { %v3137_v48 = vpop.eup %3136  ;;  %3152 = vtanh.f32 %v2362_v29  ;;  %v1499_v60 = vsel %vm5143_vm7, %v1496_v45, %v1493_v27  ;;  %v191_v32 = vmax.f32 %v5032_v4, 0.0  ;;  %v580_v41 = vand.u32 2147483647, %v5174_v35 }
 0x107   :  { %v5163_v53 = vpop.eup %3138  ;;  %v2615_v40 = vmul.f32 %v3137_v48, %v4804_v24  ;;  %v2235_v61 = vadd.f32 %v1499_v60, %v187_v5  ;;  %3154 = vlog2.f32 %v1518_v9  ;;  %vm5202_vm11 = vcmp.lt.f32.partialorder %v1515_v50, 0.0004427343 }
 0x108   :  { %v1527_v12 = vadd.f32 1.0, %v5163_v53  ;;  %v5176_v13 = vpop.eup %3140  ;;  %3156 = vpow2.f32 %v892_v0  ;;  %v1522_v21 = vadd.f32 1.0, %v1521_v62  ;;  %v1524_v37 = vand.u32 2147483647, %v5147_v47 }
 0x109   :  { %2743 = vst [vmem:[%s7325_s1 + $0x178] sm:$0xff] %v2615_v40  ;;  %v2363_v24 = vsel %vm315_vm6, %v4910_v14, %v2235_v61  ;;  %v1536_v16 = vadd.f32 1.0, %v5176_v13  ;;  %v1505_v31 = vmul.f32 %v5097_v2, %v1504_v43  ;;  %v1530_v30 = vmul.f32 -0.5, %v5163_v53 }
 0x10a   :  { %3158 = vtanh.f32 %v2363_v24  ;;  %v708_v38 = vsub.f32 0.0, %v580_v41  ;;  %v1514_v49 = vmul.f32 %v5105_v36, %v1513_v17  ;;  %v1533_v56 = vand.u32 2147483647, %v5163_v53 }
 0x10b   :  { %3160 = vlog2.f32 %v1527_v12  ;;  %v581_v7 = vand.u32 2147483647, %v5200_v58  ;;  %vm318_vm12 = vcmp.ne.f32.partialorder %v4999_v23, %v4999_v23  ;;  %v1539_v2 = vmul.f32 -0.5, %v5176_v13 }
 0x10c   :  { %3162 = vlog2.f32 %v1536_v16  ;;  %v896_v28 = vmul.f32 1.442695, %v708_v38  ;;  %v582_v57 = vand.u32 2147483647, %v5210_v11  ;;  %vm5232_vm13 = vcmp.lt.f32.partialorder %v1524_v37, 0.0004427343 }
 0x10d   :  { %v3143_v33 = vpop.eup %3142  ;;  %3164 = vpow2.f32 %v894_v25  ;;  %v709_v39 = vsub.f32 0.0, %v581_v7  ;;  %v1531_v9 = vadd.f32 1.0, %v1530_v30  ;;  %vm5243_vm14 = vcmp.lt.f32.partialorder %v1533_v56, 0.0004427343  ;;  %v5298_v7 = vld [vmem:[%s7324_s0 + $0x200] sm:$0xff] }
 0x10e   :  { %v3145_v42 = vpop.eup %3144  ;;  %v2616_v5 = vmul.f32 %v3143_v33, %v4809_v46  ;;  %v5226_v46 = vld [vmem:[%s7324_s0 + $0x1f8] sm:$0xff]  ;;  %3166 = vpow2.f32 %v896_v28  ;;  %v710_v0 = vsub.f32 0.0, %v582_v57  ;;  %v1540_v55 = vadd.f32 1.0, %v1539_v2 }
 0x10f   :  { %v3147_v45 = vpop.eup %3146  ;;  %v2617_v15 = vmul.f32 %v3145_v42, %v4831_v22  ;;  %v1523_v22 = vmul.f32 %v5147_v47, %v1522_v21  ;;  %v583_v52 = vand.u32 2147483647, %v5226_v46  ;;  %v898_v50 = vmul.f32 1.442695, %v709_v39 }
 0x110   :  { %v3149_v36 = vpop.eup %3148  ;;  %2744 = vst [vmem:[%s7325_s1 + $0x180] sm:$0xff] %v2616_v5  ;;  %v1502_v51 = vmul.f32 0.6931472, %v3147_v45  ;;  %v900_v43 = vmul.f32 1.442695, %v710_v0  ;;  %v1541_v21 = vmul.f32 %v5176_v13, %v1540_v55  ;;  %v192_v5 = vmax.f32 %v5041_v59, 0.0 }
 0x111   :  { %v5236_v29 = vpop.eup %3150  ;;  %2745 = vst [vmem:[%s7325_s1 + $0x188] sm:$0xff] %v2617_v15  ;;  %v1511_v54 = vmul.f32 0.6931472, %v3149_v36  ;;  %v711_v20 = vsub.f32 0.0, %v583_v52  ;;  %vm319_vm0 = vcmp.ne.f32.partialorder %v5032_v4, %v5032_v4  ;;  %vm320_vm1 = vcmp.ne.f32.partialorder %v5041_v59, %v5041_v59 }
 0x112   :  { %v1508_v48 = vsel %vm5189_vm9, %v1505_v31, %v1502_v51  ;;  %v1545_v60 = vadd.f32 1.0, %v5236_v29  ;;  %v1548_v38 = vmul.f32 -0.5, %v5236_v29  ;;  %v1551_v36 = vand.u32 2147483647, %v5236_v29 }
 0x113   :  { %v3153_v44 = vpop.eup %3152  ;;  %v2236_v40 = vadd.f32 %v1508_v48, %v188_v63  ;;  %v1517_v61 = vsel %vm5202_vm11, %v1514_v49, %v1511_v54  ;;  %v1542_v63 = vand.u32 2147483647, %v5176_v13  ;;  %v902_v56 = vmul.f32 1.442695, %v711_v20 }
 0x114   :  { %v3155_v62 = vpop.eup %3154  ;;  %v2618_v12 = vmul.f32 %v3153_v44, %v4884_v3  ;;  %v2237_v24 = vadd.f32 %v1517_v61, %v189_v19  ;;  %3168 = vlog2.f32 %v1545_v60  ;;  %v1532_v19 = vmul.f32 %v5163_v53, %v1531_v9 }
 0x115   :  { %v2364_v25 = vsel %vm316_vm8, %v4933_v18, %v2236_v40  ;;  %v1520_v17 = vmul.f32 0.6931472, %v3155_v62  ;;  %3170 = vpow2.f32 %v898_v50  ;;  %v5261_v16 = vpop.eup %3156  ;;  %vm5280_vm15 = vcmp.lt.f32.partialorder %v1542_v63, 0.0004427343  ;;  %v5337_v50 = vld [vmem:[%s7324_s0 + $0x208] sm:$0xff] }
 0x116   :  { %2746 = vst [vmem:[%s7325_s1 + $0x190] sm:$0xff] %v2618_v12  ;;  %3172 = vtanh.f32 %v2364_v25  ;;  %v2365_v3 = vsel %vm317_vm10, %v4946_v8, %v2237_v24  ;;  %v1554_v37 = vadd.f32 1.0, %v5261_v16  ;;  %v1549_v57 = vadd.f32 1.0, %v1548_v38 }
 0x117   :  { %v3159_v41 = vpop.eup %3158  ;;  %3174 = vtanh.f32 %v2365_v3  ;;  %v1526_v10 = vsel %vm5232_vm13, %v1523_v22, %v1520_v17  ;;  %v1557_v22 = vmul.f32 -0.5, %v5261_v16  ;;  %v584_v27 = vand.u32 2147483647, %v5298_v7 }
 0x118   :  { %v3161_v33 = vpop.eup %3160  ;;  %v2619_v31 = vmul.f32 %v3159_v41, %v4910_v14  ;;  %v2238_v30 = vadd.f32 %v1526_v10, %v190_v1  ;;  %3176 = vpow2.f32 %v900_v43  ;;  %v1560_v9 = vand.u32 2147483647, %v5261_v16 }
 0x119   :  { %v3163_v53 = vpop.eup %3162  ;;  %v1529_v42 = vmul.f32 0.6931472, %v3161_v33  ;;  %3178 = vlog2.f32 %v1554_v37  ;;  %vm321_vm2 = vcmp.ne.f32.partialorder %v5066_v34, %v5066_v34  ;;  %v1550_v60 = vmul.f32 %v5236_v29, %v1549_v57  ;;  %v5389_v57 = vld [vmem:[%s7324_s0 + $0x218] sm:$0xff] }
 0x11a   :  { %v5284_v13 = vpop.eup %3164  ;;  %2747 = vst [vmem:[%s7325_s1 + $0x198] sm:$0xff] %v2619_v31  ;;  %v2366_v14 = vsel %vm318_vm12, %v4999_v23, %v2238_v30  ;;  %v1538_v1 = vmul.f32 0.6931472, %v3163_v53  ;;  %v712_v52 = vsub.f32 0.0, %v584_v27  ;;  %vm5329_vm3 = vcmp.lt.f32.partialorder %v1551_v36, 0.0004427343 }
 0x11b   :  { %3180 = vtanh.f32 %v2366_v14  ;;  %v1535_v45 = vsel %vm5243_vm14, %v1532_v19, %v1529_v42  ;;  %v1563_v15 = vadd.f32 1.0, %v5284_v13  ;;  %v5312_v39 = vpop.eup %3166  ;;  %v1566_v48 = vmul.f32 -0.5, %v5284_v13  ;;  %v5375_v14 = vld [vmem:[%s7324_s0 + $0x210] sm:$0xff] }
 0x11c   :  { %v2239_v2 = vadd.f32 %v1535_v45, %v191_v32  ;;  %v1544_v28 = vsel %vm5280_vm15, %v1541_v21, %v1538_v1  ;;  %v193_v32 = vmax.f32 %v5066_v34, 0.0  ;;  %v1572_v47 = vadd.f32 1.0, %v5312_v39 }
 0x11d   :  { %v2240_v51 = vadd.f32 %v1544_v28, %v192_v5  ;;  %3182 = vlog2.f32 %v1563_v15  ;;  %v194_v61 = vmax.f32 %v5088_v26, 0.0  ;;  %v1558_v55 = vadd.f32 1.0, %v1557_v22 }
 0x11e   :  { %v2367_v54 = vsel %vm319_vm0, %v5032_v4, %v2239_v2  ;;  %3184 = vpow2.f32 %v902_v56  ;;  %vm322_vm4 = vcmp.ne.f32.partialorder %v5088_v26, %v5088_v26  ;;  %v1575_v29 = vmul.f32 -0.5, %v5312_v39 }
 0x11f   :  { %3186 = vtanh.f32 %v2367_v54  ;;  %v2368_v0 = vsel %vm320_vm1, %v5041_v59, %v2240_v51  ;;  %v904_v24 = vmul.f32 1.442695, %v712_v52  ;;  %vm5344_vm5 = vcmp.lt.f32.partialorder %v1560_v9, 0.0004427343 }
 0x120   :  { %3188 = vtanh.f32 %v2368_v0  ;;  %v195_v17 = vmax.f32 %v5135_v6, 0.0  ;;  %v1567_v63 = vadd.f32 1.0, %v1566_v48  ;;  %v585_v10 = vand.u32 2147483647, %v5337_v50 }
 0x121   :  { %v3169_v44 = vpop.eup %3168  ;;  %3190 = vlog2.f32 %v1572_v47  ;;  %v1559_v31 = vmul.f32 %v5261_v16, %v1558_v55  ;;  %v1576_v38 = vadd.f32 1.0, %v1575_v29  ;;  %v1578_v53 = vand.u32 2147483647, %v5312_v39 }
 0x122   :  { %v5339_v62 = vpop.eup %3170  ;;  %v1547_v12 = vmul.f32 0.6931472, %v3169_v44  ;;  %3192 = vpow2.f32 %v904_v24  ;;  %v713_v49 = vsub.f32 0.0, %v585_v10  ;;  %vm323_vm6 = vcmp.ne.f32.partialorder %v5135_v6, %v5135_v6 }
 0x123   :  { %v3173_v43 = vpop.eup %3172  ;;  %v1581_v3 = vadd.f32 1.0, %v5339_v62  ;;  %v1584_v5 = vmul.f32 -0.5, %v5339_v62  ;;  %v1568_v56 = vmul.f32 %v5284_v13, %v1567_v63  ;;  %v196_v45 = vmax.f32 %v5174_v35, 0.0 }
 0x124   :  { %v3175_v19 = vpop.eup %3174  ;;  %v2620_v20 = vmul.f32 %v3173_v43, %v4933_v18  ;;  %v1553_v41 = vsel %vm5329_vm3, %v1550_v60, %v1547_v12  ;;  %v1569_v18 = vand.u32 2147483647, %v5284_v13  ;;  %vm324_vm7 = vcmp.ne.f32.partialorder %v5174_v35, %v5174_v35  ;;  %v5421_v43 = vld [vmem:[%s7324_s0 + $0x220] sm:$0xff] }
 0x125   :  { %v5354_v21 = vpop.eup %3176  ;;  %v2621_v37 = vmul.f32 %v3175_v19, %v4946_v8  ;;  %v2241_v33 = vadd.f32 %v1553_v41, %v193_v32  ;;  %3194 = vlog2.f32 %v1581_v3  ;;  %v906_v28 = vmul.f32 1.442695, %v713_v49  ;;  %v5461_v49 = vld [vmem:[%s7324_s0 + $0x228] sm:$0xff] }
 0x126   :  { %v3179_v30 = vpop.eup %3178  ;;  %2748 = vst [vmem:[%s7325_s1 + $0x1a0] sm:$0xff] %v2620_v20  ;;  %v1590_v42 = vadd.f32 1.0, %v5354_v21  ;;  %vm5391_vm8 = vcmp.lt.f32.partialorder %v1569_v18, 0.0004427343  ;;  %vm5395_vm9 = vcmp.lt.f32.partialorder %v1578_v53, 0.0004427343  ;;  %v1577_v32 = vmul.f32 %v5312_v39, %v1576_v38 }
 0x127   :  { %2749 = vst [vmem:[%s7325_s1 + $0x1a8] sm:$0xff] %v2621_v37  ;;  %v2369_v8 = vsel %vm321_vm2, %v5066_v34, %v2241_v33  ;;  %v1556_v16 = vmul.f32 0.6931472, %v3179_v30  ;;  %v586_v22 = vand.u32 2147483647, %v5375_v14  ;;  %v1585_v9 = vadd.f32 1.0, %v1584_v5 }
 0x128   :  { %v3181_v1 = vpop.eup %3180  ;;  %3196 = vtanh.f32 %v2369_v8  ;;  %v1593_v47 = vmul.f32 -0.5, %v5354_v21  ;;  %v587_v52 = vand.u32 2147483647, %v5389_v57  ;;  %v1587_v24 = vand.u32 2147483647, %v5339_v62 }
 0x129   :  { %v2622_v15 = vmul.f32 %v3181_v1, %v4999_v23  ;;  %v1562_v2 = vsel %vm5344_vm5, %v1559_v31, %v1556_v16  ;;  %3198 = vlog2.f32 %v1590_v42  ;;  %v197_v25 = vmax.f32 %v5200_v58, 0.0 }
 0x12a   :  { %v3183_v36 = vpop.eup %3182  ;;  %v2242_v51 = vadd.f32 %v1562_v2, %v194_v61  ;;  %3200 = vpow2.f32 %v906_v28  ;;  %v714_v61 = vsub.f32 0.0, %v586_v22  ;;  %vm325_vm10 = vcmp.ne.f32.partialorder %v5200_v58, %v5200_v58  ;;  %v5469_v2 = vld [vmem:[%s7324_s0 + $0x230] sm:$0xff] }
 0x12b   :  { %v5400_v27 = vpop.eup %3184  ;;  %2750 = vst [vmem:[%s7325_s1 + $0x1b0] sm:$0xff] %v2622_v15  ;;  %v1565_v54 = vmul.f32 0.6931472, %v3183_v36  ;;  %v1586_v63 = vmul.f32 %v5339_v62, %v1585_v9  ;;  %v1596_v3 = vand.u32 2147483647, %v5354_v21  ;;  %v715_v19 = vsub.f32 0.0, %v587_v52 }
 0x12c   :  { %v3187_v0 = vpop.eup %3186  ;;  %v2370_v48 = vsel %vm322_vm4, %v5088_v26, %v2242_v51  ;;  %v1599_v60 = vadd.f32 1.0, %v5400_v27  ;;  %v1594_v10 = vadd.f32 1.0, %v1593_v47  ;;  %v588_v37 = vand.u32 2147483647, %v5421_v43 }
 0x12d   :  { %v3189_v44 = vpop.eup %3188  ;;  %v2623_v40 = vmul.f32 %v3187_v0, %v5032_v4  ;;  %3202 = vtanh.f32 %v2370_v48  ;;  %v1571_v39 = vsel %vm5391_vm8, %v1568_v56, %v1565_v54  ;;  %vm5443_vm11 = vcmp.lt.f32.partialorder %v1587_v24, 0.0004427343 }
 0x12e   :  { %v3191_v55 = vpop.eup %3190  ;;  %v2624_v12 = vmul.f32 %v3189_v44, %v5041_v59  ;;  %v2243_v29 = vadd.f32 %v1571_v39, %v195_v17  ;;  %3204 = vlog2.f32 %v1599_v60  ;;  %v908_v59 = vmul.f32 1.442695, %v714_v61  ;;  %v5494_v39 = vld [vmem:[%s7324_s0 + $0x238] sm:$0xff] }
 0x12f   :  { %2751 = vst [vmem:[%s7325_s1 + $0x1b8] sm:$0xff] %v2623_v40  ;;  %v1574_v4 = vmul.f32 0.6931472, %v3191_v55  ;;  %v5438_v20 = vpop.eup %3192  ;;  %v1602_v62 = vmul.f32 -0.5, %v5400_v27  ;;  %v910_v53 = vmul.f32 1.442695, %v715_v19  ;;  %vm326_vm13 = vcmp.ne.f32.partialorder %v5210_v11, %v5210_v11 }
 0x130   :  { %2752 = vst [vmem:[%s7325_s1 + $0x1c0] sm:$0xff] %v2624_v12  ;;  %v2371_v17 = vsel %vm323_vm6, %v5135_v6, %v2243_v29  ;;  %v1608_v18 = vadd.f32 1.0, %v5438_v20  ;;  %v716_v42 = vsub.f32 0.0, %v588_v37  ;;  %v198_v16 = vmax.f32 %v5210_v11, 0.0 }
 0x131   :  { %3206 = vtanh.f32 %v2371_v17  ;;  %v1580_v41 = vsel %vm5395_vm9, %v1577_v32, %v1574_v4  ;;  %vm5454_vm12 = vcmp.lt.f32.partialorder %v1596_v3, 0.0004427343  ;;  %v1603_v13 = vadd.f32 1.0, %v1602_v62 }
 0x132   :  { %v3195_v33 = vpop.eup %3194  ;;  %v2244_v31 = vadd.f32 %v1580_v41, %v196_v45  ;;  %3208 = vpow2.f32 %v908_v59  ;;  %v1595_v45 = vmul.f32 %v5354_v21, %v1594_v10  ;;  %v912_v15 = vmul.f32 1.442695, %v716_v42  ;;  %v5506_v59 = vld [vmem:[%s7324_s0 + $0x240] sm:$0xff] }
 0x133   :  { %v1583_v38 = vmul.f32 0.6931472, %v3195_v33  ;;  %3210 = vlog2.f32 %v1608_v18  ;;  %v1605_v22 = vand.u32 2147483647, %v5400_v27  ;;  %v589_v54 = vand.u32 2147483647, %v5461_v49 }
 0x134   :  { %v2372_v8 = vsel %vm324_vm7, %v5174_v35, %v2244_v31  ;;  %v1611_v21 = vmul.f32 -0.5, %v5438_v20  ;;  %v590_v9 = vand.u32 2147483647, %v5469_v2  ;;  %v1604_v52 = vmul.f32 %v5400_v27, %v1603_v13 }
 0x135   :  { %v3197_v1 = vpop.eup %3196  ;;  %3212 = vtanh.f32 %v2372_v8  ;;  %v1589_v56 = vsel %vm5443_vm11, %v1586_v63, %v1583_v38  ;;  %v717_v44 = vsub.f32 0.0, %v589_v54  ;;  %v199_v12 = vmax.f32 %v5226_v46, 0.0 }
 0x136   :  { %v3199_v28 = vpop.eup %3198  ;;  %v2625_v36 = vmul.f32 %v3197_v1, %v5066_v34  ;;  %v2245_v51 = vadd.f32 %v1589_v56, %v197_v25  ;;  %3214 = vpow2.f32 %v910_v53  ;;  %v718_v40 = vsub.f32 0.0, %v590_v9 }
 0x137   :  { %v1592_v23 = vmul.f32 0.6931472, %v3199_v28  ;;  %3216 = vpow2.f32 %v912_v15  ;;  %v5474_v32 = vpop.eup %3200  ;;  %vm5498_vm14 = vcmp.lt.f32.partialorder %v1605_v22, 0.0004427343  ;;  %v1612_v4 = vadd.f32 1.0, %v1611_v21 }
 0x138   :  { %2753 = vst [vmem:[%s7325_s1 + $0x1c8] sm:$0xff] %v2625_v36  ;;  %v2373_v34 = vsel %vm325_vm10, %v5200_v58, %v2245_v51  ;;  %v1617_v48 = vadd.f32 1.0, %v5474_v32  ;;  %v914_v25 = vmul.f32 1.442695, %v717_v44  ;;  %v916_v17 = vmul.f32 1.442695, %v718_v40 }
 0x139   :  { %3218 = vtanh.f32 %v2373_v34  ;;  %v1598_v0 = vsel %vm5454_vm12, %v1595_v45, %v1592_v23  ;;  %v591_v63 = vand.u32 2147483647, %v5494_v39  ;;  %vm327_vm15 = vcmp.ne.f32.partialorder %v5226_v46, %v5226_v46 }
 0x13a   :  { %v3203_v47 = vpop.eup %3202  ;;  %v2246_v60 = vadd.f32 %v1598_v0, %v198_v16  ;;  %3220 = vlog2.f32 %v1617_v48  ;;  %v1620_v37 = vmul.f32 -0.5, %v5474_v32  ;;  %v200_v31 = vmax.f32 %v5298_v7, 0.0 }
 0x13b   :  { %v3205_v61 = vpop.eup %3204  ;;  %v2626_v55 = vmul.f32 %v3203_v47, %v5088_v26  ;;  %v1614_v26 = vand.u32 2147483647, %v5438_v20  ;;  %v1613_v30 = vmul.f32 %v5438_v20, %v1612_v4  ;;  %v592_v62 = vand.u32 2147483647, %v5506_v59  ;;  %v5536_v20 = vld [vmem:[%s7324_s0 + $0x248] sm:$0xff] }
 0x13c   :  { %v2374_v24 = vsel %vm326_vm13, %v5210_v11, %v2246_v60  ;;  %v1601_v27 = vmul.f32 0.6931472, %v3205_v61  ;;  %v719_v42 = vsub.f32 0.0, %v591_v63  ;;  %vm328_vm1 = vcmp.ne.f32.partialorder %v5298_v7, %v5298_v7 }
 0x13d   :  { %2754 = vst [vmem:[%s7325_s1 + $0x1d0] sm:$0xff] %v2626_v55  ;;  %3222 = vtanh.f32 %v2374_v24  ;;  %vm5528_vm0 = vcmp.lt.f32.partialorder %v1614_v26, 0.0004427343  ;;  %v1621_v56 = vadd.f32 1.0, %v1620_v37  ;;  %v1623_v28 = vand.u32 2147483647, %v5474_v32 }
 0x13e   :  { %v3207_v3 = vpop.eup %3206  ;;  %v1607_v19 = vsel %vm5498_vm14, %v1604_v52, %v1601_v27  ;;  %3224 = vpow2.f32 %v914_v25  ;;  %v720_v51 = vsub.f32 0.0, %v592_v62  ;;  %v918_v23 = vmul.f32 1.442695, %v719_v42  ;;  %v5610_v62 = vld [vmem:[%s7324_s0 + $0x258] sm:$0xff]  ;;  %v5616_v42 = vld [vmem:[%s7324_s0 + $0x260] sm:$0xff] }
 0x13f   :  { %v2627_v41 = vmul.f32 %v3207_v3, %v5135_v6  ;;  %v2247_v10 = vadd.f32 %v1607_v19, %v199_v12  ;;  %3226 = vpow2.f32 %v916_v17  ;;  %v5519_v33 = vpop.eup %3208  ;;  %v593_v22 = vand.u32 2147483647, %v5536_v20 }
 0x140   :  { %v3211_v18 = vpop.eup %3210  ;;  %v1626_v53 = vadd.f32 1.0, %v5519_v33  ;;  %v201_v34 = vmax.f32 %v5337_v50, 0.0  ;;  %v1629_v21 = vmul.f32 -0.5, %v5519_v33  ;;  %v1622_v48 = vmul.f32 %v5474_v32, %v1621_v56 }
 0x141   :  { %2755 = vst [vmem:[%s7325_s1 + $0x1d8] sm:$0xff] %v2627_v41  ;;  %v2375_v38 = vsel %vm327_vm15, %v5226_v46, %v2247_v10  ;;  %v1610_v16 = vmul.f32 0.6931472, %v3211_v18  ;;  %vm329_vm2 = vcmp.ne.f32.partialorder %v5337_v50, %v5337_v50  ;;  %vm5564_vm3 = vcmp.lt.f32.partialorder %v1623_v28, 0.0004427343 }
 0x142   :  { %v3213_v8 = vpop.eup %3212  ;;  %3228 = vtanh.f32 %v2375_v38  ;;  %v920_v52 = vmul.f32 1.442695, %v720_v51  ;;  %v1632_v44 = vand.u32 2147483647, %v5519_v33  ;;  %v721_v40 = vsub.f32 0.0, %v593_v22 }
 0x143   :  { %v5538_v5 = vpop.eup %3214  ;;  %v2628_v1 = vmul.f32 %v3213_v8, %v5174_v35  ;;  %3230 = vlog2.f32 %v1626_v53  ;;  %v1616_v15 = vsel %vm5528_vm0, %v1613_v30, %v1610_v16  ;;  %v1630_v55 = vadd.f32 1.0, %v1629_v21 }
 0x144   :  { %v5543_v45 = vpop.eup %3216  ;;  %v1635_v36 = vadd.f32 1.0, %v5538_v5  ;;  %v2248_v35 = vadd.f32 %v1616_v15, %v200_v31  ;;  %v1638_v12 = vmul.f32 -0.5, %v5538_v5  ;;  %v922_v25 = vmul.f32 1.442695, %v721_v40 }
 0x145   :  { %2756 = vst [vmem:[%s7325_s1 + $0x1e0] sm:$0xff] %v2628_v1  ;;  %v1644_v13 = vadd.f32 1.0, %v5543_v45  ;;  %v1647_v29 = vmul.f32 -0.5, %v5543_v45  ;;  %v202_v3 = vmax.f32 %v5375_v14, 0.0  ;;  %vm330_vm4 = vcmp.ne.f32.partialorder %v5375_v14, %v5375_v14 }
 0x146   :  { %v3219_v54 = vpop.eup %3218  ;;  %3232 = vlog2.f32 %v1635_v36  ;;  %v2376_v0 = vsel %vm328_vm1, %v5298_v7, %v2248_v35  ;;  %vm5594_vm5 = vcmp.lt.f32.partialorder %v1632_v44, 0.0004427343  ;;  %v203_v41 = vmax.f32 %v5389_v57, 0.0 }
 0x147   :  { %v2629_v9 = vmul.f32 %v3219_v54, %v5200_v58  ;;  %3234 = vlog2.f32 %v1644_v13  ;;  %v3221_v47 = vpop.eup %3220  ;;  %v5571_v58 = vld [vmem:[%s7324_s0 + $0x250] sm:$0xff]  ;;  %vm331_vm6 = vcmp.ne.f32.partialorder %v5389_v57, %v5389_v57  ;;  %v1639_v31 = vadd.f32 1.0, %v1638_v12 }
 0x148   :  { %3236 = vtanh.f32 %v2376_v0  ;;  %v1619_v32 = vmul.f32 0.6931472, %v3221_v47  ;;  %v594_v26 = vand.u32 2147483647, %v5571_v58  ;;  %v1641_v30 = vand.u32 2147483647, %v5538_v5 }
 0x149   :  { %2757 = vst [vmem:[%s7325_s1 + $0x1e8] sm:$0xff] %v2629_v9  ;;  %3238 = vpow2.f32 %v918_v23  ;;  %v1631_v38 = vmul.f32 %v5519_v33, %v1630_v55  ;;  %v1648_v6 = vadd.f32 1.0, %v1647_v29  ;;  %v1650_v1 = vand.u32 2147483647, %v5543_v45 }
 0x14a   :  { %v3223_v61 = vpop.eup %3222  ;;  %3240 = vpow2.f32 %v920_v52  ;;  %v1625_v4 = vsel %vm5564_vm3, %v1622_v48, %v1619_v32  ;;  %v722_v53 = vsub.f32 0.0, %v594_v26  ;;  %vm332_vm7 = vcmp.ne.f32.partialorder %v5421_v43, %v5421_v43 }
 0x14b   :  { %v5579_v24 = vpop.eup %3224  ;;  %v2630_v27 = vmul.f32 %v3223_v61, %v5210_v11  ;;  %v2249_v63 = vadd.f32 %v1625_v4, %v201_v34  ;;  %3242 = vpow2.f32 %v922_v25  ;;  %v595_v28 = vand.u32 2147483647, %v5610_v62 }
 0x14c   :  { %v5585_v17 = vpop.eup %3226  ;;  %v1653_v19 = vadd.f32 1.0, %v5579_v24  ;;  %v1656_v56 = vmul.f32 -0.5, %v5579_v24  ;;  %v924_v33 = vmul.f32 1.442695, %v722_v53  ;;  %v1640_v36 = vmul.f32 %v5538_v5, %v1639_v31 }
 0x14d   :  { %2758 = vst [vmem:[%s7325_s1 + $0x1f0] sm:$0xff] %v2630_v27  ;;  %v1662_v10 = vadd.f32 1.0, %v5585_v17  ;;  %v2377_v37 = vsel %vm329_vm2, %v5337_v50, %v2249_v63  ;;  %v205_v51 = vmax.f32 %v5461_v49, 0.0  ;;  %v596_v35 = vand.u32 2147483647, %v5616_v42 }
 0x14e   :  { %3244 = vlog2.f32 %v1653_v19  ;;  %vm5633_vm8 = vcmp.lt.f32.partialorder %v1641_v30, 0.0004427343  ;;  %v1649_v54 = vmul.f32 %v5543_v45, %v1648_v6  ;;  %vm5638_vm9 = vcmp.lt.f32.partialorder %v1650_v1, 0.0004427343 }
 0x14f   :  { %v3229_v18 = vpop.eup %3228  ;;  %3246 = vtanh.f32 %v2377_v37  ;;  %v1665_v0 = vmul.f32 -0.5, %v5585_v17  ;;  %v1657_v60 = vadd.f32 1.0, %v1656_v56  ;;  %v1659_v52 = vand.u32 2147483647, %v5579_v24 }
 0x150   :  { %v3231_v8 = vpop.eup %3230  ;;  %v2631_v16 = vmul.f32 %v3229_v18, %v5226_v46  ;;  %3248 = vlog2.f32 %v1662_v10  ;;  %v204_v46 = vmax.f32 %v5421_v43, 0.0  ;;  %v723_v32 = vsub.f32 0.0, %v595_v28  ;;  %v5700_v28 = vld [vmem:[%s7324_s0 + $0x270] sm:$0xff] }
 0x151   :  { %v1628_v15 = vmul.f32 0.6931472, %v3231_v8  ;;  %3250 = vpow2.f32 %v924_v33  ;;  %vm333_vm10 = vcmp.ne.f32.partialorder %v5461_v49, %v5461_v49  ;;  %v724_v55 = vsub.f32 0.0, %v596_v35 }
 0x152   :  { %2759 = vst [vmem:[%s7325_s1 + $0x1f8] sm:$0xff] %v2631_v16  ;;  %v206_v25 = vmax.f32 %v5469_v2, 0.0  ;;  %v1666_v26 = vadd.f32 1.0, %v1665_v0  ;;  %vm5674_vm11 = vcmp.lt.f32.partialorder %v1659_v52, 0.0004427343  ;;  %v1658_v31 = vmul.f32 %v5579_v24, %v1657_v60 }
 0x153   :  { %v3233_v13 = vpop.eup %3232  ;;  %v1634_v23 = vsel %vm5594_vm5, %v1631_v38, %v1628_v15  ;;  %v926_v30 = vmul.f32 1.442695, %v723_v32  ;;  %v928_v6 = vmul.f32 1.442695, %v724_v55  ;;  %vm334_vm12 = vcmp.ne.f32.partialorder %v5469_v2, %v5469_v2 }
 0x154   :  { %v3235_v34 = vpop.eup %3234  ;;  %v2250_v21 = vadd.f32 %v1634_v23, %v202_v3  ;;  %v1637_v5 = vmul.f32 0.6931472, %v3233_v13  ;;  %v5668_v3 = vld [vmem:[%s7324_s0 + $0x268] sm:$0xff]  ;;  %v1667_v1 = vmul.f32 %v5585_v17, %v1666_v26  ;;  %v208_v35 = vmax.f32 %v5506_v59, 0.0 }
 0x155   :  { %v3237_v48 = vpop.eup %3236  ;;  %v1646_v47 = vmul.f32 0.6931472, %v3235_v34  ;;  %v597_v53 = vand.u32 2147483647, %v5668_v3  ;;  %vm335_vm14 = vcmp.ne.f32.partialorder %v5494_v39, %v5494_v39  ;;  %vm336_vm15 = vcmp.ne.f32.partialorder %v5506_v59, %v5506_v59 }
 0x156   :  { %v5644_v44 = vpop.eup %3238  ;;  %v2632_v45 = vmul.f32 %v3237_v48, %v5298_v7  ;;  %v2378_v40 = vsel %vm330_vm4, %v5375_v14, %v2250_v21  ;;  %v1643_v61 = vsel %vm5633_vm8, %v1640_v36, %v1637_v5  ;;  %v598_v21 = vand.u32 2147483647, %v5700_v28  ;;  %v5728_v48 = vld [vmem:[%s7324_s0 + $0x278] sm:$0xff] }
 0x157   :  { %v5655_v12 = vpop.eup %3240  ;;  %3252 = vtanh.f32 %v2378_v40  ;;  %v2251_v29 = vadd.f32 %v1643_v61, %v203_v41  ;;  %v1652_v27 = vsel %vm5638_vm9, %v1649_v54, %v1646_v47  ;;  %v1671_v7 = vadd.f32 1.0, %v5644_v44 }
 0x158   :  { %2760 = vst [vmem:[%s7325_s1 + $0x200] sm:$0xff] %v2632_v45  ;;  %v2252_v4 = vadd.f32 %v1652_v27, %v204_v46  ;;  %v1680_v63 = vadd.f32 1.0, %v5655_v12  ;;  %v1668_v41 = vand.u32 2147483647, %v5585_v17  ;;  %v5679_v10 = vpop.eup %3242  ;;  %v1674_v56 = vmul.f32 -0.5, %v5644_v44 }
 0x159   :  { %v2379_v19 = vsel %vm331_vm6, %v5389_v57, %v2251_v29  ;;  %3254 = vlog2.f32 %v1671_v7  ;;  %v1689_v38 = vadd.f32 1.0, %v5679_v10  ;;  %v207_v46 = vmax.f32 %v5494_v39, 0.0 }
 0x15a   :  { %3256 = vtanh.f32 %v2379_v19  ;;  %v2380_v37 = vsel %vm332_vm7, %v5421_v43, %v2252_v4  ;;  %vm5693_vm13 = vcmp.lt.f32.partialorder %v1668_v41, 0.0004427343  ;;  %v725_v13 = vsub.f32 0.0, %v597_v53 }
 0x15b   :  { %v3245_v18 = vpop.eup %3244  ;;  %3258 = vtanh.f32 %v2380_v37  ;;  %v1675_v54 = vadd.f32 1.0, %v1674_v56  ;;  %v1683_v34 = vmul.f32 -0.5, %v5655_v12  ;;  %v1692_v9 = vmul.f32 -0.5, %v5679_v10 }
 0x15c   :  { %v3247_v8 = vpop.eup %3246  ;;  %v1655_v16 = vmul.f32 0.6931472, %v3245_v18  ;;  %3260 = vlog2.f32 %v1680_v63  ;;  %v1677_v47 = vand.u32 2147483647, %v5644_v44  ;;  %v930_v60 = vmul.f32 1.442695, %v725_v13 }
 0x15d   :  { %v3249_v15 = vpop.eup %3248  ;;  %v2633_v33 = vmul.f32 %v3247_v8, %v5337_v50  ;;  %3262 = vlog2.f32 %v1689_v38  ;;  %v726_v52 = vsub.f32 0.0, %v598_v21  ;;  %v1686_v45 = vand.u32 2147483647, %v5655_v12 }
 0x15e   :  { %v1661_v17 = vsel %vm5674_vm11, %v1658_v31, %v1655_v16  ;;  %v1664_v36 = vmul.f32 0.6931472, %v3249_v15  ;;  %3264 = vpow2.f32 %v926_v30  ;;  %v5711_v23 = vpop.eup %3250  ;;  %v209_v40 = vmax.f32 %v5536_v20, 0.0 }
 0x15f   :  { %2761 = vst [vmem:[%s7325_s1 + $0x208] sm:$0xff] %v2633_v33  ;;  %v2253_v50 = vadd.f32 %v1661_v17, %v205_v51  ;;  %3266 = vpow2.f32 %v928_v6  ;;  %v1698_v0 = vadd.f32 1.0, %v5711_v23  ;;  %v1684_v55 = vadd.f32 1.0, %v1683_v34 }
 0x160   :  { %v1670_v22 = vsel %vm5693_vm13, %v1667_v1, %v1664_v36  ;;  %v932_v29 = vmul.f32 1.442695, %v726_v52  ;;  %v599_v27 = vand.u32 2147483647, %v5728_v48  ;;  %v1676_v4 = vmul.f32 %v5644_v44, %v1675_v54 }
 0x161   :  { %v2381_v5 = vsel %vm333_vm10, %v5461_v49, %v2253_v50  ;;  %v2254_v51 = vadd.f32 %v1670_v22, %v206_v25  ;;  %v1693_v25 = vadd.f32 1.0, %v1692_v9  ;;  %vm5742_vm0 = vcmp.lt.f32.partialorder %v1677_v47, 0.0004427343 }
 0x162   :  { %3268 = vtanh.f32 %v2381_v5  ;;  %v1695_v19 = vand.u32 2147483647, %v5679_v10  ;;  %v727_v11 = vsub.f32 0.0, %v599_v27  ;;  %vm337_vm1 = vcmp.ne.f32.partialorder %v5536_v20, %v5536_v20 }
 0x163   :  { %v2382_v32 = vsel %vm334_vm12, %v5469_v2, %v2254_v51  ;;  %3270 = vlog2.f32 %v1698_v0  ;;  %v1701_v44 = vmul.f32 -0.5, %v5711_v23  ;;  %v1685_v18 = vmul.f32 %v5655_v12, %v1684_v55  ;;  %v5809_v0 = vld [vmem:[%s7324_s0 + $0x290] sm:$0xff] }
 0x164   :  { %v3253_v61 = vpop.eup %3252  ;;  %3272 = vtanh.f32 %v2382_v32  ;;  %v211_v38 = vmax.f32 %v5610_v62, 0.0  ;;  %v934_v6 = vmul.f32 1.442695, %v727_v11  ;;  %vm5760_vm2 = vcmp.lt.f32.partialorder %v1686_v45, 0.0004427343 }
 0x165   :  { %v2634_v7 = vmul.f32 %v3253_v61, %v5375_v14  ;;  %3274 = vpow2.f32 %v930_v60  ;;  %v210_v14 = vmax.f32 %v5571_v58, 0.0  ;;  %v1694_v56 = vmul.f32 %v5679_v10, %v1693_v25  ;;  %v5780_v10 = vld [vmem:[%s7324_s0 + $0x288] sm:$0xff] }
 0x166   :  { %v3255_v26 = vpop.eup %3254  ;;  %3276 = vpow2.f32 %v932_v29  ;;  %vm5768_vm3 = vcmp.lt.f32.partialorder %v1695_v19, 0.0004427343  ;;  %vm338_vm4 = vcmp.ne.f32.partialorder %v5571_v58, %v5571_v58  ;;  %v1702_v36 = vadd.f32 1.0, %v1701_v44 }
 0x167   :  { %v3257_v41 = vpop.eup %3256  ;;  %2762 = vst [vmem:[%s7325_s1 + $0x210] sm:$0xff] %v2634_v7  ;;  %v1673_v37 = vmul.f32 0.6931472, %v3255_v26  ;;  %3278 = vpow2.f32 %v934_v6  ;;  %v212_v50 = vmax.f32 %v5616_v42, 0.0  ;;  %v213_v21 = vmax.f32 %v5668_v3, 0.0 }
 0x168   :  { %v3259_v31 = vpop.eup %3258  ;;  %v2635_v30 = vmul.f32 %v3257_v41, %v5389_v57  ;;  %v601_v52 = vand.u32 2147483647, %v5780_v10  ;;  %v1703_v45 = vmul.f32 %v5711_v23, %v1702_v36  ;;  %v602_v7 = vand.u32 2147483647, %v5809_v0 }
 0x169   :  { %v3261_v53 = vpop.eup %3260  ;;  %v2636_v8 = vmul.f32 %v3259_v31, %v5421_v43  ;;  %v1679_v16 = vsel %vm5742_vm0, %v1676_v4, %v1673_v37  ;;  %v5775_v43 = vld [vmem:[%s7324_s0 + $0x280] sm:$0xff]  ;;  %v214_v25 = vmax.f32 %v5700_v28, 0.0  ;;  %vm339_vm6 = vcmp.ne.f32.partialorder %v5610_v62, %v5610_v62 }
 0x16a   :  { %v3263_v15 = vpop.eup %3262  ;;  %2763 = vst [vmem:[%s7325_s1 + $0x218] sm:$0xff] %v2635_v30  ;;  %v2255_v57 = vadd.f32 %v1679_v16, %v207_v46  ;;  %v1682_v12 = vmul.f32 0.6931472, %v3261_v53  ;;  %v1704_v46 = vand.u32 2147483647, %v5711_v23  ;;  %v729_v11 = vsub.f32 0.0, %v601_v52 }
 0x16b   :  { %v5782_v24 = vpop.eup %3264  ;;  %2764 = vst [vmem:[%s7325_s1 + $0x220] sm:$0xff] %v2636_v8  ;;  %v1691_v17 = vmul.f32 0.6931472, %v3263_v15  ;;  %v600_v9 = vand.u32 2147483647, %v5775_v43  ;;  %v730_v53 = vsub.f32 0.0, %v602_v7  ;;  %vm340_vm9 = vcmp.ne.f32.partialorder %v5616_v42, %v5616_v42 }
 0x16c   :  { %v5791_v13 = vpop.eup %3266  ;;  %v2383_v22 = vsel %vm335_vm14, %v5494_v39, %v2255_v57  ;;  %v1688_v54 = vsel %vm5760_vm2, %v1685_v18, %v1682_v12  ;;  %v1707_v34 = vadd.f32 1.0, %v5782_v24  ;;  %vm5818_vm5 = vcmp.lt.f32.partialorder %v1704_v46, 0.0004427343  ;;  %v5853_v8 = vld [vmem:[%s7324_s0 + $0x298] sm:$0xff]  ;;  %v5867_v12 = vld [vmem:[%s7324_s0 + $0x2a0] sm:$0xff]  ;;  %v5899_v7 = vld [vmem:[%s7324_s0 + $0x2b0] sm:$0xff] }
 0x16d   :  { %3280 = vtanh.f32 %v2383_v22  ;;  %v2256_v5 = vadd.f32 %v1688_v54, %v208_v35  ;;  %v1697_v51 = vsel %vm5768_vm3, %v1694_v56, %v1691_v17  ;;  %v1716_v60 = vadd.f32 1.0, %v5791_v13 }
 0x16e   :  { %v2257_v47 = vadd.f32 %v1697_v51, %v209_v40  ;;  %3282 = vlog2.f32 %v1707_v34  ;;  %v1710_v55 = vmul.f32 -0.5, %v5782_v24  ;;  %v728_v26 = vsub.f32 0.0, %v600_v9 }
 0x16f   :  { %v3269_v32 = vpop.eup %3268  ;;  %v2384_v35 = vsel %vm336_vm15, %v5506_v59, %v2256_v5  ;;  %v1719_v19 = vmul.f32 -0.5, %v5791_v13  ;;  %v1713_v31 = vand.u32 2147483647, %v5782_v24  ;;  %v1722_v18 = vand.u32 2147483647, %v5791_v13 }
 0x170   :  { %v3271_v40 = vpop.eup %3270  ;;  %v2637_v29 = vmul.f32 %v3269_v32, %v5461_v49  ;;  %3284 = vtanh.f32 %v2384_v35  ;;  %v2385_v27 = vsel %vm337_vm1, %v5536_v20, %v2257_v47  ;;  %v1711_v44 = vadd.f32 1.0, %v1710_v55  ;;  %v5891_v35 = vld [vmem:[%s7324_s0 + $0x2a8] sm:$0xff] }
 0x171   :  { %v3273_v4 = vpop.eup %3272  ;;  %3286 = vtanh.f32 %v2385_v27  ;;  %v1700_v23 = vmul.f32 0.6931472, %v3271_v40  ;;  %v215_v16 = vmax.f32 %v5728_v48, 0.0  ;;  %v216_v1 = vmax.f32 %v5775_v43, 0.0 }
 0x172   :  { %v5830_v63 = vpop.eup %3274  ;;  %2765 = vst [vmem:[%s7325_s1 + $0x228] sm:$0xff] %v2637_v29  ;;  %v2638_v49 = vmul.f32 %v3273_v4, %v5469_v2  ;;  %3288 = vlog2.f32 %v1716_v60  ;;  %v936_v56 = vmul.f32 1.442695, %v728_v26  ;;  %v1720_v15 = vadd.f32 1.0, %v1719_v19 }
 0x173   :  { %v5837_v41 = vpop.eup %3276  ;;  %v1706_v37 = vsel %vm5818_vm5, %v1703_v45, %v1700_v23  ;;  %v1725_v30 = vadd.f32 1.0, %v5830_v63  ;;  %v1728_v57 = vmul.f32 -0.5, %v5830_v63  ;;  %vm5871_vm7 = vcmp.lt.f32.partialorder %v1713_v31, 0.0004427343  ;;  %v5920_v31 = vld [vmem:[%s7324_s0 + $0x2b8] sm:$0xff] }
 0x174   :  { %2766 = vst [vmem:[%s7325_s1 + $0x230] sm:$0xff] %v2638_v49  ;;  %v2258_v2 = vadd.f32 %v1706_v37, %v210_v14  ;;  %v1734_v6 = vadd.f32 1.0, %v5837_v41  ;;  %v5869_v33 = vpop.eup %3278  ;;  %v938_v36 = vmul.f32 1.442695, %v729_v11  ;;  %v603_v46 = vand.u32 2147483647, %v5853_v8 }
 0x175   :  { %3290 = vlog2.f32 %v1725_v30  ;;  %v1712_v22 = vmul.f32 %v5782_v24, %v1711_v44  ;;  %vm5877_vm8 = vcmp.lt.f32.partialorder %v1722_v18, 0.0004427343  ;;  %v1743_v34 = vadd.f32 1.0, %v5869_v33 }
 0x176   :  { %v2386_v14 = vsel %vm338_vm4, %v5571_v58, %v2258_v2  ;;  %3292 = vlog2.f32 %v1734_v6  ;;  %v940_v5 = vmul.f32 1.442695, %v730_v53  ;;  %v1731_v51 = vand.u32 2147483647, %v5830_v63 }
 0x177   :  { %3294 = vtanh.f32 %v2386_v14  ;;  %v1737_v9 = vmul.f32 -0.5, %v5837_v41  ;;  %v731_v47 = vsub.f32 0.0, %v603_v46  ;;  %v1721_v52 = vmul.f32 %v5791_v13, %v1720_v15 }
 0x178   :  { %3296 = vpow2.f32 %v936_v56  ;;  %v1729_v24 = vadd.f32 1.0, %v1728_v57  ;;  %v604_v32 = vand.u32 2147483647, %v5867_v12  ;;  %v1740_v55 = vand.u32 2147483647, %v5837_v41 }
 0x179   :  { %3298 = vlog2.f32 %v1743_v34  ;;  %v942_v40 = vmul.f32 1.442695, %v731_v47  ;;  %v1746_v27 = vmul.f32 -0.5, %v5869_v33  ;;  %vm341_vm10 = vcmp.ne.f32.partialorder %v5668_v3, %v5668_v3 }
 0x17a   :  { %v3281_v60 = vpop.eup %3280  ;;  %3300 = vpow2.f32 %v938_v36  ;;  %v732_v13 = vsub.f32 0.0, %v604_v32  ;;  %vm5906_vm11 = vcmp.lt.f32.partialorder %v1731_v51, 0.0004427343  ;;  %v1738_v23 = vadd.f32 1.0, %v1737_v9 }
 0x17b   :  { %v3283_v45 = vpop.eup %3282  ;;  %v2639_v61 = vmul.f32 %v3281_v60, %v5494_v39  ;;  %3302 = vpow2.f32 %v940_v5  ;;  %v605_v26 = vand.u32 2147483647, %v5891_v35  ;;  %v1730_v37 = vmul.f32 %v5830_v63, %v1729_v24 }
 0x17c   :  { %v1709_v29 = vmul.f32 0.6931472, %v3283_v45  ;;  %3304 = vpow2.f32 %v942_v40  ;;  %vm342_vm12 = vcmp.ne.f32.partialorder %v5700_v28, %v5700_v28  ;;  %v944_v44 = vmul.f32 1.442695, %v732_v13 }
 0x17d   :  { %v3285_v4 = vpop.eup %3284  ;;  %2767 = vst [vmem:[%s7325_s1 + $0x238] sm:$0xff] %v2639_v61  ;;  %v733_v18 = vsub.f32 0.0, %v605_v26  ;;  %v606_v6 = vand.u32 2147483647, %v5899_v7  ;;  %vm5929_vm13 = vcmp.lt.f32.partialorder %v1740_v55, 0.0004427343  ;;  %v1739_v36 = vmul.f32 %v5837_v41, %v1738_v23 }
 0x17e   :  { %v3287_v49 = vpop.eup %3286  ;;  %v2640_v19 = vmul.f32 %v3285_v4, %v5506_v59  ;;  %v1715_v11 = vsel %vm5871_vm7, %v1712_v22, %v1709_v29  ;;  %v1747_v56 = vadd.f32 1.0, %v1746_v27  ;;  %3306 = vpow2.f32 %v944_v44 }
 0x17f   :  { %v3289_v30 = vpop.eup %3288  ;;  %v2641_v2 = vmul.f32 %v3287_v49, %v5536_v20  ;;  %v2259_v59 = vadd.f32 %v1715_v11, %v211_v38  ;;  %v946_v38 = vmul.f32 1.442695, %v733_v18  ;;  %v734_v14 = vsub.f32 0.0, %v606_v6 }
 0x180   :  { %2768 = vst [vmem:[%s7325_s1 + $0x240] sm:$0xff] %v2640_v19  ;;  %v1718_v63 = vmul.f32 0.6931472, %v3289_v30  ;;  %v607_v15 = vand.u32 2147483647, %v5920_v31  ;;  %vm343_vm14 = vcmp.ne.f32.partialorder %v5728_v48, %v5728_v48  ;;  %v1748_v60 = vmul.f32 %v5869_v33, %v1747_v56 }
 0x181   :  { %2769 = vst [vmem:[%s7325_s1 + $0x248] sm:$0xff] %v2641_v2  ;;  %v2387_v20 = vsel %vm339_vm6, %v5610_v62, %v2259_v59  ;;  %v1749_v46 = vand.u32 2147483647, %v5869_v33  ;;  %v948_v51 = vmul.f32 1.442695, %v734_v14  ;;  %v217_v54 = vmax.f32 %v5780_v10, 0.0 }
 0x182   :  { %v3291_v57 = vpop.eup %3290  ;;  %3308 = vtanh.f32 %v2387_v20  ;;  %v1724_v17 = vsel %vm5877_vm8, %v1721_v52, %v1718_v63  ;;  %v735_v52 = vsub.f32 0.0, %v607_v15  ;;  %v218_v27 = vmax.f32 %v5809_v0, 0.0 }
 0x183   :  { %v3293_v22 = vpop.eup %3292  ;;  %v2260_v34 = vadd.f32 %v1724_v17, %v212_v50  ;;  %v1727_v5 = vmul.f32 0.6931472, %v3291_v57  ;;  %3310 = vpow2.f32 %v946_v38  ;;  %vm5967_vm15 = vcmp.lt.f32.partialorder %v1749_v46, 0.0004427343 }
 0x184   :  { %v3295_v9 = vpop.eup %3294  ;;  %v1736_v47 = vmul.f32 0.6931472, %v3293_v22  ;;  %3312 = vpow2.f32 %v948_v51  ;;  %v950_v61 = vmul.f32 1.442695, %v735_v52  ;;  %v220_v19 = vmax.f32 %v5867_v12, 0.0 }
 0x185   :  { %v2642_v41 = vmul.f32 %v3295_v9, %v5571_v58  ;;  %v2388_v24 = vsel %vm340_vm9, %v5616_v42, %v2260_v34  ;;  %v1733_v50 = vsel %vm5906_vm11, %v1730_v37, %v1727_v5  ;;  %v3297_v32 = vpop.eup %3296  ;;  %v221_v18 = vmax.f32 %v5891_v35, 0.0 }
 0x186   :  { %3314 = vtanh.f32 %v2388_v24  ;;  %v2261_v45 = vadd.f32 %v1733_v50, %v213_v21  ;;  %v1742_v33 = vsel %vm5929_vm13, %v1739_v36, %v1736_v47  ;;  %v3299_v55 = vpop.eup %3298  ;;  %v1752_v29 = vadd.f32 1.0, %v3297_v32  ;;  %v5975_v21 = vld [vmem:[%s7324_s0 + $0x2c0] sm:$0xff] }
 0x187   :  { %2770 = vst [vmem:[%s7325_s1 + $0x250] sm:$0xff] %v2642_v41  ;;  %v2262_v58 = vadd.f32 %v1742_v33, %v214_v25  ;;  %v3301_v13 = vpop.eup %3300  ;;  %v1745_v39 = vmul.f32 0.6931472, %v3299_v55  ;;  %v219_v25 = vmax.f32 %v5853_v8, 0.0  ;;  %3316 = vpow2.f32 %v950_v61 }
 0x188   :  { %v2389_v4 = vsel %vm341_vm10, %v5668_v3, %v2261_v45  ;;  %v3303_v23 = vpop.eup %3302  ;;  %v1755_v49 = vmul.f32 -0.5, %v3297_v32  ;;  %v1761_v44 = vadd.f32 1.0, %v3301_v13  ;;  %v608_v30 = vand.u32 2147483647, %v5975_v21 }
 0x189   :  { %3318 = vtanh.f32 %v2389_v4  ;;  %v2390_v26 = vsel %vm342_vm12, %v5700_v28, %v2262_v58  ;;  %v5987_v11 = vpop.eup %3304  ;;  %v1751_v37 = vsel %vm5967_vm15, %v1748_v60, %v1745_v39  ;;  %v1764_v59 = vmul.f32 -0.5, %v3301_v13 }
 0x18a   :  { %3320 = vtanh.f32 %v2390_v26  ;;  %v2263_v2 = vadd.f32 %v1751_v37, %v215_v16  ;;  %v1758_v6 = vand.u32 2147483647, %v3297_v32  ;;  %v1770_v63 = vadd.f32 1.0, %v3303_v23 }
 0x18b   :  { %3322 = vlog2.f32 %v1752_v29  ;;  %v222_v53 = vmax.f32 %v5899_v7, 0.0  ;;  %v5996_v56 = vpop.eup %3306  ;;  %v1756_v38 = vadd.f32 1.0, %v1755_v49  ;;  %v1773_v14 = vmul.f32 -0.5, %v3303_v23 }
 0x18c   :  { %3324 = vlog2.f32 %v1761_v44  ;;  %v2391_v20 = vsel %vm343_vm14, %v5728_v48, %v2263_v2  ;;  %v1779_v16 = vadd.f32 1.0, %v5987_v11  ;;  %v1767_v15 = vand.u32 2147483647, %v3301_v13 }
 0x18d   :  { %3326 = vtanh.f32 %v2391_v20  ;;  %v223_v57 = vmax.f32 %v5920_v31, 0.0  ;;  %v736_v17 = vsub.f32 0.0, %v608_v30  ;;  %v1765_v46 = vadd.f32 1.0, %v1764_v59 }
 0x18e   :  { %3328 = vlog2.f32 %v1770_v63  ;;  %v1782_v22 = vmul.f32 -0.5, %v5987_v11  ;;  %v1788_v34 = vadd.f32 1.0, %v5996_v56  ;;  %vm6007_vm0 = vcmp.lt.f32.partialorder %v1758_v6, 0.0004427343 }
 0x18f   :  { %v3309_v36 = vpop.eup %3308  ;;  %v1776_v47 = vand.u32 2147483647, %v3303_v23  ;;  %3330 = vlog2.f32 %v1779_v16  ;;  %v6011_v60 = vmul.f32 %v3297_v32, %v1756_v38  ;;  %v1774_v52 = vadd.f32 1.0, %v1773_v14 }
 0x190   :  { %v3311_v5 = vpop.eup %3310  ;;  %v2643_v51 = vmul.f32 %v3309_v36, %v5610_v62  ;;  %3332 = vlog2.f32 %v1788_v34  ;;  %v1791_v41 = vmul.f32 -0.5, %v5996_v56  ;;  %vm6017_vm1 = vcmp.lt.f32.partialorder %v1767_v15, 0.0004427343 }
 0x191   :  { %v3313_v24 = vpop.eup %3312  ;;  %v1785_v62 = vand.u32 2147483647, %v5987_v11  ;;  %v1797_v45 = vadd.f32 1.0, %v3311_v5  ;;  %v1800_v33 = vmul.f32 -0.5, %v3311_v5  ;;  %vm344_vm2 = vcmp.ne.f32.partialorder %v5775_v43, %v5775_v43 }
 0x192   :  { %2771 = vst [vmem:[%s7325_s1 + $0x258] sm:$0xff] %v2643_v51  ;;  %v1766_v32 = vmul.f32 %v3301_v13, %v1765_v46  ;;  %v1783_v55 = vadd.f32 1.0, %v1782_v22  ;;  %v1806_v58 = vadd.f32 1.0, %v3313_v24  ;;  %v1809_v40 = vmul.f32 -0.5, %v3313_v24  ;;  %v6064_v46 = vld [vmem:[%s7324_s0 + $0x2d0] sm:$0xff]  ;;  %v6173_v22 = vld [vmem:[%s7324_s0 + $0x2e8] sm:$0xff] }
 0x193   :  { %v3315_v61 = vpop.eup %3314  ;;  %vm345_vm3 = vcmp.ne.f32.partialorder %v5780_v10, %v5780_v10  ;;  %vm6027_vm4 = vcmp.lt.f32.partialorder %v1776_v47, 0.0004427343  ;;  %v1794_v39 = vand.u32 2147483647, %v5996_v56  ;;  %3334 = vlog2.f32 %v1797_v45 }
 0x194   :  { %v2644_v29 = vmul.f32 %v3315_v61, %v5616_v42  ;;  %v6032_v26 = vpop.eup %3316  ;;  %v6034_v49 = vmul.f32 %v3303_v23, %v1774_v52  ;;  %v1792_v13 = vadd.f32 1.0, %v1791_v41  ;;  %v1803_v37 = vand.u32 2147483647, %v3311_v5  ;;  %v6047_v23 = vld [vmem:[%s7324_s0 + $0x2c8] sm:$0xff] }
 0x195   :  { %3336 = vlog2.f32 %v1806_v58  ;;  %vm6039_vm5 = vcmp.lt.f32.partialorder %v1785_v62, 0.0004427343  ;;  %v1801_v30 = vadd.f32 1.0, %v1800_v33  ;;  %v1810_v2 = vadd.f32 1.0, %v1809_v40 }
 0x196   :  { %v3319_v44 = vpop.eup %3318  ;;  %2772 = vst [vmem:[%s7325_s1 + $0x260] sm:$0xff] %v2644_v29  ;;  %v1815_v59 = vadd.f32 1.0, %v6032_v26  ;;  %vm346_vm6 = vcmp.ne.f32.partialorder %v5809_v0, %v5809_v0  ;;  %v1784_v20 = vmul.f32 %v5987_v11, %v1783_v55  ;;  %v1812_v38 = vand.u32 2147483647, %v3313_v24  ;;  %v6092_v55 = vld [vmem:[%s7324_s0 + $0x2d8] sm:$0xff] }
 0x197   :  { %v3321_v6 = vpop.eup %3320  ;;  %v2645_v63 = vmul.f32 %v3319_v44, %v5668_v3  ;;  %v952_v14 = vmul.f32 1.442695, %v736_v17  ;;  %vm347_vm7 = vcmp.ne.f32.partialorder %v5853_v8, %v5853_v8  ;;  %vm6056_vm8 = vcmp.lt.f32.partialorder %v1794_v39, 0.0004427343 }
 0x198   :  { %v3323_v16 = vpop.eup %3322  ;;  %v2646_v15 = vmul.f32 %v3321_v6, %v5700_v28  ;;  %3338 = vlog2.f32 %v1815_v59  ;;  %v1818_v3 = vmul.f32 -0.5, %v6032_v26  ;;  %vm348_vm9 = vcmp.ne.f32.partialorder %v5867_v12, %v5867_v12 }
 0x199   :  { %v3325_v11 = vpop.eup %3324  ;;  %2773 = vst [vmem:[%s7325_s1 + $0x268] sm:$0xff] %v2645_v63  ;;  %v1754_v28 = vmul.f32 0.6931472, %v3323_v16  ;;  %v1793_v17 = vmul.f32 %v5996_v56, %v1792_v13  ;;  %vm6072_vm10 = vcmp.lt.f32.partialorder %v1803_v37, 0.0004427343  ;;  %3340 = vpow2.f32 %v952_v14 }
 0x19a   :  { %v609_v34 = vand.u32 2147483647, %v6047_v23  ;;  %2774 = vst [vmem:[%s7325_s1 + $0x270] sm:$0xff] %v2646_v15  ;;  %v1763_v51 = vmul.f32 0.6931472, %v3325_v11  ;;  %v1802_v47 = vmul.f32 %v3311_v5, %v1801_v30  ;;  %v1811_v52 = vmul.f32 %v3313_v24, %v1810_v2  ;;  %v3327_v62 = vpop.eup %3326 }
 0x19b   :  { %v1821_v41 = vand.u32 2147483647, %v6032_v26  ;;  %v1760_v56 = vsel %vm6007_vm0, %v6011_v60, %v1754_v28  ;;  %vm6084_vm11 = vcmp.lt.f32.partialorder %v1812_v38, 0.0004427343  ;;  %v610_v61 = vand.u32 2147483647, %v6064_v46  ;;  %v3329_v5 = vpop.eup %3328 }
 0x19c   :  { %v737_v33 = vsub.f32 0.0, %v609_v34  ;;  %v2647_v24 = vmul.f32 %v3327_v62, %v5728_v48  ;;  %v2264_v58 = vadd.f32 %v1760_v56, %v216_v1  ;;  %v1769_v9 = vsel %vm6017_vm1, %v1766_v32, %v1763_v51  ;;  %v3331_v40 = vpop.eup %3330 }
 0x19d   :  { %vm349_vm12 = vcmp.ne.f32.partialorder %v5891_v35, %v5891_v35  ;;  %v1819_v60 = vadd.f32 1.0, %v1818_v3  ;;  %v2265_v29 = vadd.f32 %v1769_v9, %v217_v54  ;;  %v1772_v39 = vmul.f32 0.6931472, %v3329_v5  ;;  %v3333_v37 = vpop.eup %3332 }
 0x19e   :  { %vm350_vm13 = vcmp.ne.f32.partialorder %v5899_v7, %v5899_v7  ;;  %v954_v13 = vmul.f32 1.442695, %v737_v33  ;;  %v738_v48 = vsub.f32 0.0, %v610_v61  ;;  %2775 = vst [vmem:[%s7325_s1 + $0x278] sm:$0xff] %v2647_v24  ;;  %v2392_v1 = vsel %vm344_vm2, %v5775_v43, %v2264_v58  ;;  %v6186_v61 = vld [vmem:[%s7324_s0 + $0x2f0] sm:$0xff]  ;;  %v6192_v58 = vld [vmem:[%s7324_s0 + $0x2f8] sm:$0xff] }
 0x19f   :  { %v1781_v50 = vmul.f32 0.6931472, %v3331_v40  ;;  %vm6112_vm14 = vcmp.lt.f32.partialorder %v1821_v41, 0.0004427343  ;;  %v611_v54 = vand.u32 2147483647, %v6092_v55  ;;  %3342 = vtanh.f32 %v2392_v1 }
 0x1a0   :  { %v2393_v44 = vsel %vm345_vm3, %v5780_v10, %v2265_v29  ;;  %v1778_v30 = vsel %vm6027_vm4, %v6034_v49, %v1772_v39  ;;  %v1790_v2 = vmul.f32 0.6931472, %v3333_v37  ;;  %v956_v63 = vmul.f32 1.442695, %v738_v48  ;;  %v3335_v38 = vpop.eup %3334 }
 0x1a1   :  { %3344 = vtanh.f32 %v2393_v44  ;;  %v2266_v59 = vadd.f32 %v1778_v30, %v218_v27  ;;  %v1787_v6 = vsel %vm6039_vm5, %v1784_v20, %v1781_v50  ;;  %v739_v15 = vsub.f32 0.0, %v611_v54 }
 0x1a2   :  { %v2267_v14 = vadd.f32 %v1787_v6, %v219_v25  ;;  %v1796_v16 = vsel %vm6056_vm8, %v1793_v17, %v1790_v2  ;;  %3346 = vpow2.f32 %v954_v13  ;;  %v3337_v4 = vpop.eup %3336  ;;  %v1799_v42 = vmul.f32 0.6931472, %v3335_v38  ;;  %v6141_v25 = vld [vmem:[%s7324_s0 + $0x2e0] sm:$0xff] }
 0x1a3   :  { %v2394_v49 = vsel %vm346_vm6, %v5809_v0, %v2266_v59  ;;  %v2268_v27 = vadd.f32 %v1796_v16, %v220_v19  ;;  %3348 = vpow2.f32 %v956_v63  ;;  %v1808_v36 = vmul.f32 0.6931472, %v3337_v4  ;;  %v6218_v16 = vld [vmem:[%s7324_s0 + $0x300] sm:$0xff] }
 0x1a4   :  { %3350 = vtanh.f32 %v2394_v49  ;;  %v2395_v20 = vsel %vm347_vm7, %v5853_v8, %v2267_v14  ;;  %v958_v3 = vmul.f32 1.442695, %v739_v15  ;;  %v1805_v11 = vsel %vm6072_vm10, %v1802_v47, %v1799_v42 }
 0x1a5   :  { %3352 = vtanh.f32 %v2395_v20  ;;  %v2396_v19 = vsel %vm348_vm9, %v5867_v12, %v2268_v27  ;;  %v1820_v28 = vmul.f32 %v6032_v26, %v1819_v60  ;;  %v3339_v17 = vpop.eup %3338  ;;  %v2269_v34 = vadd.f32 %v1805_v11, %v221_v18  ;;  %v6242_v11 = vld [vmem:[%s7324_s0 + $0x308] sm:$0xff] }
 0x1a6   :  { %3354 = vtanh.f32 %v2396_v19  ;;  %v1814_v51 = vsel %vm6084_vm11, %v1811_v52, %v1808_v36  ;;  %v612_v41 = vand.u32 2147483647, %v6141_v25  ;;  %v6159_v62 = vpop.eup %3340  ;;  %v1817_v33 = vmul.f32 0.6931472, %v3339_v17 }
 0x1a7   :  { %v2270_v56 = vadd.f32 %v1814_v51, %v222_v53  ;;  %3356 = vpow2.f32 %v958_v3  ;;  %v2397_v26 = vsel %vm349_vm12, %v5891_v35, %v2269_v34  ;;  %vm351_vm15 = vcmp.ne.f32.partialorder %v5920_v31, %v5920_v31 }
 0x1a8   :  { %v1824_v18 = vadd.f32 1.0, %v6159_v62  ;;  %3358 = vtanh.f32 %v2397_v26  ;;  %v1823_v47 = vsel %vm6112_vm14, %v1820_v28, %v1817_v33  ;;  %v740_v52 = vsub.f32 0.0, %v612_v41  ;;  %v6253_v41 = vld [vmem:[%s7324_s0 + $0x310] sm:$0xff] }
 0x1a9   :  { %v2398_v53 = vsel %vm350_vm13, %v5899_v7, %v2270_v56  ;;  %v2271_v45 = vadd.f32 %v1823_v47, %v223_v57  ;;  %v613_v24 = vand.u32 2147483647, %v6173_v22  ;;  %v614_v57 = vand.u32 2147483647, %v6186_v61 }
 0x1aa   :  { %3360 = vtanh.f32 %v2398_v53  ;;  %v960_v5 = vmul.f32 1.442695, %v740_v52  ;;  %v615_v13 = vand.u32 2147483647, %v6192_v58  ;;  %v1827_v1 = vmul.f32 -0.5, %v6159_v62 }
 0x1ab   :  { %3362 = vlog2.f32 %v1824_v18  ;;  %v2399_v9 = vsel %vm351_vm15, %v5920_v31, %v2271_v45  ;;  %v741_v40 = vsub.f32 0.0, %v613_v24  ;;  %v742_v44 = vsub.f32 0.0, %v614_v57 }
 0x1ac   :  { %v3343_v60 = vpop.eup %3342  ;;  %3364 = vtanh.f32 %v2399_v9  ;;  %v1828_v38 = vadd.f32 1.0, %v1827_v1  ;;  %v1830_v14 = vand.u32 2147483647, %v6159_v62  ;;  %v225_v27 = vmax.f32 %v6047_v23, 0.0 }
 0x1ad   :  { %v2648_v39 = vmul.f32 %v3343_v60, %v5775_v43  ;;  %3366 = vpow2.f32 %v960_v5  ;;  %v962_v50 = vmul.f32 1.442695, %v741_v40  ;;  %v743_v43 = vsub.f32 0.0, %v615_v13 }
 0x1ae   :  { %v3345_v29 = vpop.eup %3344  ;;  %v964_v4 = vmul.f32 1.442695, %v742_v44  ;;  %v226_v42 = vmax.f32 %v6064_v46, 0.0  ;;  %v616_v19 = vand.u32 2147483647, %v6218_v16  ;;  %v1829_v34 = vmul.f32 %v6159_v62, %v1828_v38 }
 0x1af   :  { %v6198_v48 = vpop.eup %3346  ;;  %v2649_v37 = vmul.f32 %v3345_v29, %v5780_v10  ;;  %2776 = vst [vmem:[%s7325_s1 + $0x280] sm:$0xff] %v2648_v39  ;;  %3368 = vpow2.f32 %v962_v50  ;;  %v966_v49 = vmul.f32 1.442695, %v743_v43  ;;  %vm6246_vm0 = vcmp.lt.f32.partialorder %v1830_v14, 0.0004427343  ;;  %v6281_v29 = vld [vmem:[%s7324_s0 + $0x318] sm:$0xff] }
 0x1b0   :  { %v6202_v32 = vpop.eup %3348  ;;  %v1833_v54 = vadd.f32 1.0, %v6198_v48  ;;  %v1839_v26 = vand.u32 2147483647, %v6198_v48  ;;  %v744_v18 = vsub.f32 0.0, %v616_v19  ;;  %vm352_vm1 = vcmp.ne.f32.partialorder %v5975_v21, %v5975_v21 }
 0x1b1   :  { %v3351_v30 = vpop.eup %3350  ;;  %2777 = vst [vmem:[%s7325_s1 + $0x288] sm:$0xff] %v2649_v37  ;;  %v1842_v10 = vadd.f32 1.0, %v6202_v32  ;;  %v1845_v3 = vmul.f32 -0.5, %v6202_v32  ;;  %v1848_v62 = vand.u32 2147483647, %v6202_v32  ;;  %vm353_vm2 = vcmp.ne.f32.partialorder %v6047_v23, %v6047_v23 }
 0x1b2   :  { %v3353_v2 = vpop.eup %3352  ;;  %v2650_v59 = vmul.f32 %v3351_v30, %v5809_v0  ;;  %3370 = vlog2.f32 %v1833_v54  ;;  %v617_v53 = vand.u32 2147483647, %v6242_v11  ;;  %v968_v45 = vmul.f32 1.442695, %v744_v18 }
 0x1b3   :  { %v3355_v6 = vpop.eup %3354  ;;  %v2651_v63 = vmul.f32 %v3353_v2, %v5853_v8  ;;  %3372 = vlog2.f32 %v1842_v10  ;;  %v224_v8 = vmax.f32 %v5975_v21, 0.0  ;;  %v1846_v52 = vadd.f32 1.0, %v1845_v3 }
 0x1b4   :  { %v6220_v15 = vpop.eup %3356  ;;  %2778 = vst [vmem:[%s7325_s1 + $0x290] sm:$0xff] %v2650_v59  ;;  %v2652_v0 = vmul.f32 %v3355_v6, %v5867_v12  ;;  %v1836_v12 = vmul.f32 -0.5, %v6198_v48  ;;  %3374 = vpow2.f32 %v964_v4  ;;  %v618_v5 = vand.u32 2147483647, %v6253_v41 }
 0x1b5   :  { %2779 = vst [vmem:[%s7325_s1 + $0x298] sm:$0xff] %v2651_v63  ;;  %v1851_v20 = vadd.f32 1.0, %v6220_v15  ;;  %v3359_v36 = vpop.eup %3358  ;;  %vm354_vm3 = vcmp.ne.f32.partialorder %v6064_v46, %v6064_v46  ;;  %v1854_v40 = vmul.f32 -0.5, %v6220_v15  ;;  %v745_v57 = vsub.f32 0.0, %v617_v53 }
 0x1b6   :  { %2780 = vst [vmem:[%s7325_s1 + $0x2a0] sm:$0xff] %v2652_v0  ;;  %v2653_v17 = vmul.f32 %v3359_v36, %v5891_v35  ;;  %vm6283_vm4 = vcmp.lt.f32.partialorder %v1839_v26, 0.0004427343  ;;  %vm6292_vm5 = vcmp.lt.f32.partialorder %v1848_v62, 0.0004427343  ;;  %v746_v54 = vsub.f32 0.0, %v618_v5 }
 0x1b7   :  { %v3361_v28 = vpop.eup %3360  ;;  %3376 = vlog2.f32 %v1851_v20  ;;  %v970_v50 = vmul.f32 1.442695, %v745_v57  ;;  %v619_v10 = vand.u32 2147483647, %v6281_v29  ;;  %v1847_v59 = vmul.f32 %v6202_v32, %v1846_v52 }
 0x1b8   :  { %v3363_v56 = vpop.eup %3362  ;;  %v2654_v33 = vmul.f32 %v3361_v28, %v5899_v7  ;;  %3378 = vpow2.f32 %v966_v49  ;;  %2781 = vst [vmem:[%s7325_s1 + $0x2a8] sm:$0xff] %v2653_v17  ;;  %v1837_v7 = vadd.f32 1.0, %v1836_v12  ;;  %v1855_v6 = vadd.f32 1.0, %v1854_v40 }
 0x1b9   :  { %v1826_v35 = vmul.f32 0.6931472, %v3363_v56  ;;  %v3365_v47 = vpop.eup %3364  ;;  %3380 = vpow2.f32 %v968_v45  ;;  %v1857_v0 = vand.u32 2147483647, %v6220_v15  ;;  %v972_v4 = vmul.f32 1.442695, %v746_v54 }
 0x1ba   :  { %2782 = vst [vmem:[%s7325_s1 + $0x2b0] sm:$0xff] %v2654_v33  ;;  %v6270_v24 = vpop.eup %3366  ;;  %v2655_v9 = vmul.f32 %v3365_v47, %v5920_v31  ;;  %v227_v31 = vmax.f32 %v6092_v55, 0.0  ;;  %v1838_v30 = vmul.f32 %v6198_v48, %v1837_v7  ;;  %vm355_vm6 = vcmp.ne.f32.partialorder %v6092_v55, %v6092_v55 }
 0x1bb   :  { %v1832_v60 = vsel %vm6246_vm0, %v1829_v34, %v1826_v35  ;;  %v1860_v37 = vadd.f32 1.0, %v6270_v24  ;;  %v228_v48 = vmax.f32 %v6141_v25, 0.0  ;;  %v1863_v32 = vmul.f32 -0.5, %v6270_v24  ;;  %v6340_v35 = vld [vmem:[%s7324_s0 + $0x320] sm:$0xff] }
 0x1bc   :  { %v2272_v39 = vadd.f32 %v1832_v60, %v224_v8  ;;  %2783 = vst [vmem:[%s7325_s1 + $0x2b8] sm:$0xff] %v2655_v9  ;;  %v6296_v44 = vpop.eup %3368  ;;  %v747_v20 = vsub.f32 0.0, %v619_v10  ;;  %v1856_v19 = vmul.f32 %v6220_v15, %v1855_v6  ;;  %v229_v28 = vmax.f32 %v6173_v22, 0.0 }
 0x1bd   :  { %3382 = vlog2.f32 %v1860_v37  ;;  %v1869_v63 = vadd.f32 1.0, %v6296_v44  ;;  %vm6323_vm7 = vcmp.lt.f32.partialorder %v1857_v0, 0.0004427343  ;;  %v1872_v56 = vmul.f32 -0.5, %v6296_v44 }
 0x1be   :  { %v2400_v43 = vsel %vm352_vm1, %v5975_v21, %v2272_v39  ;;  %v1866_v18 = vand.u32 2147483647, %v6270_v24  ;;  %vm356_vm8 = vcmp.ne.f32.partialorder %v6141_v25, %v6141_v25  ;;  %v1864_v53 = vadd.f32 1.0, %v1863_v32 }
 0x1bf   :  { %v3371_v2 = vpop.eup %3370  ;;  %3384 = vtanh.f32 %v2400_v43  ;;  %v974_v47 = vmul.f32 1.442695, %v747_v20  ;;  %v1875_v52 = vand.u32 2147483647, %v6296_v44  ;;  %v1873_v9 = vadd.f32 1.0, %v1872_v56 }
 0x1c0   :  { %v3373_v38 = vpop.eup %3372  ;;  %v1835_v14 = vmul.f32 0.6931472, %v3371_v2  ;;  %3386 = vpow2.f32 %v970_v50  ;;  %v620_v60 = vand.u32 2147483647, %v6340_v35  ;;  %vm357_vm9 = vcmp.ne.f32.partialorder %v6173_v22, %v6173_v22 }
 0x1c1   :  { %v1844_v49 = vmul.f32 0.6931472, %v3373_v38  ;;  %3388 = vlog2.f32 %v1869_v63  ;;  %v6313_v36 = vpop.eup %3374  ;;  %v231_v57 = vmax.f32 %v6192_v58, 0.0  ;;  %v232_v39 = vmax.f32 %v6218_v16, 0.0  ;;  %v6380_v63 = vld [vmem:[%s7324_s0 + $0x328] sm:$0xff] }
 0x1c2   :  { %v1841_v8 = vsel %vm6283_vm4, %v1838_v30, %v1835_v14  ;;  %3390 = vpow2.f32 %v972_v4  ;;  %v1878_v33 = vadd.f32 1.0, %v6313_v36  ;;  %v1881_v40 = vmul.f32 -0.5, %v6313_v36 }
 0x1c3   :  { %v2273_v12 = vadd.f32 %v1841_v8, %v225_v27  ;;  %v1850_v3 = vsel %vm6292_vm5, %v1847_v59, %v1844_v49  ;;  %v1865_v37 = vmul.f32 %v6270_v24, %v1864_v53  ;;  %vm6366_vm10 = vcmp.lt.f32.partialorder %v1866_v18, 0.0004427343 }
 0x1c4   :  { %v3377_v17 = vpop.eup %3376  ;;  %v2274_v34 = vadd.f32 %v1850_v3, %v226_v42  ;;  %v230_v42 = vmax.f32 %v6186_v61, 0.0  ;;  %vm6370_vm11 = vcmp.lt.f32.partialorder %v1875_v52, 0.0004427343  ;;  %v1874_v59 = vmul.f32 %v6296_v44, %v1873_v9 }
 0x1c5   :  { %v6329_v27 = vpop.eup %3378  ;;  %v2401_v15 = vsel %vm353_vm2, %v6047_v23, %v2273_v12  ;;  %v1853_v26 = vmul.f32 0.6931472, %v3377_v17  ;;  %v1884_v24 = vand.u32 2147483647, %v6313_v36  ;;  %v748_v6 = vsub.f32 0.0, %v620_v60  ;;  %v6441_v60 = vld [vmem:[%s7324_s0 + $0x338] sm:$0xff] }
 0x1c6   :  { %3392 = vtanh.f32 %v2401_v15  ;;  %v2402_v62 = vsel %vm354_vm3, %v6064_v46, %v2274_v34  ;;  %v1887_v45 = vadd.f32 1.0, %v6329_v27  ;;  %v6358_v13 = vpop.eup %3380  ;;  %v1890_v1 = vmul.f32 -0.5, %v6329_v27 }
 0x1c7   :  { %3394 = vtanh.f32 %v2402_v62  ;;  %v1859_v7 = vsel %vm6323_vm7, %v1856_v19, %v1853_v26  ;;  %v1896_v30 = vadd.f32 1.0, %v6358_v13  ;;  %v1882_v0 = vadd.f32 1.0, %v1881_v40 }
 0x1c8   :  { %v2275_v5 = vadd.f32 %v1859_v7, %v227_v31  ;;  %3396 = vlog2.f32 %v1878_v33  ;;  %v1893_v4 = vand.u32 2147483647, %v6329_v27  ;;  %v1891_v8 = vadd.f32 1.0, %v1890_v1 }
 0x1c9   :  { %3398 = vlog2.f32 %v1887_v45  ;;  %v1899_v32 = vmul.f32 -0.5, %v6358_v13  ;;  %v1902_v19 = vand.u32 2147483647, %v6358_v13  ;;  %v621_v17 = vand.u32 2147483647, %v6380_v63 }
 0x1ca   :  { %v2403_v31 = vsel %vm355_vm6, %v6092_v55, %v2275_v5  ;;  %3400 = vpow2.f32 %v974_v47  ;;  %v3383_v50 = vpop.eup %3382  ;;  %vm358_vm12 = vcmp.ne.f32.partialorder %v6186_v61, %v6186_v61  ;;  %v233_v34 = vmax.f32 %v6242_v11, 0.0 }
 0x1cb   :  { %3402 = vtanh.f32 %v2403_v31  ;;  %v1862_v2 = vmul.f32 0.6931472, %v3383_v50  ;;  %v976_v56 = vmul.f32 1.442695, %v748_v6  ;;  %v1883_v15 = vmul.f32 %v6313_v36, %v1882_v0  ;;  %v6426_v36 = vld [vmem:[%s7324_s0 + $0x330] sm:$0xff] }
 0x1cc   :  { %v3385_v10 = vpop.eup %3384  ;;  %3404 = vlog2.f32 %v1896_v30  ;;  %vm6410_vm13 = vcmp.lt.f32.partialorder %v1884_v24, 0.0004427343  ;;  %vm359_vm14 = vcmp.ne.f32.partialorder %v6192_v58, %v6192_v58  ;;  %v1892_v62 = vmul.f32 %v6329_v27, %v1891_v8 }
 0x1cd   :  { %v6382_v38 = vpop.eup %3386  ;;  %v2656_v14 = vmul.f32 %v3385_v10, %v5975_v21  ;;  %v1868_v44 = vsel %vm6366_vm10, %v1865_v37, %v1862_v2  ;;  %vm6419_vm15 = vcmp.lt.f32.partialorder %v1893_v4, 0.0004427343  ;;  %v1900_v7 = vadd.f32 1.0, %v1899_v32 }
 0x1ce   :  { %v3389_v49 = vpop.eup %3388  ;;  %v1905_v20 = vadd.f32 1.0, %v6382_v38  ;;  %v2276_v21 = vadd.f32 %v1868_v44, %v228_v48  ;;  %vm6428_vm0 = vcmp.lt.f32.partialorder %v1902_v19, 0.0004427343  ;;  %v749_v45 = vsub.f32 0.0, %v621_v17 }
 0x1cf   :  { %v6390_v12 = vpop.eup %3390  ;;  %2784 = vst [vmem:[%s7325_s1 + $0x2c0] sm:$0xff] %v2656_v14  ;;  %v1871_v3 = vmul.f32 0.6931472, %v3389_v49  ;;  %v1908_v9 = vmul.f32 -0.5, %v6382_v38  ;;  %vm360_vm1 = vcmp.ne.f32.partialorder %v6218_v16, %v6218_v16  ;;  %v622_v37 = vand.u32 2147483647, %v6426_v36 }
 0x1d0   :  { %3406 = vlog2.f32 %v1905_v20  ;;  %v1914_v51 = vadd.f32 1.0, %v6390_v12  ;;  %v2404_v33 = vsel %vm356_vm8, %v6141_v25, %v2276_v21  ;;  %v1911_v54 = vand.u32 2147483647, %v6382_v38 }
 0x1d1   :  { %v1877_v48 = vsel %vm6370_vm11, %v1874_v59, %v1871_v3  ;;  %3408 = vtanh.f32 %v2404_v33  ;;  %v234_v43 = vmax.f32 %v6253_v41, 0.0  ;;  %v1917_v30 = vmul.f32 -0.5, %v6390_v12  ;;  %v6497_v33 = vld [vmem:[%s7324_s0 + $0x348] sm:$0xff] }
 0x1d2   :  { %v2277_v18 = vadd.f32 %v1877_v48, %v229_v28  ;;  %3410 = vlog2.f32 %v1914_v51  ;;  %v750_v2 = vsub.f32 0.0, %v622_v37  ;;  %v623_v59 = vand.u32 2147483647, %v6441_v60 }
 0x1d3   :  { %v3393_v47 = vpop.eup %3392  ;;  %3412 = vpow2.f32 %v976_v56  ;;  %v1901_v14 = vmul.f32 %v6358_v13, %v1900_v7  ;;  %vm361_vm2 = vcmp.ne.f32.partialorder %v6242_v11, %v6242_v11  ;;  %v1909_v0 = vadd.f32 1.0, %v1908_v9 }
 0x1d4   :  { %v3395_v28 = vpop.eup %3394  ;;  %v2657_v27 = vmul.f32 %v3393_v47, %v6047_v23  ;;  %v2405_v5 = vsel %vm357_vm9, %v6173_v22, %v2277_v18  ;;  %v978_v23 = vmul.f32 1.442695, %v749_v45  ;;  %v980_v32 = vmul.f32 1.442695, %v750_v2  ;;  %v6539_v2 = vld [vmem:[%s7324_s0 + $0x350] sm:$0xff] }
 0x1d5   :  { %v3397_v40 = vpop.eup %3396  ;;  %v2658_v31 = vmul.f32 %v3395_v28, %v6064_v46  ;;  %3414 = vtanh.f32 %v2405_v5  ;;  %vm6472_vm3 = vcmp.lt.f32.partialorder %v1911_v54, 0.0004427343  ;;  %v1918_v3 = vadd.f32 1.0, %v1917_v30 }
 0x1d6   :  { %v3399_v1 = vpop.eup %3398  ;;  %2785 = vst [vmem:[%s7325_s1 + $0x2c8] sm:$0xff] %v2657_v27  ;;  %v1880_v50 = vmul.f32 0.6931472, %v3397_v40  ;;  %3416 = vpow2.f32 %v978_v23  ;;  %v751_v19 = vsub.f32 0.0, %v623_v59  ;;  %v1910_v51 = vmul.f32 %v6382_v38, %v1909_v0 }
 0x1d7   :  { %v6453_v46 = vpop.eup %3400  ;;  %2786 = vst [vmem:[%s7325_s1 + $0x2d0] sm:$0xff] %v2658_v31  ;;  %v1889_v10 = vmul.f32 0.6931472, %v3399_v1  ;;  %v1920_v56 = vand.u32 2147483647, %v6390_v12  ;;  %vm362_vm4 = vcmp.ne.f32.partialorder %v6253_v41, %v6253_v41  ;;  %v1919_v7 = vmul.f32 %v6390_v12, %v1918_v3  ;;  %v6569_v3 = vld [vmem:[%s7324_s0 + $0x358] sm:$0xff] }
 0x1d8   :  { %v3403_v24 = vpop.eup %3402  ;;  %v1886_v6 = vsel %vm6410_vm13, %v1883_v15, %v1880_v50  ;;  %v1923_v4 = vadd.f32 1.0, %v6453_v46  ;;  %v982_v26 = vmul.f32 1.442695, %v751_v19  ;;  %v1926_v38 = vmul.f32 -0.5, %v6453_v46 }
 0x1d9   :  { %v2659_v49 = vmul.f32 %v3403_v24, %v6092_v55  ;;  %v2278_v44 = vadd.f32 %v1886_v6, %v230_v42  ;;  %v1895_v8 = vsel %vm6419_vm15, %v1892_v62, %v1889_v10  ;;  %v3405_v20 = vpop.eup %3404  ;;  %v6479_v55 = vld [vmem:[%s7324_s0 + $0x340] sm:$0xff]  ;;  %v625_v52 = vand.u32 2147483647, %v6497_v33 }
 0x1da   :  { %v2279_v21 = vadd.f32 %v1895_v8, %v231_v57  ;;  %3418 = vlog2.f32 %v1923_v4  ;;  %v1898_v57 = vmul.f32 0.6931472, %v3405_v20  ;;  %v624_v18 = vand.u32 2147483647, %v6479_v55 }
 0x1db   :  { %2787 = vst [vmem:[%s7325_s1 + $0x2d8] sm:$0xff] %v2659_v49  ;;  %v2406_v42 = vsel %vm358_vm12, %v6186_v61, %v2278_v44  ;;  %3420 = vpow2.f32 %v980_v32  ;;  %vm6516_vm5 = vcmp.lt.f32.partialorder %v1920_v56, 0.0004427343  ;;  %v1927_v37 = vadd.f32 1.0, %v1926_v38 }
 0x1dc   :  { %3422 = vtanh.f32 %v2406_v42  ;;  %v2407_v17 = vsel %vm359_vm14, %v6192_v58, %v2279_v21  ;;  %v1904_v15 = vsel %vm6428_vm0, %v1901_v14, %v1898_v57  ;;  %v752_v45 = vsub.f32 0.0, %v624_v18  ;;  %v6586_v18 = vld [vmem:[%s7324_s0 + $0x360] sm:$0xff] }
 0x1dd   :  { %v3407_v48 = vpop.eup %3406  ;;  %3424 = vtanh.f32 %v2407_v17  ;;  %v2280_v62 = vadd.f32 %v1904_v15, %v232_v39  ;;  %v1929_v1 = vand.u32 2147483647, %v6453_v46  ;;  %v753_v54 = vsub.f32 0.0, %v625_v52 }
 0x1de   :  { %v1907_v53 = vmul.f32 0.6931472, %v3407_v48  ;;  %v3409_v47 = vpop.eup %3408  ;;  %3426 = vpow2.f32 %v982_v26  ;;  %v1928_v14 = vmul.f32 %v6453_v46, %v1927_v37  ;;  %v626_v4 = vand.u32 2147483647, %v6539_v2 }
 0x1df   :  { %v3411_v28 = vpop.eup %3410  ;;  %v2660_v27 = vmul.f32 %v3409_v47, %v6141_v25  ;;  %v2408_v39 = vsel %vm360_vm1, %v6218_v16, %v2280_v62  ;;  %v984_v25 = vmul.f32 1.442695, %v752_v45  ;;  %v986_v0 = vmul.f32 1.442695, %v753_v54 }
 0x1e0   :  { %v1913_v5 = vsel %vm6472_vm3, %v1910_v51, %v1907_v53  ;;  %v6520_v12 = vpop.eup %3412  ;;  %3428 = vtanh.f32 %v2408_v39  ;;  %v1916_v31 = vmul.f32 0.6931472, %v3411_v28  ;;  %vm6556_vm6 = vcmp.lt.f32.partialorder %v1929_v1, 0.0004427343  ;;  %v6606_v39 = vld [vmem:[%s7324_s0 + $0x368] sm:$0xff] }
 0x1e1   :  { %v2281_v40 = vadd.f32 %v1913_v5, %v233_v34  ;;  %2788 = vst [vmem:[%s7325_s1 + $0x2e0] sm:$0xff] %v2660_v27  ;;  %v1932_v50 = vadd.f32 1.0, %v6520_v12  ;;  %3430 = vpow2.f32 %v984_v25  ;;  %v754_v20 = vsub.f32 0.0, %v626_v4 }
 0x1e2   :  { %v3415_v23 = vpop.eup %3414  ;;  %v1922_v10 = vsel %vm6516_vm5, %v1919_v7, %v1916_v31  ;;  %vm363_vm7 = vcmp.ne.f32.partialorder %v6281_v29, %v6281_v29  ;;  %v1935_v46 = vmul.f32 -0.5, %v6520_v12  ;;  %v1938_v15 = vand.u32 2147483647, %v6520_v12 }
 0x1e3   :  { %v2661_v30 = vmul.f32 %v3415_v23, %v6173_v22  ;;  %v2409_v34 = vsel %vm361_vm2, %v6242_v11, %v2281_v40  ;;  %v6541_v59 = vpop.eup %3416  ;;  %v2282_v22 = vadd.f32 %v1922_v10, %v234_v43  ;;  %v235_v43 = vmax.f32 %v6281_v29, 0.0 }
 0x1e4   :  { %3432 = vtanh.f32 %v2409_v34  ;;  %v1941_v24 = vadd.f32 1.0, %v6541_v59  ;;  %v988_v17 = vmul.f32 1.442695, %v754_v20  ;;  %v1944_v26 = vmul.f32 -0.5, %v6541_v59 }
 0x1e5   :  { %2789 = vst [vmem:[%s7325_s1 + $0x2e8] sm:$0xff] %v2661_v30  ;;  %3434 = vlog2.f32 %v1932_v50  ;;  %v2410_v6 = vsel %vm362_vm4, %v6253_v41, %v2282_v22  ;;  %v236_v62 = vmax.f32 %v6340_v35, 0.0  ;;  %v1936_v53 = vadd.f32 1.0, %v1935_v46 }
 0x1e6   :  { %3436 = vtanh.f32 %v2410_v6  ;;  %vm364_vm8 = vcmp.ne.f32.partialorder %v6340_v35, %v6340_v35  ;;  %v237_v7 = vmax.f32 %v6380_v63, 0.0  ;;  %v628_v27 = vand.u32 2147483647, %v6586_v18  ;;  %v6632_v6 = vld [vmem:[%s7324_s0 + $0x370] sm:$0xff] }
 0x1e7   :  { %v3419_v49 = vpop.eup %3418  ;;  %3438 = vlog2.f32 %v1941_v24  ;;  %vm6610_vm9 = vcmp.lt.f32.partialorder %v1938_v15, 0.0004427343  ;;  %vm365_vm10 = vcmp.ne.f32.partialorder %v6380_v63, %v6380_v63  ;;  %v238_v40 = vmax.f32 %v6426_v36, 0.0 }
 0x1e8   :  { %v6560_v8 = vpop.eup %3420  ;;  %v1925_v32 = vmul.f32 0.6931472, %v3419_v49  ;;  %3440 = vpow2.f32 %v986_v0  ;;  %v1937_v23 = vmul.f32 %v6520_v12, %v1936_v53  ;;  %v1947_v37 = vand.u32 2147483647, %v6541_v59 }
 0x1e9   :  { %v3423_v21 = vpop.eup %3422  ;;  %v1950_v13 = vadd.f32 1.0, %v6560_v8  ;;  %v1953_v28 = vmul.f32 -0.5, %v6560_v8  ;;  %v1956_v1 = vand.u32 2147483647, %v6560_v8  ;;  %v756_v34 = vsub.f32 0.0, %v628_v27 }
 0x1ea   :  { %v3425_v42 = vpop.eup %3424  ;;  %v2662_v57 = vmul.f32 %v3423_v21, %v6186_v61  ;;  %v1931_v19 = vsel %vm6556_vm6, %v1928_v14, %v1925_v32  ;;  %v627_v61 = vand.u32 2147483647, %v6569_v3  ;;  %v629_v10 = vand.u32 2147483647, %v6606_v39 }
 0x1eb   :  { %v2663_v51 = vmul.f32 %v3425_v42, %v6192_v58  ;;  %v2283_v56 = vadd.f32 %v1931_v19, %v235_v43  ;;  %3442 = vlog2.f32 %v1950_v13  ;;  %v6575_v48 = vpop.eup %3426  ;;  %vm366_vm11 = vcmp.ne.f32.partialorder %v6426_v36, %v6426_v36 }
 0x1ec   :  { %2790 = vst [vmem:[%s7325_s1 + $0x2f0] sm:$0xff] %v2662_v57  ;;  %3444 = vpow2.f32 %v988_v17  ;;  %v1959_v38 = vadd.f32 1.0, %v6575_v48  ;;  %v755_v45 = vsub.f32 0.0, %v627_v61  ;;  %v1954_v24 = vadd.f32 1.0, %v1953_v28 }
 0x1ed   :  { %2791 = vst [vmem:[%s7325_s1 + $0x2f8] sm:$0xff] %v2663_v51  ;;  %v2411_v58 = vsel %vm363_vm7, %v6281_v29, %v2283_v56  ;;  %v3429_v47 = vpop.eup %3428  ;;  %v1962_v12 = vmul.f32 -0.5, %v6575_v48  ;;  %v239_v0 = vmax.f32 %v6441_v60, 0.0  ;;  %v1965_v4 = vand.u32 2147483647, %v6575_v48  ;;  %v6664_v51 = vld [vmem:[%s7324_s0 + $0x378] sm:$0xff] }
 0x1ee   :  { %3446 = vtanh.f32 %v2411_v58  ;;  %v2664_v52 = vmul.f32 %v3429_v47, %v6218_v16  ;;  %v6608_v5 = vpop.eup %3430  ;;  %v1945_v16 = vadd.f32 1.0, %v1944_v26  ;;  %v990_v31 = vmul.f32 1.442695, %v755_v45 }
 0x1ef   :  { %3448 = vlog2.f32 %v1959_v38  ;;  %v1968_v50 = vadd.f32 1.0, %v6608_v5  ;;  %v992_v49 = vmul.f32 1.442695, %v756_v34  ;;  %vm6643_vm12 = vcmp.lt.f32.partialorder %v1947_v37, 0.0004427343 }
 0x1f0   :  { %2792 = vst [vmem:[%s7325_s1 + $0x300] sm:$0xff] %v2664_v52  ;;  %3450 = vpow2.f32 %v990_v31  ;;  %v757_v21 = vsub.f32 0.0, %v629_v10  ;;  %vm6654_vm13 = vcmp.lt.f32.partialorder %v1956_v1, 0.0004427343  ;;  %vm367_vm14 = vcmp.ne.f32.partialorder %v6441_v60, %v6441_v60 }
 0x1f1   :  { %v3433_v25 = vpop.eup %3432  ;;  %3452 = vlog2.f32 %v1968_v50  ;;  %v1963_v19 = vadd.f32 1.0, %v1962_v12  ;;  %v1971_v17 = vmul.f32 -0.5, %v6608_v5  ;;  %vm6672_vm15 = vcmp.lt.f32.partialorder %v1965_v4, 0.0004427343  ;;  %v6717_v4 = vld [vmem:[%s7324_s0 + $0x380] sm:$0xff] }
 0x1f2   :  { %v3435_v54 = vpop.eup %3434  ;;  %v2665_v30 = vmul.f32 %v3433_v25, %v6242_v11  ;;  %v1946_v11 = vmul.f32 %v6541_v59, %v1945_v16  ;;  %3454 = vpow2.f32 %v992_v49  ;;  %v630_v59 = vand.u32 2147483647, %v6632_v6 }
 0x1f3   :  { %v1934_v22 = vmul.f32 0.6931472, %v3435_v54  ;;  %v3437_v14 = vpop.eup %3436  ;;  %v994_v38 = vmul.f32 1.442695, %v757_v21  ;;  %v631_v52 = vand.u32 2147483647, %v6664_v51  ;;  %v1964_v16 = vmul.f32 %v6575_v48, %v1963_v19 }
 0x1f4   :  { %2793 = vst [vmem:[%s7325_s1 + $0x308] sm:$0xff] %v2665_v30  ;;  %v3439_v43 = vpop.eup %3438  ;;  %v2666_v44 = vmul.f32 %v3437_v14, %v6253_v41  ;;  %v1955_v41 = vmul.f32 %v6560_v8, %v1954_v24  ;;  %v758_v45 = vsub.f32 0.0, %v630_v59  ;;  %v1974_v37 = vand.u32 2147483647, %v6608_v5 }
 0x1f5   :  { %v1940_v32 = vsel %vm6610_vm9, %v1937_v23, %v1934_v22  ;;  %v1943_v13 = vmul.f32 0.6931472, %v3439_v43  ;;  %v6648_v42 = vpop.eup %3440  ;;  %v240_v50 = vmax.f32 %v6479_v55, 0.0  ;;  %vm368_vm0 = vcmp.ne.f32.partialorder %v6479_v55, %v6479_v55 }
 0x1f6   :  { %v2284_v46 = vadd.f32 %v1940_v32, %v236_v62  ;;  %2794 = vst [vmem:[%s7325_s1 + $0x310] sm:$0xff] %v2666_v44  ;;  %v1977_v61 = vadd.f32 1.0, %v6648_v42  ;;  %v1980_v54 = vmul.f32 -0.5, %v6648_v42  ;;  %v996_v48 = vmul.f32 1.442695, %v758_v45 }
 0x1f7   :  { %v1949_v15 = vsel %vm6643_vm12, %v1946_v11, %v1943_v13  ;;  %vm6708_vm1 = vcmp.lt.f32.partialorder %v1974_v37, 0.0004427343  ;;  %v241_v14 = vmax.f32 %v6497_v33, 0.0  ;;  %vm369_vm2 = vcmp.ne.f32.partialorder %v6497_v33, %v6497_v33  ;;  %v6735_v13 = vld [vmem:[%s7324_s0 + $0x388] sm:$0xff] }
 0x1f8   :  { %v3443_v56 = vpop.eup %3442  ;;  %v2412_v8 = vsel %vm364_vm8, %v6340_v35, %v2284_v46  ;;  %v2285_v62 = vadd.f32 %v1949_v15, %v237_v7  ;;  %v1972_v7 = vadd.f32 1.0, %v1971_v17  ;;  %v1981_v44 = vadd.f32 1.0, %v1980_v54 }
 0x1f9   :  { %v6677_v58 = vpop.eup %3444  ;;  %3456 = vtanh.f32 %v2412_v8  ;;  %v1952_v53 = vmul.f32 0.6931472, %v3443_v56  ;;  %v1983_v21 = vand.u32 2147483647, %v6648_v42  ;;  %v632_v46 = vand.u32 2147483647, %v6717_v4 }
 0x1fa   :  { %3458 = vlog2.f32 %v1977_v61  ;;  %v1986_v47 = vadd.f32 1.0, %v6677_v58  ;;  %v2413_v27 = vsel %vm365_vm10, %v6380_v63, %v2285_v62  ;;  %v1973_v10 = vmul.f32 %v6608_v5, %v1972_v7 }
 0x1fb   :  { %v3447_v28 = vpop.eup %3446  ;;  %v1958_v9 = vsel %vm6654_vm13, %v1955_v41, %v1952_v53  ;;  %3460 = vtanh.f32 %v2413_v27  ;;  %v1989_v43 = vmul.f32 -0.5, %v6677_v58  ;;  %v242_v41 = vmax.f32 %v6539_v2, 0.0  ;;  %v6750_v53 = vld [vmem:[%s7324_s0 + $0x390] sm:$0xff] }
 0x1fc   :  { %v3449_v31 = vpop.eup %3448  ;;  %v2667_v25 = vmul.f32 %v3447_v28, %v6281_v29  ;;  %v2286_v23 = vadd.f32 %v1958_v9, %v238_v40  ;;  %3462 = vlog2.f32 %v1986_v47  ;;  %v759_v40 = vsub.f32 0.0, %v631_v52 }
 0x1fd   :  { %v1961_v1 = vmul.f32 0.6931472, %v3449_v31  ;;  %3464 = vpow2.f32 %v994_v38  ;;  %v6701_v30 = vpop.eup %3450  ;;  %v1990_v17 = vadd.f32 1.0, %v1989_v43  ;;  %v1992_v56 = vand.u32 2147483647, %v6677_v58 }
 0x1fe   :  { %2795 = vst [vmem:[%s7325_s1 + $0x318] sm:$0xff] %v2667_v25  ;;  %v2414_v29 = vsel %vm366_vm11, %v6426_v36, %v2286_v23  ;;  %v3453_v22 = vpop.eup %3452  ;;  %v1995_v11 = vadd.f32 1.0, %v6701_v30  ;;  %v998_v5 = vmul.f32 1.442695, %v759_v40  ;;  %v1998_v57 = vmul.f32 -0.5, %v6701_v30  ;;  %v6778_v40 = vld [vmem:[%s7324_s0 + $0x398] sm:$0xff] }
 0x1ff   :  { %3466 = vtanh.f32 %v2414_v29  ;;  %v1967_v34 = vsel %vm6672_vm15, %v1964_v16, %v1961_v1  ;;  %v1970_v49 = vmul.f32 0.6931472, %v3453_v22  ;;  %v6726_v32 = vpop.eup %3454  ;;  %v760_v8 = vsub.f32 0.0, %v632_v46 }
 0x200   :  { %v2287_v24 = vadd.f32 %v1967_v34, %v239_v0  ;;  %3468 = vpow2.f32 %v996_v48  ;;  %v2004_v19 = vadd.f32 1.0, %v6726_v32  ;;  %v1982_v61 = vmul.f32 %v6648_v42, %v1981_v44 }
 0x201   :  { %3470 = vlog2.f32 %v1995_v11  ;;  %v1976_v20 = vsel %vm6708_vm1, %v1973_v10, %v1970_v49  ;;  %v633_v62 = vand.u32 2147483647, %v6735_v13  ;;  %vm6753_vm3 = vcmp.lt.f32.partialorder %v1983_v21, 0.0004427343 }
 0x202   :  { %v2415_v0 = vsel %vm367_vm14, %v6441_v60, %v2287_v24  ;;  %v2288_v59 = vadd.f32 %v1976_v20, %v240_v50  ;;  %v1000_v52 = vmul.f32 1.442695, %v760_v8  ;;  %vm370_vm4 = vcmp.ne.f32.partialorder %v6539_v2, %v6539_v2 }
 0x203   :  { %3472 = vtanh.f32 %v2415_v0  ;;  %v1999_v42 = vadd.f32 1.0, %v1998_v57  ;;  %v761_v27 = vsub.f32 0.0, %v633_v62  ;;  %v1991_v16 = vmul.f32 %v6677_v58, %v1990_v17 }
 0x204   :  { %3474 = vpow2.f32 %v998_v5  ;;  %v2416_v26 = vsel %vm368_vm0, %v6479_v55, %v2288_v59  ;;  %vm6763_vm5 = vcmp.lt.f32.partialorder %v1992_v56, 0.0004427343  ;;  %v634_v7 = vand.u32 2147483647, %v6750_v53 }
 0x205   :  { %3476 = vlog2.f32 %v2004_v19  ;;  %v2007_v37 = vmul.f32 -0.5, %v6726_v32  ;;  %v1002_v1 = vmul.f32 1.442695, %v761_v27  ;;  %v2001_v29 = vand.u32 2147483647, %v6701_v30 }
 0x206   :  { %v3457_v15 = vpop.eup %3456  ;;  %3478 = vtanh.f32 %v2416_v26  ;;  %v762_v48 = vsub.f32 0.0, %v634_v7  ;;  %v2000_v10 = vmul.f32 %v6701_v30, %v1999_v42  ;;  %v635_v30 = vand.u32 2147483647, %v6778_v40 }
 0x207   :  { %v3459_v38 = vpop.eup %3458  ;;  %v2668_v47 = vmul.f32 %v3457_v15, %v6340_v35  ;;  %3480 = vpow2.f32 %v1000_v52  ;;  %v2008_v5 = vadd.f32 1.0, %v2007_v37  ;;  %vm6799_vm6 = vcmp.lt.f32.partialorder %v2001_v29, 0.0004427343  ;;  %v6860_v29 = vld [vmem:[%s7324_s0 + $0x3a8] sm:$0xff] }
 0x208   :  { %v1979_v28 = vmul.f32 0.6931472, %v3459_v38  ;;  %v3461_v9 = vpop.eup %3460  ;;  %3482 = vpow2.f32 %v1002_v1  ;;  %v1004_v11 = vmul.f32 1.442695, %v762_v48  ;;  %v2010_v44 = vand.u32 2147483647, %v6726_v32 }
 0x209   :  { %2796 = vst [vmem:[%s7325_s1 + $0x320] sm:$0xff] %v2668_v47  ;;  %v3463_v31 = vpop.eup %3462  ;;  %v2669_v25 = vmul.f32 %v3461_v9, %v6380_v63  ;;  %v243_v63 = vmax.f32 %v6569_v3, 0.0  ;;  %vm371_vm7 = vcmp.ne.f32.partialorder %v6569_v3, %v6569_v3  ;;  %v244_v57 = vmax.f32 %v6586_v18, 0.0 }
 0x20a   :  { %v1985_v23 = vsel %vm6753_vm3, %v1982_v61, %v1979_v28  ;;  %v6772_v50 = vpop.eup %3464  ;;  %v1988_v58 = vmul.f32 0.6931472, %v3463_v31  ;;  %vm372_vm8 = vcmp.ne.f32.partialorder %v6586_v18, %v6586_v18  ;;  %v2009_v56 = vmul.f32 %v6726_v32, %v2008_v5  ;;  %v6832_v32 = vld [vmem:[%s7324_s0 + $0x3a0] sm:$0xff] }
 0x20b   :  { %v2289_v54 = vadd.f32 %v1985_v23, %v241_v14  ;;  %2797 = vst [vmem:[%s7325_s1 + $0x328] sm:$0xff] %v2669_v25  ;;  %v2013_v22 = vadd.f32 1.0, %v6772_v50  ;;  %v763_v8 = vsub.f32 0.0, %v635_v30  ;;  %vm6823_vm9 = vcmp.lt.f32.partialorder %v2010_v44, 0.0004427343 }
 0x20c   :  { %v3467_v34 = vpop.eup %3466  ;;  %v1994_v14 = vsel %vm6763_vm5, %v1991_v16, %v1988_v58  ;;  %v2016_v61 = vmul.f32 -0.5, %v6772_v50  ;;  %v245_v45 = vmax.f32 %v6606_v39, 0.0  ;;  %v246_v52 = vmax.f32 %v6632_v6, 0.0 }
 0x20d   :  { %v2670_v24 = vmul.f32 %v3467_v34, %v6426_v36  ;;  %v2417_v12 = vsel %vm369_vm2, %v6497_v33, %v2289_v54  ;;  %v6793_v49 = vpop.eup %3468  ;;  %v2290_v43 = vadd.f32 %v1994_v14, %v242_v41  ;;  %v1006_v28 = vmul.f32 1.442695, %v763_v8  ;;  %v6900_v8 = vld [vmem:[%s7324_s0 + $0x3b0] sm:$0xff] }
 0x20e   :  { %3484 = vtanh.f32 %v2417_v12  ;;  %v3471_v0 = vpop.eup %3470  ;;  %v2022_v20 = vadd.f32 1.0, %v6793_v49  ;;  %v2019_v9 = vand.u32 2147483647, %v6772_v50  ;;  %v2025_v7 = vmul.f32 -0.5, %v6793_v49 }
 0x20f   :  { %2798 = vst [vmem:[%s7325_s1 + $0x330] sm:$0xff] %v2670_v24  ;;  %3486 = vlog2.f32 %v2013_v22  ;;  %v2418_v46 = vsel %vm370_vm4, %v6539_v2, %v2290_v43  ;;  %v1997_v59 = vmul.f32 0.6931472, %v3471_v0  ;;  %v636_v31 = vand.u32 2147483647, %v6832_v32 }
 0x210   :  { %v3473_v21 = vpop.eup %3472  ;;  %3488 = vpow2.f32 %v1004_v11  ;;  %vm373_vm10 = vcmp.ne.f32.partialorder %v6606_v39, %v6606_v39  ;;  %v2017_v25 = vadd.f32 1.0, %v2016_v61  ;;  %v247_v23 = vmax.f32 %v6664_v51, 0.0 }
 0x211   :  { %v2671_v41 = vmul.f32 %v3473_v21, %v6441_v60  ;;  %3490 = vtanh.f32 %v2418_v46  ;;  %v6815_v19 = vpop.eup %3474  ;;  %v2003_v17 = vsel %vm6799_vm6, %v2000_v10, %v1997_v59  ;;  %v2028_v1 = vand.u32 2147483647, %v6793_v49 }
 0x212   :  { %3492 = vlog2.f32 %v2022_v20  ;;  %v3477_v15 = vpop.eup %3476  ;;  %v2291_v60 = vadd.f32 %v2003_v17, %v243_v63  ;;  %v2031_v62 = vadd.f32 1.0, %v6815_v19  ;;  %v248_v54 = vmax.f32 %v6717_v4, 0.0 }
 0x213   :  { %2799 = vst [vmem:[%s7325_s1 + $0x338] sm:$0xff] %v2671_v41  ;;  %v3479_v38 = vpop.eup %3478  ;;  %v2006_v47 = vmul.f32 0.6931472, %v3477_v15  ;;  %v764_v58 = vsub.f32 0.0, %v636_v31  ;;  %v2034_v63 = vmul.f32 -0.5, %v6815_v19  ;;  %v249_v10 = vmax.f32 %v6735_v13, 0.0 }
 0x214   :  { %v2672_v42 = vmul.f32 %v3479_v38, %v6479_v55  ;;  %v2419_v27 = vsel %vm371_vm7, %v6569_v3, %v2291_v60  ;;  %3494 = vlog2.f32 %v2031_v62  ;;  %v6842_v16 = vpop.eup %3480  ;;  %vm6870_vm11 = vcmp.lt.f32.partialorder %v2019_v9, 0.0004427343 }
 0x215   :  { %3496 = vtanh.f32 %v2419_v27  ;;  %v2012_v35 = vsel %vm6823_vm9, %v2009_v56, %v2006_v47  ;;  %v2040_v37 = vadd.f32 1.0, %v6842_v16  ;;  %v6862_v48 = vpop.eup %3482  ;;  %vm374_vm12 = vcmp.ne.f32.partialorder %v6632_v6, %v6632_v6 }
 0x216   :  { %2800 = vst [vmem:[%s7325_s1 + $0x340] sm:$0xff] %v2672_v42  ;;  %v2292_v55 = vadd.f32 %v2012_v35, %v244_v57  ;;  %3498 = vpow2.f32 %v1006_v28  ;;  %v2026_v24 = vadd.f32 1.0, %v2025_v7  ;;  %v2049_v12 = vadd.f32 1.0, %v6862_v48 }
 0x217   :  { %3500 = vlog2.f32 %v2040_v37  ;;  %v2018_v11 = vmul.f32 %v6772_v50, %v2017_v25  ;;  %v2037_v43 = vand.u32 2147483647, %v6815_v19  ;;  %v1008_v5 = vmul.f32 1.442695, %v764_v58 }
 0x218   :  { %v2420_v34 = vsel %vm372_vm8, %v6586_v18, %v2292_v55  ;;  %v637_v30 = vand.u32 2147483647, %v6860_v29  ;;  %vm6881_vm13 = vcmp.lt.f32.partialorder %v2028_v1, 0.0004427343  ;;  %v2043_v20 = vmul.f32 -0.5, %v6842_v16  ;;  %v6937_v1 = vld [vmem:[%s7324_s0 + $0x3c0] sm:$0xff] }
 0x219   :  { %3502 = vtanh.f32 %v2420_v34  ;;  %vm375_vm14 = vcmp.ne.f32.partialorder %v6664_v51, %v6664_v51  ;;  %v2035_v50 = vadd.f32 1.0, %v2034_v63  ;;  %v2046_v57 = vand.u32 2147483647, %v6842_v16 }
 0x21a   :  { %3504 = vlog2.f32 %v2049_v12  ;;  %v765_v59 = vsub.f32 0.0, %v637_v30  ;;  %v2052_v17 = vmul.f32 -0.5, %v6862_v48  ;;  %vm6905_vm15 = vcmp.lt.f32.partialorder %v2037_v43, 0.0004427343 }
 0x21b   :  { %v3485_v14 = vpop.eup %3484  ;;  %3506 = vpow2.f32 %v1008_v5  ;;  %v2044_v47 = vadd.f32 1.0, %v2043_v20  ;;  %v2036_v28 = vmul.f32 %v6815_v19, %v2035_v50  ;;  %vm376_vm0 = vcmp.ne.f32.partialorder %v6717_v4, %v6717_v4 }
 0x21c   :  { %v3487_v0 = vpop.eup %3486  ;;  %v2673_v36 = vmul.f32 %v3485_v14, %v6497_v33  ;;  %v2027_v33 = vmul.f32 %v6793_v49, %v2026_v24  ;;  %v1010_v49 = vmul.f32 1.442695, %v765_v59  ;;  %v638_v42 = vand.u32 2147483647, %v6900_v8 }
 0x21d   :  { %v6886_v21 = vpop.eup %3488  ;;  %v2015_v46 = vmul.f32 0.6931472, %v3487_v0  ;;  %vm6928_vm1 = vcmp.lt.f32.partialorder %v2046_v57, 0.0004427343  ;;  %v2053_v7 = vadd.f32 1.0, %v2052_v17  ;;  %v2045_v34 = vmul.f32 %v6842_v16, %v2044_v47 }
 0x21e   :  { %v3491_v41 = vpop.eup %3490  ;;  %2801 = vst [vmem:[%s7325_s1 + $0x348] sm:$0xff] %v2673_v36  ;;  %v2058_v56 = vadd.f32 1.0, %v6886_v21  ;;  %v766_v37 = vsub.f32 0.0, %v638_v42  ;;  %v2061_v63 = vmul.f32 -0.5, %v6886_v21  ;;  %v640_v5 = vand.u32 2147483647, %v6937_v1 }
 0x21f   :  { %v3493_v15 = vpop.eup %3492  ;;  %v2674_v60 = vmul.f32 %v3491_v41, %v6539_v2  ;;  %v2021_v26 = vsel %vm6870_vm11, %v2018_v11, %v2015_v46  ;;  %v2055_v2 = vand.u32 2147483647, %v6862_v48  ;;  %v2054_v36 = vmul.f32 %v6862_v48, %v2053_v7 }
 0x220   :  { %v2293_v62 = vadd.f32 %v2021_v26, %v245_v45  ;;  %v2024_v38 = vmul.f32 0.6931472, %v3493_v15  ;;  %3508 = vlog2.f32 %v2058_v56  ;;  %v6920_v45 = vld [vmem:[%s7324_s0 + $0x3b8] sm:$0xff]  ;;  %v2062_v50 = vadd.f32 1.0, %v2061_v63  ;;  %v6984_v15 = vld [vmem:[%s7324_s0 + $0x3c8] sm:$0xff] }
 0x221   :  { %2802 = vst [vmem:[%s7325_s1 + $0x350] sm:$0xff] %v2674_v60  ;;  %3510 = vpow2.f32 %v1010_v49  ;;  %v3495_v27 = vpop.eup %3494  ;;  %v639_v22 = vand.u32 2147483647, %v6920_v45  ;;  %vm6951_vm2 = vcmp.lt.f32.partialorder %v2055_v2, 0.0004427343  ;;  %v768_v17 = vsub.f32 0.0, %v640_v5 }
 0x222   :  { %v2421_v9 = vsel %vm373_vm10, %v6606_v39, %v2293_v62  ;;  %v2030_v19 = vsel %vm6881_vm13, %v2027_v33, %v2024_v38  ;;  %v3497_v31 = vpop.eup %3496  ;;  %v2033_v25 = vmul.f32 0.6931472, %v3495_v27  ;;  %v2064_v41 = vand.u32 2147483647, %v6886_v21 }
 0x223   :  { %3512 = vtanh.f32 %v2421_v9  ;;  %v2294_v55 = vadd.f32 %v2030_v19, %v246_v52  ;;  %v2675_v58 = vmul.f32 %v3497_v31, %v6569_v3  ;;  %v6943_v24 = vpop.eup %3498  ;;  %v1012_v3 = vmul.f32 1.442695, %v766_v37  ;;  %v7016_v31 = vld [vmem:[%s7324_s0 + $0x3d0] sm:$0xff] }
 0x224   :  { %v2039_v12 = vsel %vm6905_vm15, %v2036_v28, %v2033_v25  ;;  %v3501_v16 = vpop.eup %3500  ;;  %v2067_v43 = vadd.f32 1.0, %v6943_v24  ;;  %v767_v44 = vsub.f32 0.0, %v639_v22  ;;  %vm377_vm3 = vcmp.ne.f32.partialorder %v6735_v13, %v6735_v13 }
 0x225   :  { %v2422_v52 = vsel %vm374_vm12, %v6632_v6, %v2294_v55  ;;  %2803 = vst [vmem:[%s7325_s1 + $0x358] sm:$0xff] %v2675_v58  ;;  %v2295_v11 = vadd.f32 %v2039_v12, %v247_v23  ;;  %v2042_v0 = vmul.f32 0.6931472, %v3501_v16  ;;  %v2063_v26 = vmul.f32 %v6886_v21, %v2062_v50  ;;  %v7035_v12 = vld [vmem:[%s7324_s0 + $0x3d8] sm:$0xff] }
 0x226   :  { %3514 = vtanh.f32 %v2422_v52  ;;  %v3503_v30 = vpop.eup %3502  ;;  %v1014_v33 = vmul.f32 1.442695, %v767_v44  ;;  %v2070_v61 = vmul.f32 -0.5, %v6943_v24  ;;  %v250_v38 = vmax.f32 %v6750_v53, 0.0 }
 0x227   :  { %3516 = vpow2.f32 %v1012_v3  ;;  %v2676_v20 = vmul.f32 %v3503_v30, %v6586_v18  ;;  %v2423_v46 = vsel %vm375_vm14, %v6664_v51, %v2295_v11  ;;  %v3505_v23 = vpop.eup %3504  ;;  %v2048_v59 = vsel %vm6928_vm1, %v2045_v34, %v2042_v0 }
 0x228   :  { %3518 = vlog2.f32 %v2067_v43  ;;  %v6971_v48 = vpop.eup %3506  ;;  %v2296_v18 = vadd.f32 %v2048_v59, %v248_v54  ;;  %v2051_v57 = vmul.f32 0.6931472, %v3505_v23  ;;  %vm6997_vm4 = vcmp.lt.f32.partialorder %v2064_v41, 0.0004427343  ;;  %v7059_v23 = vld [vmem:[%s7324_s0 + $0x3e0] sm:$0xff] }
 0x229   :  { %3520 = vtanh.f32 %v2423_v46  ;;  %2804 = vst [vmem:[%s7325_s1 + $0x360] sm:$0xff] %v2676_v20  ;;  %v2076_v56 = vadd.f32 1.0, %v6971_v48  ;;  %v1016_v42 = vmul.f32 1.442695, %v768_v17  ;;  %v641_v21 = vand.u32 2147483647, %v6984_v15 }
 0x22a   :  { %3522 = vpow2.f32 %v1014_v33  ;;  %v2424_v60 = vsel %vm376_vm0, %v6717_v4, %v2296_v18  ;;  %v2057_v54 = vsel %vm6951_vm2, %v2054_v36, %v2051_v57  ;;  %vm378_vm5 = vcmp.ne.f32.partialorder %v6750_v53, %v6750_v53 }
 0x22b   :  { %3524 = vtanh.f32 %v2424_v60  ;;  %v2297_v62 = vadd.f32 %v2057_v54, %v249_v10  ;;  %v2071_v35 = vadd.f32 1.0, %v2070_v61  ;;  %v769_v7 = vsub.f32 0.0, %v641_v21 }
 0x22c   :  { %3526 = vlog2.f32 %v2076_v56  ;;  %v2073_v37 = vand.u32 2147483647, %v6943_v24  ;;  %v2079_v58 = vmul.f32 -0.5, %v6971_v48  ;;  %vm379_vm6 = vcmp.ne.f32.partialorder %v6778_v40, %v6778_v40 }
 0x22d   :  { %v3509_v49 = vpop.eup %3508  ;;  %v2425_v27 = vsel %vm377_vm3, %v6735_v13, %v2297_v62  ;;  %v1018_v34 = vmul.f32 1.442695, %v769_v7  ;;  %v642_v52 = vand.u32 2147483647, %v7016_v31  ;;  %v2072_v16 = vmul.f32 %v6943_v24, %v2071_v35 }
 0x22e   :  { %v7001_v28 = vpop.eup %3510  ;;  %v2060_v2 = vmul.f32 0.6931472, %v3509_v49  ;;  %3528 = vtanh.f32 %v2425_v27  ;;  %v2082_v11 = vand.u32 2147483647, %v6971_v48  ;;  %vm7042_vm7 = vcmp.lt.f32.partialorder %v2073_v37, 0.0004427343 }
 0x22f   :  { %v2085_v10 = vadd.f32 1.0, %v7001_v28  ;;  %v2088_v30 = vmul.f32 -0.5, %v7001_v28  ;;  %v2080_v44 = vadd.f32 1.0, %v2079_v58  ;;  %v770_v24 = vsub.f32 0.0, %v642_v52 }
 0x230   :  { %v3513_v9 = vpop.eup %3512  ;;  %v2066_v19 = vsel %vm6997_vm4, %v2063_v26, %v2060_v2  ;;  %v643_v20 = vand.u32 2147483647, %v7035_v12  ;;  %v252_v50 = vmax.f32 %v6832_v32, 0.0  ;;  %vm380_vm8 = vcmp.ne.f32.partialorder %v6832_v32, %v6832_v32 }
 0x231   :  { %v2677_v55 = vmul.f32 %v3513_v9, %v6606_v39  ;;  %v2298_v25 = vadd.f32 %v2066_v19, %v250_v38  ;;  %3530 = vlog2.f32 %v2085_v10  ;;  %v251_v39 = vmax.f32 %v6778_v40, 0.0 }
 0x232   :  { %3532 = vpow2.f32 %v1016_v42  ;;  %vm7065_vm9 = vcmp.lt.f32.partialorder %v2082_v11, 0.0004427343  ;;  %v771_v18 = vsub.f32 0.0, %v643_v20  ;;  %v2089_v17 = vadd.f32 1.0, %v2088_v30  ;;  %v7085_v42 = vld [vmem:[%s7324_s0 + $0x3e8] sm:$0xff] }
 0x233   :  { %v3515_v63 = vpop.eup %3514  ;;  %2805 = vst [vmem:[%s7325_s1 + $0x368] sm:$0xff] %v2677_v55  ;;  %v2426_v22 = vsel %vm378_vm5, %v6750_v53, %v2298_v25  ;;  %v2091_v56 = vand.u32 2147483647, %v7001_v28  ;;  %v2081_v26 = vmul.f32 %v6971_v48, %v2080_v44  ;;  %v644_v49 = vand.u32 2147483647, %v7059_v23 }
 0x234   :  { %v7037_v14 = vpop.eup %3516  ;;  %v2678_v3 = vmul.f32 %v3515_v63, %v6632_v6  ;;  %3534 = vtanh.f32 %v2426_v22  ;;  %v1022_v61 = vmul.f32 1.442695, %v771_v18  ;;  %v253_v21 = vmax.f32 %v6860_v29, 0.0  ;;  %v7146_v18 = vld [vmem:[%s7324_s0 + $0x3f8] sm:$0xff] }
 0x235   :  { %v3519_v43 = vpop.eup %3518  ;;  %v2094_v0 = vadd.f32 1.0, %v7037_v14  ;;  %3536 = vpow2.f32 %v1018_v34  ;;  %v2097_v2 = vmul.f32 -0.5, %v7037_v14  ;;  %v772_v27 = vsub.f32 0.0, %v644_v49 }
 0x236   :  { %v3521_v36 = vpop.eup %3520  ;;  %2806 = vst [vmem:[%s7325_s1 + $0x370] sm:$0xff] %v2678_v3  ;;  %v2069_v6 = vmul.f32 0.6931472, %v3519_v43  ;;  %vm7092_vm10 = vcmp.lt.f32.partialorder %v2091_v56, 0.0004427343  ;;  %vm381_vm11 = vcmp.ne.f32.partialorder %v6860_v29, %v6860_v29  ;;  %vm382_vm13 = vcmp.ne.f32.partialorder %v6900_v8, %v6900_v8 }
 0x237   :  { %v2679_v46 = vmul.f32 %v3521_v36, %v6664_v51  ;;  %3538 = vlog2.f32 %v2094_v0  ;;  %v7061_v59 = vpop.eup %3522  ;;  %v1020_v51 = vmul.f32 1.442695, %v770_v24  ;;  %v1024_v25 = vmul.f32 1.442695, %v772_v27 }
 0x238   :  { %v2075_v41 = vsel %vm7042_vm7, %v2072_v16, %v2069_v6  ;;  %v2103_v60 = vadd.f32 1.0, %v7061_v59  ;;  %v3525_v54 = vpop.eup %3524  ;;  %v2106_v19 = vmul.f32 -0.5, %v7061_v59  ;;  %v645_v37 = vand.u32 2147483647, %v7085_v42 }
 0x239   :  { %2807 = vst [vmem:[%s7325_s1 + $0x378] sm:$0xff] %v2679_v46  ;;  %v2299_v57 = vadd.f32 %v2075_v41, %v251_v39  ;;  %3540 = vpow2.f32 %v1020_v51  ;;  %v3527_v62 = vpop.eup %3526  ;;  %v2680_v38 = vmul.f32 %v3525_v54, %v6717_v4  ;;  %v2090_v4 = vmul.f32 %v7001_v28, %v2089_v17  ;;  %v7104_v28 = vld [vmem:[%s7324_s0 + $0x3f0] sm:$0xff] }
 0x23a   :  { %3542 = vlog2.f32 %v2103_v60  ;;  %v2078_v48 = vmul.f32 0.6931472, %v3527_v62  ;;  %v2098_v22 = vadd.f32 1.0, %v2097_v2  ;;  %v773_v11 = vsub.f32 0.0, %v645_v37 }
 0x23b   :  { %v2427_v47 = vsel %vm379_vm6, %v6778_v40, %v2299_v57  ;;  %v3529_v10 = vpop.eup %3528  ;;  %2808 = vst [vmem:[%s7325_s1 + $0x380] sm:$0xff] %v2680_v38  ;;  %v646_v43 = vand.u32 2147483647, %v7104_v28  ;;  %v2107_v36 = vadd.f32 1.0, %v2106_v19  ;;  %v254_v6 = vmax.f32 %v6900_v8, 0.0 }
 0x23c   :  { %3544 = vtanh.f32 %v2427_v47  ;;  %v2681_v7 = vmul.f32 %v3529_v10, %v6735_v13  ;;  %v2084_v55 = vsel %vm7065_vm9, %v2081_v26, %v2078_v48  ;;  %v2100_v13 = vand.u32 2147483647, %v7037_v14 }
 0x23d   :  { %3546 = vpow2.f32 %v1022_v61  ;;  %v2300_v34 = vadd.f32 %v2084_v55, %v252_v50  ;;  %v2099_v44 = vmul.f32 %v7037_v14, %v2098_v22  ;;  %v2109_v50 = vand.u32 2147483647, %v7061_v59 }
 0x23e   :  { %v3531_v35 = vpop.eup %3530  ;;  %2809 = vst [vmem:[%s7325_s1 + $0x388] sm:$0xff] %v2681_v7  ;;  %3548 = vpow2.f32 %v1024_v25  ;;  %vm7135_vm12 = vcmp.lt.f32.partialorder %v2100_v13, 0.0004427343  ;;  %v1026_v14 = vmul.f32 1.442695, %v773_v11  ;;  %v774_v33 = vsub.f32 0.0, %v646_v43 }
 0x23f   :  { %v7106_v58 = vpop.eup %3532  ;;  %v2087_v63 = vmul.f32 0.6931472, %v3531_v35  ;;  %v2428_v3 = vsel %vm380_vm8, %v6832_v32, %v2300_v34  ;;  %v2108_v51 = vmul.f32 %v7061_v59, %v2107_v36  ;;  %v255_v61 = vmax.f32 %v6920_v45, 0.0 }
 0x240   :  { %v2112_v39 = vadd.f32 1.0, %v7106_v58  ;;  %3550 = vtanh.f32 %v2428_v3  ;;  %v2115_v56 = vmul.f32 -0.5, %v7106_v58  ;;  %v1028_v60 = vmul.f32 1.442695, %v774_v33 }
 0x241   :  { %v3535_v52 = vpop.eup %3534  ;;  %v2093_v16 = vsel %vm7092_vm10, %v2090_v4, %v2087_v63  ;;  %vm7154_vm14 = vcmp.lt.f32.partialorder %v2109_v50, 0.0004427343  ;;  %vm383_vm15 = vcmp.ne.f32.partialorder %v6920_v45, %v6920_v45  ;;  %v647_v47 = vand.u32 2147483647, %v7146_v18 }
 0x242   :  { %v7122_v5 = vpop.eup %3536  ;;  %v2682_v30 = vmul.f32 %v3535_v52, %v6750_v53  ;;  %v2301_v0 = vadd.f32 %v2093_v16, %v253_v21  ;;  %3552 = vlog2.f32 %v2112_v39  ;;  %v2116_v4 = vadd.f32 1.0, %v2115_v56 }
 0x243   :  { %v2121_v24 = vadd.f32 1.0, %v7122_v5  ;;  %v2124_v27 = vmul.f32 -0.5, %v7122_v5  ;;  %v2118_v19 = vand.u32 2147483647, %v7106_v58  ;;  %v775_v7 = vsub.f32 0.0, %v647_v47 }
 0x244   :  { %v3539_v20 = vpop.eup %3538  ;;  %2810 = vst [vmem:[%s7325_s1 + $0x390] sm:$0xff] %v2682_v30  ;;  %v2429_v53 = vsel %vm381_vm11, %v6860_v29, %v2301_v0  ;;  %v2117_v22 = vmul.f32 %v7106_v58, %v2116_v4  ;;  %v2127_v13 = vand.u32 2147483647, %v7122_v5  ;;  %v256_v16 = vmax.f32 %v6937_v1, 0.0 }
 0x245   :  { %3554 = vtanh.f32 %v2429_v53  ;;  %v2096_v41 = vmul.f32 0.6931472, %v3539_v20  ;;  %v2125_v25 = vadd.f32 1.0, %v2124_v27  ;;  %v1030_v39 = vmul.f32 1.442695, %v775_v7 }
 0x246   :  { %3556 = vlog2.f32 %v2121_v24  ;;  %v7148_v57 = vpop.eup %3540  ;;  %vm7189_vm0 = vcmp.lt.f32.partialorder %v2118_v19, 0.0004427343  ;;  %vm384_vm1 = vcmp.ne.f32.partialorder %v6937_v1, %v6937_v1  ;;  %vm7204_vm2 = vcmp.lt.f32.partialorder %v2127_v13, 0.0004427343 }
 0x247   :  { %v2102_v17 = vsel %vm7135_vm12, %v2099_v44, %v2096_v41  ;;  %3558 = vpow2.f32 %v1026_v14  ;;  %v3543_v54 = vpop.eup %3542  ;;  %v2130_v49 = vadd.f32 1.0, %v7148_v57  ;;  %v2133_v37 = vmul.f32 -0.5, %v7148_v57 }
 0x248   :  { %v2302_v26 = vadd.f32 %v2102_v17, %v254_v6  ;;  %v2105_v38 = vmul.f32 0.6931472, %v3543_v54  ;;  %3560 = vpow2.f32 %v1028_v60  ;;  %v2126_v58 = vmul.f32 %v7122_v5, %v2125_v25 }
 0x249   :  { %v3545_v62 = vpop.eup %3544  ;;  %3562 = vlog2.f32 %v2130_v49  ;;  %v2134_v36 = vadd.f32 1.0, %v2133_v37  ;;  %v2136_v53 = vand.u32 2147483647, %v7148_v57  ;;  %vm385_vm3 = vcmp.ne.f32.partialorder %v6984_v15, %v6984_v15 }
 0x24a   :  { %v7162_v2 = vpop.eup %3546  ;;  %v2683_v48 = vmul.f32 %v3545_v62, %v6778_v40  ;;  %v2430_v21 = vsel %vm382_vm13, %v6900_v8, %v2302_v26  ;;  %v2111_v10 = vsel %vm7154_vm14, %v2108_v51, %v2105_v38  ;;  %vm386_vm4 = vcmp.ne.f32.partialorder %v7016_v31, %v7016_v31 }
 0x24b   :  { %3564 = vtanh.f32 %v2430_v21  ;;  %v2139_v9 = vadd.f32 1.0, %v7162_v2  ;;  %v2303_v40 = vadd.f32 %v2111_v10, %v255_v61  ;;  %v7177_v35 = vpop.eup %3548  ;;  %v2142_v30 = vmul.f32 -0.5, %v7162_v2 }
 0x24c   :  { %2811 = vst [vmem:[%s7325_s1 + $0x398] sm:$0xff] %v2683_v48  ;;  %v2148_v34 = vadd.f32 1.0, %v7177_v35  ;;  %v2151_v41 = vmul.f32 -0.5, %v7177_v35  ;;  %v2135_v60 = vmul.f32 %v7148_v57, %v2134_v36  ;;  %v2145_v54 = vand.u32 2147483647, %v7162_v2 }
 0x24d   :  { %3566 = vlog2.f32 %v2139_v9  ;;  %v2431_v55 = vsel %vm383_vm15, %v6920_v45, %v2303_v40  ;;  %v3551_v63 = vpop.eup %3550  ;;  %v2143_v5 = vadd.f32 1.0, %v2142_v30  ;;  %vm7231_vm5 = vcmp.lt.f32.partialorder %v2136_v53, 0.0004427343 }
 0x24e   :  { %3568 = vtanh.f32 %v2431_v55  ;;  %v2684_v3 = vmul.f32 %v3551_v63, %v6832_v32  ;;  %v257_v32 = vmax.f32 %v6984_v15, 0.0  ;;  %v2152_v38 = vadd.f32 1.0, %v2151_v41 }
 0x24f   :  { %v3553_v52 = vpop.eup %3552  ;;  %3570 = vlog2.f32 %v2148_v34  ;;  %v2144_v21 = vmul.f32 %v7162_v2, %v2143_v5  ;;  %v2154_v27 = vand.u32 2147483647, %v7177_v35  ;;  %v259_v9 = vmax.f32 %v7035_v12, 0.0 }
 0x250   :  { %v2114_v43 = vmul.f32 0.6931472, %v3553_v52  ;;  %3572 = vpow2.f32 %v1030_v39  ;;  %2812 = vst [vmem:[%s7325_s1 + $0x3a0] sm:$0xff] %v2684_v3  ;;  %vm7246_vm6 = vcmp.lt.f32.partialorder %v2145_v54, 0.0004427343  ;;  %vm387_vm7 = vcmp.ne.f32.partialorder %v7035_v12, %v7035_v12 }
 0x251   :  { %v260_v7 = vmax.f32 %v7059_v23, 0.0  ;;  %v2153_v55 = vmul.f32 %v7177_v35, %v2152_v38  ;;  %vm2155_vm8 = vcmp.lt.f32.partialorder %v2154_v27, 0.0004427343  ;;  %vm388_vm9 = vcmp.ne.f32.partialorder %v7059_v23, %v7059_v23 }
 0x252   :  { %v3555_v0 = vpop.eup %3554  ;;  %v2120_v24 = vsel %vm7189_vm0, %v2117_v22, %v2114_v43  ;;  %v261_v20 = vmax.f32 %v7085_v42, 0.0  ;;  %vm389_vm11 = vcmp.ne.f32.partialorder %v7085_v42, %v7085_v42  ;;  %vm390_vm13 = vcmp.ne.f32.partialorder %v7104_v28, %v7104_v28 }
 0x253   :  { %v3557_v6 = vpop.eup %3556  ;;  %v2685_v44 = vmul.f32 %v3555_v0, %v6860_v29  ;;  %v2304_v50 = vadd.f32 %v2120_v24, %v256_v16  ;;  %v258_v29 = vmax.f32 %v7016_v31, 0.0  ;;  %vm391_vm15 = vcmp.ne.f32.partialorder %v7146_v18, %v7146_v18 }
 0x254   :  { %v7209_v46 = vpop.eup %3558  ;;  %v2123_v14 = vmul.f32 0.6931472, %v3557_v6 }
 0x255   :  { %2813 = vst [vmem:[%s7325_s1 + $0x3a8] sm:$0xff] %v2685_v44  ;;  %v2157_v33 = vadd.f32 1.0, %v7209_v46  ;;  %v7219_v51 = vpop.eup %3560  ;;  %v2432_v17 = vsel %vm384_vm1, %v6937_v1, %v2304_v50  ;;  %v2160_v25 = vmul.f32 -0.5, %v7209_v46  ;;  %v2163_v30 = vand.u32 2147483647, %v7209_v46 }
 0x256   :  { %v2129_v56 = vsel %vm7204_vm2, %v2126_v58, %v2123_v14  ;;  %v3563_v26 = vpop.eup %3562  ;;  %3574 = vtanh.f32 %v2432_v17  ;;  %v2166_v47 = vadd.f32 1.0, %v7219_v51  ;;  %v2169_v35 = vmul.f32 -0.5, %v7219_v51 }
 0x257   :  { %v2305_v61 = vadd.f32 %v2129_v56, %v257_v32  ;;  %v2132_v62 = vmul.f32 0.6931472, %v3563_v26  ;;  %3576 = vlog2.f32 %v2157_v33  ;;  %v2161_v11 = vadd.f32 1.0, %v2160_v25 }
 0x258   :  { %v3565_v49 = vpop.eup %3564  ;;  %v2170_v32 = vadd.f32 1.0, %v2169_v35  ;;  %v2172_v6 = vand.u32 2147483647, %v7219_v51  ;;  %vm2164_vm10 = vcmp.lt.f32.partialorder %v2163_v30, 0.0004427343 }
 0x259   :  { %v2686_v57 = vmul.f32 %v3565_v49, %v6900_v8  ;;  %v2433_v48 = vsel %vm385_vm3, %v6984_v15, %v2305_v61  ;;  %v2138_v4 = vsel %vm7231_vm5, %v2135_v60, %v2132_v62  ;;  %v2162_v36 = vmul.f32 %v7209_v46, %v2161_v11 }
 0x25a   :  { %v3567_v10 = vpop.eup %3566  ;;  %3578 = vtanh.f32 %v2433_v48  ;;  %v2306_v8 = vadd.f32 %v2138_v4, %v258_v29  ;;  %v2171_v46 = vmul.f32 %v7219_v51, %v2170_v32  ;;  %vm2173_vm12 = vcmp.lt.f32.partialorder %v2172_v6, 0.0004427343 }
 0x25b   :  { %2814 = vst [vmem:[%s7325_s1 + $0x3b0] sm:$0xff] %v2686_v57  ;;  %v2141_v19 = vmul.f32 0.6931472, %v3567_v10  ;;  %3580 = vlog2.f32 %v2166_v47  ;;  %v3569_v2 = vpop.eup %3568  ;;  %v263_v57 = vmax.f32 %v7146_v18, 0.0 }
 0x25c   :  { %v3571_v37 = vpop.eup %3570  ;;  %v2687_v34 = vmul.f32 %v3569_v2, %v6920_v45  ;;  %v2434_v63 = vsel %vm386_vm4, %v7016_v31, %v2306_v8 }
 0x25d   :  { %v2147_v22 = vsel %vm7246_vm6, %v2144_v21, %v2141_v19  ;;  %v3573_v13 = vpop.eup %3572  ;;  %3582 = vtanh.f32 %v2434_v63  ;;  %v2150_v52 = vmul.f32 0.6931472, %v3571_v37 }
 0x25e   :  { %v2307_v39 = vadd.f32 %v2147_v22, %v259_v9  ;;  %2815 = vst [vmem:[%s7325_s1 + $0x3b8] sm:$0xff] %v2687_v34  ;;  %v2175_v45 = vadd.f32 1.0, %v3573_v13  ;;  %v2178_v50 = vmul.f32 -0.5, %v3573_v13  ;;  %v2181_v26 = vand.u32 2147483647, %v3573_v13 }
 0x25f   :  { %v2156_v16 = vsel %vm2155_vm8, %v2153_v55, %v2150_v52 }
 0x260   :  { %v2435_v3 = vsel %vm387_vm7, %v7035_v12, %v2307_v39  ;;  %v2308_v43 = vadd.f32 %v2156_v16, %v260_v7  ;;  %v2179_v56 = vadd.f32 1.0, %v2178_v50  ;;  %vm2182_vm14 = vcmp.lt.f32.partialorder %v2181_v26, 0.0004427343 }
 0x261   :  { %3584 = vtanh.f32 %v2435_v3 }
 0x262   :  { %3586 = vlog2.f32 %v2175_v45  ;;  %v2436_v0 = vsel %vm388_vm9, %v7059_v23, %v2308_v43  ;;  %v2180_v62 = vmul.f32 %v3573_v13, %v2179_v56 }
 0x263   :  { %v3575_v58 = vpop.eup %3574  ;;  %3588 = vtanh.f32 %v2436_v0 }
 0x264   :  { %v3577_v44 = vpop.eup %3576  ;;  %v2688_v24 = vmul.f32 %v3575_v58, %v6937_v1  ;;  %v262_v1 = vmax.f32 %v7104_v28, 0.0 }
 0x265   :  { %v2159_v53 = vmul.f32 0.6931472, %v3577_v44 }
 0x266   :  { %2816 = vst [vmem:[%s7325_s1 + $0x3c0] sm:$0xff] %v2688_v24 }
 0x267   :  { %v3579_v14 = vpop.eup %3578  ;;  %v2165_v5 = vsel %vm2164_vm10, %v2162_v36, %v2159_v53 }
 0x268   :  { %v3581_v41 = vpop.eup %3580  ;;  %v2689_v29 = vmul.f32 %v3579_v14, %v6984_v15  ;;  %v2309_v33 = vadd.f32 %v2165_v5, %v261_v20 }
 0x269   :  { %v2168_v17 = vmul.f32 0.6931472, %v3581_v41 }
 0x26a   :  { %2817 = vst [vmem:[%s7325_s1 + $0x3c8] sm:$0xff] %v2689_v29  ;;  %v3583_v60 = vpop.eup %3582  ;;  %v2437_v54 = vsel %vm389_vm11, %v7085_v42, %v2309_v33 }
 0x26b   :  { %v2174_v51 = vsel %vm2173_vm12, %v2171_v46, %v2168_v17  ;;  %v2690_v15 = vmul.f32 %v3583_v60, %v7016_v31  ;;  %3590 = vtanh.f32 %v2437_v54 }
 0x26c   :  { %v2310_v61 = vadd.f32 %v2174_v51, %v262_v1 }
 0x26d   :  { %2818 = vst [vmem:[%s7325_s1 + $0x3d0] sm:$0xff] %v2690_v15 }
 0x26e   :  { %v3585_v59 = vpop.eup %3584  ;;  %v2438_v49 = vsel %vm390_vm13, %v7104_v28, %v2310_v61 }
 0x26f   :  { %v3587_v38 = vpop.eup %3586  ;;  %v2691_v47 = vmul.f32 %v3585_v59, %v7035_v12  ;;  %3592 = vtanh.f32 %v2438_v49 }
 0x270   :  { %v2177_v48 = vmul.f32 0.6931472, %v3587_v38  ;;  %v3589_v21 = vpop.eup %3588 }
 0x271   :  { %2819 = vst [vmem:[%s7325_s1 + $0x3d8] sm:$0xff] %v2691_v47  ;;  %v2692_v31 = vmul.f32 %v3589_v21, %v7059_v23 }
 0x272   :  { %v2183_v27 = vsel %vm2182_vm14, %v2180_v62, %v2177_v48 }
 0x273   :  { %v2311_v10 = vadd.f32 %v2183_v27, %v263_v57  ;;  %2820 = vst [vmem:[%s7325_s1 + $0x3e0] sm:$0xff] %v2692_v31 }
 0x275   :  { %v2439_v12 = vsel %vm391_vm15, %v7146_v18, %v2311_v10 }
 0x276   :  { %3594 = vtanh.f32 %v2439_v12 }
 0x278   :  { %v3591_v4 = vpop.eup %3590 }
 0x279   :  { %v2693_v9 = vmul.f32 %v3591_v4, %v7085_v42 }
 0x27b   :  { %2821 = vst [vmem:[%s7325_s1 + $0x3e8] sm:$0xff] %v2693_v9 }
 0x27c   :  { %v3593_v40 = vpop.eup %3592 }
 0x27d   :  { %v2694_v23 = vmul.f32 %v3593_v40, %v7104_v28 }
 0x27f   :  { %2822 = vst [vmem:[%s7325_s1 + $0x3f0] sm:$0xff] %v2694_v23 }
 0x283   :  { %v3595_v8 = vpop.eup %3594 }
 0x284   :  { %v2695_v19 = vmul.f32 %v3595_v8, %v7146_v18 }
 0x286   :  { %2823 = vst [vmem:[%s7325_s1 + $0x3f8] sm:$0xff] %v2695_v19 }

</bundles_post_ra>
